<compile_context>
chip_gen: v5e
topology: v5e:2x2
jax: 0.10.0
libtpu: 0.0.40
codegen_flags: <defaults>
</compile_context>

<pallas_src>
import jax
import jax.numpy as jnp
from jax.experimental import pallas as pl
from jax.experimental.pallas import tpu as pltpu


# ----------------------------------------------------------------------------
# Constants
# ----------------------------------------------------------------------------
N_FEAT = 1000        # backbone output features (logical)
N_OUT = 100          # top_layers output classes (logical)
N_FEAT_PAD = 1024    # lane-padded (multiple of 128)
N_OUT_PAD = 128      # lane-padded (multiple of 128)
K_ALIGN = 512        # K padding granularity
TK_MAX = 2048        # max K-tile for streaming the backbone weight
TB_MAX = 256         # max batch tile (rows per grid step / per core)
SUBLANE = 8          # minimum sublane-aligned batch


def _round_up(x, m):
    return (x + m - 1) // m * m


def _choose_tk(k_pad):
    """Largest multiple of K_ALIGN that divides k_pad and is <= TK_MAX."""
    best = K_ALIGN
    tk = K_ALIGN
    while tk <= min(k_pad, TK_MAX):
        if k_pad % tk == 0:
            best = tk
        tk += K_ALIGN
    return best


# ----------------------------------------------------------------------------
# Fused Pallas kernel
# ----------------------------------------------------------------------------
def _fused_kernel(x_ref, bbw_ref, bbb_ref, topw_ref, topb_ref, o_ref, acc_ref):
    """grid = (b_pad // TB, k_pad // TK); ("parallel", "arbitrary").

    Per K step: accumulate one K-slab of the backbone matmul (bf16 MXU, f32 acc).
    Step 0 seeds the accumulator with (product + backbone bias).
    Last K step: ReLU -> Linear(1000,100) -> LogSoftmax epilogue; the top-layer
    weights/biases use constant index_maps so they stay VMEM-resident.
    """
    k = pl.program_id(1)

    prod = jnp.dot(x_ref[...], bbw_ref[...], preferred_element_type=jnp.float32)

    @pl.when(k == 0)
    def _():
        acc_ref[...] = prod + bbb_ref[...]

    @pl.when(k != 0)
    def _():
        acc_ref[...] += prod

    @pl.when(k == pl.num_programs(1) - 1)
    def _():
        # ReLU in f32 (bias already folded into the accumulator on step 0).
        feats = jnp.maximum(acc_ref[...], 0.0)
        # Linear(1000,100) on the MXU (bf16 in, f32 out).
        logits = jnp.dot(feats.astype(jnp.bfloat16), topw_ref[...],
                         preferred_element_type=jnp.float32) + topb_ref[...]
        # Mask the padded logit lanes (cols >= N_OUT) before LogSoftmax.
        col = jax.lax.broadcasted_iota(jnp.int32, logits.shape, 1)
        logits = jnp.where(col < N_OUT, logits, -jnp.inf)
        # Numerically stable LogSoftmax (all f32).
        m = jnp.max(logits, axis=-1, keepdims=True)
        shifted = logits - m
        lse = jnp.log(jnp.sum(jnp.exp(shifted), axis=-1, keepdims=True))
        o_ref[...] = shifted - lse


def _fused_forward_pallas(x_pad, bb_w, bb_b, top_w, top_b, tb, tk):
    b_pad, k_pad = x_pad.shape
    assert k_pad % tk == 0 and b_pad % tb == 0
    grid = (b_pad // tb, k_pad // tk)

    return pl.pallas_call(
        _fused_kernel,
        out_shape=jax.ShapeDtypeStruct((b_pad, N_OUT_PAD), jnp.float32),
        grid_spec=pltpu.PrefetchScalarGridSpec(
            num_scalar_prefetch=0,
            grid=grid,
            in_specs=[
                pl.BlockSpec((tb, tk), lambda i, k: (i, k)),                  # x tile
                pl.BlockSpec((tk, N_FEAT_PAD), lambda i, k: (k, 0)),          # bb_w (streamed)
                pl.BlockSpec((1, N_FEAT_PAD), lambda i, k: (0, 0)),           # bb_b (resident)
                pl.BlockSpec((N_FEAT_PAD, N_OUT_PAD), lambda i, k: (0, 0)),   # top_w (resident)
                pl.BlockSpec((1, N_OUT_PAD), lambda i, k: (0, 0)),            # top_b (resident)
            ],
            out_specs=pl.BlockSpec((tb, N_OUT_PAD), lambda i, k: (i, 0)),
            scratch_shapes=[pltpu.VMEM((tb, N_FEAT_PAD), jnp.float32)],
        ),
        compiler_params=pltpu.CompilerParams(
            # batch tiles independent (megacore-shardable on v7x); K is the reduction.
            dimension_semantics=("parallel", "arbitrary"),
            vmem_limit_bytes=32 * 1024 * 1024,   # well within v7x's 64 MiB/TC
        ),
    )(x_pad, bb_w, bb_b, top_w, top_b)


# ----------------------------------------------------------------------------
# Glue (plain JAX): upsample, padding, parameter init
# ----------------------------------------------------------------------------
def _nearest_upsample(x, out_hw):
    # nn.Upsample(size=(34,34)), default mode='nearest'
    # (PyTorch: src_idx = floor(dst_idx * in / out)).  Single fused gather.
    _, _, H, W = x.shape
    oh, ow = out_hw
    rows = jnp.floor(jnp.arange(oh) * (H / oh)).astype(jnp.int32)
    cols = jnp.floor(jnp.arange(ow) * (W / ow)).astype(jnp.int32)
    return x[:, :, rows[:, None], cols[None, :]]


def init_params(key, in_features):
    k1, k2, k3, k4 = jax.random.split(key, 4)
    k_pad = _round_up(in_features, K_ALIGN)
    tk = _choose_tk(k_pad)

    bb_w = jax.random.normal(k1, (in_features, N_FEAT), jnp.float32) * 0.02
    bb_b = jax.random.normal(k2, (N_FEAT,), jnp.float32) * 0.02
    top_w = jax.random.normal(k3, (N_FEAT, N_OUT), jnp.float32) * 0.02
    top_b = jax.random.normal(k4, (N_OUT,), jnp.float32) * 0.02

    # Pad once at init to tile-/lane-aligned shapes.  Weights -> bf16 (MXU native,
    # halves HBM weight streaming); biases stay f32.  Zero padding keeps the math
    # identical for the logical portion.
    bb_w_pad = jnp.zeros((k_pad, N_FEAT_PAD), jnp.bfloat16)
    bb_w_pad = bb_w_pad.at[:in_features, :N_FEAT].set(bb_w.astype(jnp.bfloat16))
    bb_b_pad = jnp.zeros((1, N_FEAT_PAD), jnp.float32).at[0, :N_FEAT].set(bb_b)
    top_w_pad = jnp.zeros((N_FEAT_PAD, N_OUT_PAD), jnp.bfloat16)
    top_w_pad = top_w_pad.at[:N_FEAT, :N_OUT].set(top_w.astype(jnp.bfloat16))
    top_b_pad = jnp.zeros((1, N_OUT_PAD), jnp.float32).at[0, :N_OUT].set(top_b)

    return {
        "in_features": in_features,
        "k_pad": k_pad,
        "tk": tk,
        "bb_w": bb_w_pad,
        "bb_b": bb_b_pad,
        "top_w": top_w_pad,
        "top_b": top_b_pad,
    }


def my_model_forward(params, x, upscale=False):
    if upscale:
        x = _nearest_upsample(x, (34, 34))
    b = x.shape[0]
    x_flat = x.reshape(b, -1).astype(jnp.float32)
    f_in = x_flat.shape[1]
    assert f_in == params["in_features"], (f_in, params["in_features"])

    # Batch padding / tiling: single tile up to TB_MAX rows, then TB_MAX-row tiles.
    b_pad = _round_up(max(b, SUBLANE), SUBLANE)
    if b_pad > TB_MAX:
        b_pad = _round_up(b_pad, TB_MAX)
        tb = TB_MAX
    else:
        tb = b_pad

    # Pad and pre-cast x to bf16 once in the wrapper (halves the per-step x DMA and
    # removes the per-step cast from the kernel's VALU slot).
    x_pad = jnp.pad(x_flat, ((0, b_pad - b), (0, params["k_pad"] - f_in)))
    x_pad = x_pad.astype(jnp.bfloat16)

    out_pad = _fused_forward_pallas(
        x_pad, params["bb_w"], params["bb_b"], params["top_w"], params["top_b"],
        tb, params["tk"])
    return out_pad[:b, :N_OUT]


def _reference_forward(params, x, upscale=False):
    # Pure-JAX reference with the same (padded, bf16-weight) math.
    if upscale:
        x = _nearest_upsample(x, (34, 34))
    b = x.shape[0]
    x_flat = x.reshape(b, -1).astype(jnp.float32)
    x_flat = jnp.pad(x_flat, ((0, 0), (0, params["k_pad"] - x_flat.shape[1])))
    feats = jnp.dot(x_flat.astype(jnp.bfloat16), params["bb_w"],
                    preferred_element_type=jnp.float32) + params["bb_b"]
    feats = jnp.maximum(feats, 0.0)
    logits = jnp.dot(feats.astype(jnp.bfloat16), params["top_w"],
                     preferred_element_type=jnp.float32) + params["top_b"]
    return jax.nn.log_softmax(logits[:, :N_OUT], axis=1)


# ----------------------------------------------------------------------------
if __name__ == "__main__":
    key = jax.random.PRNGKey(0)
    kx, kp = jax.random.split(key)

    B, C, H, W = 2, 4, 16, 16
    x = jax.random.normal(kx, (B, C, H, W), jnp.float32)

    # --- non-upscale path (backbone sees C*H*W = 1024 features, 1 K step) ---
    params = init_params(kp, C * H * W)
    out = my_model_forward(params, x, upscale=False)
    out = jax.block_until_ready(out)
    assert out.shape == (B, N_OUT), out.shape
    row_sums = jnp.sum(jnp.exp(out), axis=1)
    assert bool(jnp.all(jnp.abs(row_sums - 1.0) < 1e-3)), row_sums
    ref = _reference_forward(params, x, upscale=False)
    assert bool(jnp.max(jnp.abs(out - ref)) < 5e-2), jnp.max(jnp.abs(out - ref))

    # --- upscale path (nn.Upsample((34,34)) -> backbone sees C*34*34 = 4624 features) ---
    params_up = init_params(kp, C * 34 * 34)
    out_up = my_model_forward(params_up, x, upscale=True)
    out_up = jax.block_until_ready(out_up)
    assert out_up.shape == (B, N_OUT), out_up.shape
    row_sums_up = jnp.sum(jnp.exp(out_up), axis=1)
    assert bool(jnp.all(jnp.abs(row_sums_up - 1.0) < 1e-3)), row_sums_up
    ref_up = _reference_forward(params_up, x, upscale=True)
    assert bool(jnp.max(jnp.abs(out_up - ref_up)) < 5e-2), jnp.max(jnp.abs(out_up - ref_up))

    print("KERNEL_OK")
</pallas_src>

<mosaic_0001>
module attributes {stable_mosaic.version = 11 : i64} {
  func.func @_fused_kernel(%arg0: i32, %arg1: i32, %arg2: memref<8x1024xbf16, #tpu.memory_space<vmem>>, %arg3: memref<1024x1024xbf16, #tpu.memory_space<vmem>>, %arg4: memref<1x1024xf32, #tpu.memory_space<vmem>>, %arg5: memref<1024x128xbf16, #tpu.memory_space<vmem>>, %arg6: memref<1x128xf32, #tpu.memory_space<vmem>>, %arg7: memref<8x128xf32, #tpu.memory_space<vmem>>, %arg8: memref<8x1024xf32, #tpu.memory_space<vmem>>) attributes {dimension_semantics = [#tpu.dimension_semantics<parallel>, #tpu.dimension_semantics<arbitrary>], iteration_bounds = array<i64: 1, 1>, scalar_prefetch = 0 : i64, scratch_operands = 1 : i64, tpu.core_type = #tpu.core_type<tc>, window_params = [{transform_indices = @transform_0, window_bounds = array<i64: 8, 1024>}, {transform_indices = @transform_1, window_bounds = array<i64: 1024, 1024>}, {pipeline_mode = #tpu.pipeline_mode<synchronous>, transform_indices = @transform_2, window_bounds = array<i64: 1, 1024>}, {pipeline_mode = #tpu.pipeline_mode<synchronous>, transform_indices = @transform_3, window_bounds = array<i64: 1024, 128>}, {pipeline_mode = #tpu.pipeline_mode<synchronous>, transform_indices = @transform_4, window_bounds = array<i64: 1, 128>}, {transform_indices = @transform_5, window_bounds = array<i64: 8, 128>}]} {
    %c0 = arith.constant 0 : index
    %c0_0 = arith.constant 0 : index
    %0 = vector.load %arg2[%c0, %c0_0] : memref<8x1024xbf16, #tpu.memory_space<vmem>>, vector<8x1024xbf16>
    %c0_1 = arith.constant 0 : index
    %c0_2 = arith.constant 0 : index
    %1 = vector.load %arg3[%c0_1, %c0_2] : memref<1024x1024xbf16, #tpu.memory_space<vmem>>, vector<1024x1024xbf16>
    %cst = arith.constant dense<0.000000e+00> : vector<8x1024xf32>
    %2 = tpu.matmul %0, %1, %cst {dimension_numbers = #tpu.dot_dimension_numbers<[1], [0], [0], [1], [0, 0, 1, 1], [], []>} : vector<8x1024xbf16>, vector<1024x1024xbf16>, vector<8x1024xf32> -> vector<8x1024xf32>
    %c0_i32 = arith.constant 0 : i32
    %3 = arith.cmpi eq, %arg1, %c0_i32 : i32
    %4 = arith.extui %3 : i1 to i32
    %c0_i32_3 = arith.constant 0 : i32
    %5 = arith.cmpi ne, %4, %c0_i32_3 : i32
    scf.if %5 {
      %c0_8 = arith.constant 0 : index
      %c0_9 = arith.constant 0 : index
      %12 = vector.load %arg4[%c0_8, %c0_9] : memref<1x1024xf32, #tpu.memory_space<vmem>>, vector<1x1024xf32>
      %13 = vector.broadcast %12 : vector<1x1024xf32> to vector<8x1024xf32>
      %14 = arith.addf %2, %13 : vector<8x1024xf32>
      %c0_10 = arith.constant 0 : index
      %c0_11 = arith.constant 0 : index
      %15 = vector.load %arg8[%c0_10, %c0_11] : memref<8x1024xf32, #tpu.memory_space<vmem>>, vector<8x1024xf32>
      tpu.vector_store %arg8[%c0_10, %c0_11], %14 {strides = array<i32>} : memref<8x1024xf32, #tpu.memory_space<vmem>>, vector<8x1024xf32>,
    } else {
    }
    %c0_i32_4 = arith.constant 0 : i32
    %6 = arith.cmpi ne, %arg1, %c0_i32_4 : i32
    %7 = arith.extui %6 : i1 to i32
    %c0_i32_5 = arith.constant 0 : i32
    %8 = arith.cmpi ne, %7, %c0_i32_5 : i32
    scf.if %8 {
      %c0_8 = arith.constant 0 : index
      %c0_9 = arith.constant 0 : index
      %12 = vector.load %arg8[%c0_8, %c0_9] : memref<8x1024xf32, #tpu.memory_space<vmem>>, vector<8x1024xf32>
      %13 = arith.addf %12, %2 : vector<8x1024xf32>
      %c0_10 = arith.constant 0 : index
      %c0_11 = arith.constant 0 : index
      %14 = vector.load %arg8[%c0_10, %c0_11] : memref<8x1024xf32, #tpu.memory_space<vmem>>, vector<8x1024xf32>
      tpu.vector_store %arg8[%c0_10, %c0_11], %13 {strides = array<i32>} : memref<8x1024xf32, #tpu.memory_space<vmem>>, vector<8x1024xf32>,
    } else {
    }
    %c0_i32_6 = arith.constant 0 : i32
    %9 = arith.cmpi eq, %arg1, %c0_i32_6 : i32
    %10 = arith.extui %9 : i1 to i32
    %c0_i32_7 = arith.constant 0 : i32
    %11 = arith.cmpi ne, %10, %c0_i32_7 : i32
    scf.if %11 {
      %c0_8 = arith.constant 0 : index
      %c0_9 = arith.constant 0 : index
      %12 = vector.load %arg8[%c0_8, %c0_9] : memref<8x1024xf32, #tpu.memory_space<vmem>>, vector<8x1024xf32>
      %cst_10 = arith.constant 0.000000e+00 : f32
      %13 = vector.broadcast %cst_10 : f32 to vector<8x1024xf32>
      %14 = arith.maximumf %12, %13 : vector<8x1024xf32>
      %15 = arith.truncf %14 : vector<8x1024xf32> to vector<8x1024xbf16>
      %c0_11 = arith.constant 0 : index
      %c0_12 = arith.constant 0 : index
      %16 = vector.load %arg5[%c0_11, %c0_12] : memref<1024x128xbf16, #tpu.memory_space<vmem>>, vector<1024x128xbf16>
      %cst_13 = arith.constant dense<0.000000e+00> : vector<8x128xf32>
      %17 = tpu.matmul %15, %16, %cst_13 {dimension_numbers = #tpu.dot_dimension_numbers<[1], [0], [0], [1], [0, 0, 1, 1], [], []>} : vector<8x1024xbf16>, vector<1024x128xbf16>, vector<8x128xf32> -> vector<8x128xf32>
      %c0_14 = arith.constant 0 : index
      %c0_15 = arith.constant 0 : index
      %18 = vector.load %arg6[%c0_14, %c0_15] : memref<1x128xf32, #tpu.memory_space<vmem>>, vector<1x128xf32>
      %19 = vector.broadcast %18 : vector<1x128xf32> to vector<8x128xf32>
      %20 = arith.addf %17, %19 : vector<8x128xf32>
      %21 = tpu.iota {dimensions = array<i32: 1>} : vector<8x128xi32>
      %c100_i32 = arith.constant 100 : i32
      %22 = vector.broadcast %c100_i32 : i32 to vector<8x128xi32>
      %23 = arith.cmpi slt, %21, %22 : vector<8x128xi32>
      %cst_16 = arith.constant 0xFF800000 : f32
      %24 = vector.broadcast %cst_16 : f32 to vector<8x128xf32>
      %25 = arith.select %23, %20, %24 : vector<8x128xi1>, vector<8x128xf32>
      %cst_17 = arith.constant dense<0xFF800000> : vector<8xf32>
      %26 = vector.multi_reduction <maximumf>, %25, %cst_17 [1] : vector<8x128xf32> to vector<8xf32>
      %27 = vector.shape_cast %26 : vector<8xf32> to vector<8x1xf32>
      %28 = vector.broadcast %27 : vector<8x1xf32> to vector<8x128xf32>
      %29 = arith.subf %25, %28 : vector<8x128xf32>
      %30 = math.exp %29 : vector<8x128xf32>
      %cst_18 = arith.constant dense<0.000000e+00> : vector<8xf32>
      %31 = vector.multi_reduction <add>, %30, %cst_18 [1] : vector<8x128xf32> to vector<8xf32>
      %32 = vector.shape_cast %31 : vector<8xf32> to vector<8x1xf32>
      %33 = math.log %32 : vector<8x1xf32>
      %34 = vector.broadcast %33 : vector<8x1xf32> to vector<8x128xf32>
      %35 = arith.subf %29, %34 : vector<8x128xf32>
      %c0_19 = arith.constant 0 : index
      %c0_20 = arith.constant 0 : index
      %36 = vector.load %arg7[%c0_19, %c0_20] : memref<8x128xf32, #tpu.memory_space<vmem>>, vector<8x128xf32>
      tpu.vector_store %arg7[%c0_19, %c0_20], %35 {strides = array<i32>} : memref<8x128xf32, #tpu.memory_space<vmem>>, vector<8x128xf32>,
    } else {
    }
    return
  }
  func.func @transform_0(%arg0: i32, %arg1: i32) -> (i32, i32) {
    %c0_i32 = arith.constant 0 : i32
    return %arg0, %arg1 : i32, i32
  }
  func.func @transform_1(%arg0: i32, %arg1: i32) -> (i32, i32) {
    %c0_i32 = arith.constant 0 : i32
    %c0_i32_0 = arith.constant 0 : i32
    return %arg1, %c0_i32 : i32, i32
  }
  func.func @transform_2(%arg0: i32, %arg1: i32) -> (i32, i32) {
    %c0_i32 = arith.constant 0 : i32
    %c0_i32_0 = arith.constant 0 : i32
    %c0_i32_1 = arith.constant 0 : i32
    return %c0_i32, %c0_i32_0 : i32, i32
  }
  func.func @transform_3(%arg0: i32, %arg1: i32) -> (i32, i32) {
    %c0_i32 = arith.constant 0 : i32
    %c0_i32_0 = arith.constant 0 : i32
    %c0_i32_1 = arith.constant 0 : i32
    return %c0_i32, %c0_i32_0 : i32, i32
  }
  func.func @transform_4(%arg0: i32, %arg1: i32) -> (i32, i32) {
    %c0_i32 = arith.constant 0 : i32
    %c0_i32_0 = arith.constant 0 : i32
    %c0_i32_1 = arith.constant 0 : i32
    return %c0_i32, %c0_i32_0 : i32, i32
  }
  func.func @transform_5(%arg0: i32, %arg1: i32) -> (i32, i32) {
    %c0_i32 = arith.constant 0 : i32
    %c0_i32_0 = arith.constant 0 : i32
    return %arg0, %c0_i32 : i32, i32
  }
}

</mosaic_0001>

<bundles_post_ra>
// kernel: tpu_custom_call.1
= control target key start
LH: loop header
LB: loop body
LE: loop exit
PB: predicated region body
PF: predicated region fallthrough
CT: control target
= control target key end

     0   :  { %10 = vsyncpa [#allocation4], 0  ;;  %s8025_s0 = inlined_call_operand.hbm [shape: bf16[8,1024], index: 0, kind: input, shape index: {}]   ;;  %s8026_s1 = inlined_call_operand.hbm [shape: bf16[1024,1024], index: 1, kind: input, shape index: {}]   ;;  %s8027_s2 = inlined_call_operand.hbm [shape: f32[1,1024], index: 2, kind: input, shape index: {}]   ;;  %s8028_s3 = inlined_call_operand.hbm [shape: bf16[1024,128], index: 3, kind: input, shape index: {}]   ;;  %s8029_s4 = inlined_call_operand.hbm [shape: f32[1,128], index: 4, kind: input, shape index: {}]   ;;  %s8030_s5 = inlined_call_operand.hbm [shape: f32[8,128], index: 5, kind: output, shape index: {}]  }
   0x1   :  { %11 = vsyncpa [#allocation7], 0 }
   0x2   :  { %12 = vsyncpa [#allocation10], 0  ;;  %s29_s20 = sshll.u32 %s8026_s1, 4  ;;  %s30_s20 = int_to_ptr.hbm [resolvable:$true] %s29_s20 }
   0x3   :  { %13 = vsyncpa [#allocation5], 0  ;;  %s7823_s21 = smov [#allocation6]   ;;  %s53_s25 = sshll.u32 %s8028_s3, 4  ;;  %s54_s25 = int_to_ptr.hbm [resolvable:$true] %s53_s25 }
   0x4   :  { %s31_s22 = sshll.u32 %s7823_s21, 4  ;;  %s7824_s26 = smov 512   ;;  %s32_s22 = int_to_ptr.vmem [resolvable:$true] %s31_s22 }
   0x5   :  { %s7825_s27 = smov 32   ;;  %s7826_s28 = smov [#allocation9]  }
   0x6   :  { %37 = dma.hbm_to_vmem [thread:$0]  %s30_s20, 65536, %s32_s22, [#allocation7], %s7824_s26, %s7824_s26, %s7825_s27  }
   0x7   :  { %s55_s29 = sshll.u32 %s7826_s28, 4  ;;  %s7827_s30 = smov 64   ;;  %s56_s29 = int_to_ptr.vmem [resolvable:$true] %s55_s29 }
   0x8   :  { %s7828_s6 = smov 4   ;;  %s19_s8 = sshll.u32 %s8025_s0, 4  ;;  %s20_s8 = int_to_ptr.hbm [resolvable:$true] %s19_s8 }
   0x9   :  { %61 = dma.hbm_to_vmem [thread:$0]  %s54_s25, 8192, %s56_s29, [#allocation10], %s7827_s30, %s7827_s30, %s7828_s6  }
   0xa   :  { %s7829_s9 = smov [#allocation3]   ;;  %s43_s12 = sshll.u32 %s8027_s2, 4  ;;  %s44_s12 = int_to_ptr.hbm [resolvable:$true] %s43_s12 }
   0xb   :  { %s21_s10 = sshll.u32 %s7829_s9, 4  ;;  %s7830_s13 = smov [#allocation8]   ;;  %s22_s10 = int_to_ptr.vmem [resolvable:$true] %s21_s10 }
   0xc   :  { %24 = dma.hbm_to_vmem [thread:$0]  %s20_s8, 512, %s22_s10, [#allocation4]  }
   0xd   :  { %s45_s14 = sshll.u32 %s7830_s13, 4  ;;  %s67_s17 = sshll.u32 %s8029_s4, 4  ;;  %s46_s14 = int_to_ptr.vmem [resolvable:$true] %s45_s14  ;;  %s68_s17 = int_to_ptr.hbm [resolvable:$true] %s67_s17 }
   0xe   :  { %48 = dma.hbm_to_vmem [thread:$0]  %s44_s12, 128, %s46_s14, [#allocation7]  }
   0xf   :  { %s7831_s0 = smov [#allocation11]  }
  0x10   :  { %s69_s18 = sshll.u32 %s7831_s0, 4  ;;  %s70_s18 = int_to_ptr.vmem [resolvable:$true] %s69_s18 }
  0x11   :  { %72 = dma.hbm_to_vmem [thread:$0]  %s68_s17, 16, %s70_s18, [#allocation10]  }
  0x12   :  { %7815 = dma.done.wait [#allocation4], 512  }
  0x13   :  { %7816 = vsyncadd [#allocation4], 4294966784 }
  0x14   :  { %7817 = dma.done.wait [#allocation7], 65664  }
  0x15   :  { %7818 = vsyncadd [#allocation7], 4294901632 }
  0x16   :  { %7819 = dma.done.wait [#allocation10], 8208  }
  0x17   :  { %7820 = vsyncadd [#allocation10], 4294959088  ;;  %v5002_v0 = vld [vmem:[#allocation6 + $0x1c0] sm:$0xf]  ;;  %s7832_s2 = smov [#allocation12]   ;;  %s4764_s21 = sshll.u32 %s8030_s5, 4  ;;  %s4765_s21 = int_to_ptr.hbm [resolvable:$true] %s4764_s21 }
  0x18   :  { %v7140_v1 = vld [vmem:[#allocation6 + $0x1dc] sm:$0xf0]  ;;  %s4762_s4 = sshll.u32 %s7832_s2, 4  ;;  %s4763_s4 = int_to_ptr.vmem [resolvable:$true] %s4762_s4 }
  0x19   :  { %v5258_v2 = vld [vmem:[#allocation6 + $0x3c0] sm:$0xf]  ;;  %v5003_v3 = vor.u32 %v7140_v1, %v5002_v0 }
  0x1a   :  { %v7204_v4 = vld [vmem:[#allocation6 + $0x3dc] sm:$0xf0] }
  0x1b   :  { %v5514_v5 = vld [vmem:[#allocation6 + $0x5c0] sm:$0xf]  ;;  %v5259_v7 = vor.u32 %v7204_v4, %v5258_v2  ;;  %3197 = vmatpush.bf16.msra.mxu0 %v5003_v3 }
  0x1c   :  { %v7268_v6 = vld [vmem:[#allocation6 + $0x5dc] sm:$0xf0] }
  0x1d   :  { %v5515_v8 = vor.u32 %v7268_v6, %v5514_v5  ;;  %v5770_v9 = vld [vmem:[#allocation6 + $0x7c0] sm:$0xf]  ;;  %3210 = vmatpush.bf16.msra.mxu1 %v5259_v7 }
  0x1e   :  { %v7332_v10 = vld [vmem:[#allocation6 + $0x7dc] sm:$0xf0] }
  0x1f   :  { %v4970_v11 = vld [vmem:[#allocation6 + $0x180] sm:$0xf]  ;;  %v5771_v12 = vor.u32 %v7332_v10, %v5770_v9  ;;  %3223 = vmatpush.bf16.msra.mxu2 %v5515_v8 }
  0x20   :  { %v7132_v13 = vld [vmem:[#allocation6 + $0x19c] sm:$0xf0] }
  0x21   :  { %v5226_v14 = vld [vmem:[#allocation6 + $0x380] sm:$0xf]  ;;  %v4971_v16 = vor.u32 %v7132_v13, %v4970_v11  ;;  %3236 = vmatpush.bf16.msra.mxu3 %v5771_v12 }
  0x22   :  { %v7196_v15 = vld [vmem:[#allocation6 + $0x39c] sm:$0xf0] }
  0x23   :  { %v5227_v17 = vor.u32 %v7196_v15, %v5226_v14  ;;  %v5482_v18 = vld [vmem:[#allocation6 + $0x580] sm:$0xf]  ;;  %3198 = vmatpush.bf16.msra.mxu0 %v4971_v16 }
  0x24   :  { %v7260_v19 = vld [vmem:[#allocation6 + $0x59c] sm:$0xf0] }
  0x25   :  { %v5738_v20 = vld [vmem:[#allocation6 + $0x780] sm:$0xf]  ;;  %v5483_v21 = vor.u32 %v7260_v19, %v5482_v18  ;;  %3211 = vmatpush.bf16.msra.mxu1 %v5227_v17 }
  0x26   :  { %v7324_v22 = vld [vmem:[#allocation6 + $0x79c] sm:$0xf0] }
  0x27   :  { %v4938_v23 = vld [vmem:[#allocation6 + $0x140] sm:$0xf]  ;;  %v5739_v25 = vor.u32 %v7324_v22, %v5738_v20  ;;  %3224 = vmatpush.bf16.msra.mxu2 %v5483_v21 }
  0x28   :  { %v7124_v24 = vld [vmem:[#allocation6 + $0x15c] sm:$0xf0] }
  0x29   :  { %v5194_v26 = vld [vmem:[#allocation6 + $0x340] sm:$0xf]  ;;  %v4939_v29 = vor.u32 %v7124_v24, %v4938_v23  ;;  %3237 = vmatpush.bf16.msra.mxu3 %v5739_v25 }
  0x2a   :  { %v7188_v27 = vld [vmem:[#allocation6 + $0x35c] sm:$0xf0] }
  0x2b   :  { %v5450_v28 = vld [vmem:[#allocation6 + $0x540] sm:$0xf]  ;;  %v5195_v33 = vor.u32 %v7188_v27, %v5194_v26  ;;  %3199 = vmatpush.bf16.msra.mxu0 %v4939_v29 }
  0x2c   :  { %v7252_v30 = vld [vmem:[#allocation6 + $0x55c] sm:$0xf0] }
  0x2d   :  { %v5706_v31 = vld [vmem:[#allocation6 + $0x740] sm:$0xf]  ;;  %v5451_v34 = vor.u32 %v7252_v30, %v5450_v28  ;;  %3212 = vmatpush.bf16.msra.mxu1 %v5195_v33 }
  0x2e   :  { %v7316_v32 = vld [vmem:[#allocation6 + $0x75c] sm:$0xf0] }
  0x2f   :  { %v4906_v35 = vld [vmem:[#allocation6 + $0x100] sm:$0xf]  ;;  %v5707_v38 = vor.u32 %v7316_v32, %v5706_v31  ;;  %3225 = vmatpush.bf16.msra.mxu2 %v5451_v34 }
  0x30   :  { %v7116_v36 = vld [vmem:[#allocation6 + $0x11c] sm:$0xf0] }
  0x31   :  { %v5162_v37 = vld [vmem:[#allocation6 + $0x300] sm:$0xf]  ;;  %v4907_v44 = vor.u32 %v7116_v36, %v4906_v35  ;;  %3238 = vmatpush.bf16.msra.mxu3 %v5707_v38 }
  0x32   :  { %v7180_v39 = vld [vmem:[#allocation6 + $0x31c] sm:$0xf0] }
  0x33   :  { %v5418_v40 = vld [vmem:[#allocation6 + $0x500] sm:$0xf]  ;;  %v5163_v45 = vor.u32 %v7180_v39, %v5162_v37  ;;  %3200 = vmatpush.bf16.msra.mxu0 %v4907_v44 }
  0x34   :  { %v7244_v41 = vld [vmem:[#allocation6 + $0x51c] sm:$0xf0] }
  0x35   :  { %v5674_v42 = vld [vmem:[#allocation6 + $0x700] sm:$0xf]  ;;  %v5419_v46 = vor.u32 %v7244_v41, %v5418_v40  ;;  %3213 = vmatpush.bf16.msra.mxu1 %v5163_v45 }
  0x36   :  { %v7308_v43 = vld [vmem:[#allocation6 + $0x71c] sm:$0xf0] }
  0x37   :  { %v4874_v47 = vld [vmem:[#allocation6 + $0xc0] sm:$0xf]  ;;  %v5675_v50 = vor.u32 %v7308_v43, %v5674_v42  ;;  %3226 = vmatpush.bf16.msra.mxu2 %v5419_v46 }
  0x38   :  { %v7108_v48 = vld [vmem:[#allocation6 + $0xdc] sm:$0xf0] }
  0x39   :  { %v5130_v49 = vld [vmem:[#allocation6 + $0x2c0] sm:$0xf]  ;;  %v4875_v56 = vor.u32 %v7108_v48, %v4874_v47  ;;  %3239 = vmatpush.bf16.msra.mxu3 %v5675_v50 }
  0x3a   :  { %v7172_v51 = vld [vmem:[#allocation6 + $0x2dc] sm:$0xf0] }
  0x3b   :  { %v5386_v52 = vld [vmem:[#allocation6 + $0x4c0] sm:$0xf]  ;;  %v5131_v57 = vor.u32 %v7172_v51, %v5130_v49  ;;  %3201 = vmatpush.bf16.msra.mxu0 %v4875_v56 }
  0x3c   :  { %v7236_v53 = vld [vmem:[#allocation6 + $0x4dc] sm:$0xf0] }
  0x3d   :  { %v5642_v54 = vld [vmem:[#allocation6 + $0x6c0] sm:$0xf]  ;;  %v5387_v58 = vor.u32 %v7236_v53, %v5386_v52  ;;  %3214 = vmatpush.bf16.msra.mxu1 %v5131_v57 }
  0x3e   :  { %v7300_v55 = vld [vmem:[#allocation6 + $0x6dc] sm:$0xf0] }
  0x3f   :  { %v4842_v59 = vld [vmem:[#allocation6 + $0x80] sm:$0xf]  ;;  %v5643_v62 = vor.u32 %v7300_v55, %v5642_v54  ;;  %3227 = vmatpush.bf16.msra.mxu2 %v5387_v58  ;;  %v94_v58 = vld [vmem:[#allocation3 + $0x8] sm:$0xff] }
  0x40   :  { %v7100_v60 = vld [vmem:[#allocation6 + $0x9c] sm:$0xf0] }
  0x41   :  { %v5098_v61 = vld [vmem:[#allocation6 + $0x280] sm:$0xf]  ;;  %v4843_v4 = vor.u32 %v7100_v60, %v4842_v59  ;;  %3240 = vmatpush.bf16.msra.mxu3 %v5643_v62 }
  0x42   :  { %v7164_v63 = vld [vmem:[#allocation6 + $0x29c] sm:$0xf0] }
  0x43   :  { %v5354_v0 = vld [vmem:[#allocation6 + $0x480] sm:$0xf]  ;;  %v5099_v5 = vor.u32 %v7164_v63, %v5098_v61  ;;  %3202 = vmatpush.bf16.msra.mxu0 %v4843_v4  ;;  %v615_v63 = vunpack.c.l.b16 %v94_v58 }
  0x44   :  { %v7228_v1 = vld [vmem:[#allocation6 + $0x49c] sm:$0xf0] }
  0x45   :  { %v5610_v2 = vld [vmem:[#allocation6 + $0x680] sm:$0xf]  ;;  %v5355_v6 = vor.u32 %v7228_v1, %v5354_v0  ;;  %3215 = vmatpush.bf16.msra.mxu1 %v5099_v5  ;;  %v616_v0 = vunpack.c.h.b16 %v94_v58  ;;  %v7878_v4 = vpack.c.b16 %v615_v63, %v615_v63 }
  0x46   :  { %v7292_v3 = vld [vmem:[#allocation6 + $0x69c] sm:$0xf0] }
  0x47   :  { %v4810_v7 = vld [vmem:[#allocation6 + $0x40] sm:$0xf]  ;;  %v5611_v10 = vor.u32 %v7292_v3, %v5610_v2  ;;  %3228 = vmatpush.bf16.msra.mxu2 %v5355_v6  ;;  %v7880_v6 = vpack.c.b16 %v616_v0, %v616_v0 }
  0x48   :  { %v7092_v8 = vld [vmem:[#allocation6 + $0x5c] sm:$0xf0] }
  0x49   :  { %v5066_v9 = vld [vmem:[#allocation6 + $0x240] sm:$0xf]  ;;  %v4811_v16 = vor.u32 %v7092_v8, %v4810_v7  ;;  %3241 = vmatpush.bf16.msra.mxu3 %v5611_v10 }
  0x4a   :  { %v7156_v11 = vld [vmem:[#allocation6 + $0x25c] sm:$0xf0] }
  0x4b   :  { %v5322_v12 = vld [vmem:[#allocation6 + $0x440] sm:$0xf]  ;;  %v5067_v19 = vor.u32 %v7156_v11, %v5066_v9  ;;  %3203 = vmatpush.bf16.msra.mxu0 %v4811_v16 }
  0x4c   :  { %v7220_v13 = vld [vmem:[#allocation6 + $0x45c] sm:$0xf0] }
  0x4d   :  { %v5578_v14 = vld [vmem:[#allocation6 + $0x640] sm:$0xf]  ;;  %v5323_v20 = vor.u32 %v7220_v13, %v5322_v12  ;;  %3216 = vmatpush.bf16.msra.mxu1 %v5067_v19 }
  0x4e   :  { %v7284_v15 = vld [vmem:[#allocation6 + $0x65c] sm:$0xf0] }
  0x4f   :  { %v4778_v17 = vld [vmem:[#allocation6] sm:$0xf]  ;;  %v5579_v24 = vor.u32 %v7284_v15, %v5578_v14  ;;  %3229 = vmatpush.bf16.msra.mxu2 %v5323_v20 }
  0x50   :  { %v7084_v18 = vld [vmem:[#allocation6 + $0x1c] sm:$0xf0] }
  0x51   :  { %v5034_v21 = vld [vmem:[#allocation6 + $0x200] sm:$0xf]  ;;  %v4779_v31 = vor.u32 %v7084_v18, %v4778_v17  ;;  %3242 = vmatpush.bf16.msra.mxu3 %v5579_v24 }
  0x52   :  { %v7148_v22 = vld [vmem:[#allocation6 + $0x21c] sm:$0xf0] }
  0x53   :  { %v5290_v23 = vld [vmem:[#allocation6 + $0x400] sm:$0xf]  ;;  %v5035_v35 = vor.u32 %v7148_v22, %v5034_v21  ;;  %3204 = vmatpush.bf16.msra.mxu0 %v4779_v31 }
  0x54   :  { %v7212_v25 = vld [vmem:[#allocation6 + $0x41c] sm:$0xf0] }
  0x55   :  { %v5546_v26 = vld [vmem:[#allocation6 + $0x600] sm:$0xf]  ;;  %v5291_v36 = vor.u32 %v7212_v25, %v5290_v23  ;;  %3217 = vmatpush.bf16.msra.mxu1 %v5035_v35 }
  0x56   :  { %v7276_v27 = vld [vmem:[#allocation6 + $0x61c] sm:$0xf0] }
  0x57   :  { %v6026_v28 = vld [vmem:[#allocation6 + $0x9c0] sm:$0xf]  ;;  %v5547_v39 = vor.u32 %v7276_v27, %v5546_v26  ;;  %3230 = vmatpush.bf16.msra.mxu2 %v5291_v36 }
  0x58   :  { %v7396_v29 = vld [vmem:[#allocation6 + $0x9dc] sm:$0xf0] }
  0x59   :  { %v6282_v30 = vld [vmem:[#allocation6 + $0xbc0] sm:$0xf]  ;;  %v6027_v40 = vor.u32 %v7396_v29, %v6026_v28  ;;  %3243 = vmatpush.bf16.msra.mxu3 %v5547_v39 }
  0x5a   :  { %v7460_v32 = vld [vmem:[#allocation6 + $0xbdc] sm:$0xf0]  ;;  %3231 = vmatmul.bf16.vlgmr.msra.gmra.mxu2 %v7878_v4 }
  0x5b   :  { %v6538_v33 = vld [vmem:[#allocation6 + $0xdc0] sm:$0xf]  ;;  %v6283_v41 = vor.u32 %v7460_v32, %v6282_v30  ;;  %3249 = vmatpush.bf16.msrb.mxu0 %v6027_v40 }
  0x5c   :  { %v7524_v34 = vld [vmem:[#allocation6 + $0xddc] sm:$0xf0]  ;;  %3244 = vmatmul.bf16.vlgmr.msra.gmra.mxu3 %v7880_v6 }
  0x5d   :  { %v6794_v37 = vld [vmem:[#allocation6 + $0xfc0] sm:$0xf]  ;;  %v6539_v42 = vor.u32 %v7524_v34, %v6538_v33  ;;  %3262 = vmatpush.bf16.msrb.mxu1 %v6283_v41 }
  0x5e   :  { %v7588_v38 = vld [vmem:[#allocation6 + $0xfdc] sm:$0xf0] }
  0x5f   :  { %v5994_v43 = vld [vmem:[#allocation6 + $0x980] sm:$0xf]  ;;  %v6795_v46 = vor.u32 %v7588_v38, %v6794_v37  ;;  %3275 = vmatpush.bf16.msrb.mxu2 %v6539_v42 }
  0x60   :  { %v7388_v44 = vld [vmem:[#allocation6 + $0x99c] sm:$0xf0] }
  0x61   :  { %v6250_v45 = vld [vmem:[#allocation6 + $0xb80] sm:$0xf]  ;;  %v5995_v52 = vor.u32 %v7388_v44, %v5994_v43  ;;  %3288 = vmatpush.bf16.msrb.mxu3 %v6795_v46 }
  0x62   :  { %v7452_v47 = vld [vmem:[#allocation6 + $0xb9c] sm:$0xf0] }
  0x63   :  { %v6506_v48 = vld [vmem:[#allocation6 + $0xd80] sm:$0xf]  ;;  %v6251_v54 = vor.u32 %v7452_v47, %v6250_v45  ;;  %3250 = vmatpush.bf16.msrb.mxu0 %v5995_v52 }
  0x64   :  { %v7516_v49 = vld [vmem:[#allocation6 + $0xd9c] sm:$0xf0] }
  0x65   :  { %v6762_v50 = vld [vmem:[#allocation6 + $0xf80] sm:$0xf]  ;;  %v6507_v55 = vor.u32 %v7516_v49, %v6506_v48  ;;  %3263 = vmatpush.bf16.msrb.mxu1 %v6251_v54 }
  0x66   :  { %v7580_v51 = vld [vmem:[#allocation6 + $0xf9c] sm:$0xf0] }
  0x67   :  { %v5962_v53 = vld [vmem:[#allocation6 + $0x940] sm:$0xf]  ;;  %v6763_v59 = vor.u32 %v7580_v51, %v6762_v50  ;;  %3276 = vmatpush.bf16.msrb.mxu2 %v6507_v55 }
  0x68   :  { %v7380_v56 = vld [vmem:[#allocation6 + $0x95c] sm:$0xf0] }
  0x69   :  { %v6218_v57 = vld [vmem:[#allocation6 + $0xb40] sm:$0xf]  ;;  %v5963_v3 = vor.u32 %v7380_v56, %v5962_v53  ;;  %3289 = vmatpush.bf16.msrb.mxu3 %v6763_v59 }
  0x6a   :  { %v7444_v60 = vld [vmem:[#allocation6 + $0xb5c] sm:$0xf0] }
  0x6b   :  { %v6474_v61 = vld [vmem:[#allocation6 + $0xd40] sm:$0xf]  ;;  %v6219_v7 = vor.u32 %v7444_v60, %v6218_v57  ;;  %3251 = vmatpush.bf16.msrb.mxu0 %v5963_v3  ;;  %v96_v3 = vld [vmem:[#allocation3 + $0x18] sm:$0xff] }
  0x6c   :  { %v7508_v62 = vld [vmem:[#allocation6 + $0xd5c] sm:$0xf0] }
  0x6d   :  { %v6730_v1 = vld [vmem:[#allocation6 + $0xf40] sm:$0xf]  ;;  %v6475_v8 = vor.u32 %v7508_v62, %v6474_v61  ;;  %3264 = vmatpush.bf16.msrb.mxu1 %v6219_v7 }
  0x6e   :  { %v7572_v2 = vld [vmem:[#allocation6 + $0xf5c] sm:$0xf0] }
  0x6f   :  { %v93_v5 = vld [vmem:[#allocation3] sm:$0xff]  ;;  %v6731_v14 = vor.u32 %v7572_v2, %v6730_v1  ;;  %3277 = vmatpush.bf16.msrb.mxu2 %v6475_v8 }
  0x70   :  { %v5930_v9 = vld [vmem:[#allocation6 + $0x900] sm:$0xf]  ;;  %v613_v12 = vunpack.c.l.b16 %v93_v5  ;;  %v614_v13 = vunpack.c.h.b16 %v93_v5 }
  0x71   :  { %v7372_v10 = vld [vmem:[#allocation6 + $0x91c] sm:$0xf0]  ;;  %3290 = vmatpush.bf16.msrb.mxu3 %v6731_v14  ;;  %v5260_v14 = vld [vmem:[#allocation6 + $0x3e0] sm:$0xf0] }
  0x72   :  { %v6186_v11 = vld [vmem:[#allocation6 + $0xb00] sm:$0xf]  ;;  %v7883_v20 = vpack.c.b16 %v613_v12, %v613_v12  ;;  %v7886_v21 = vpack.c.b16 %v614_v13, %v614_v13  ;;  %v5931_v22 = vor.u32 %v7372_v10, %v5930_v9  ;;  %v95_v9 = vld [vmem:[#allocation3 + $0x10] sm:$0xff]  ;;  %v7136_v10 = vld [vmem:[#allocation6 + $0x1c4] sm:$0xf] }
  0x73   :  { %v7436_v15 = vld [vmem:[#allocation6 + $0xb1c] sm:$0xf0]  ;;  %v7200_v12 = vld [vmem:[#allocation6 + $0x3c4] sm:$0xf] }
  0x74   :  { %v6442_v16 = vld [vmem:[#allocation6 + $0xd00] sm:$0xf]  ;;  %v6187_v23 = vor.u32 %v7436_v15, %v6186_v11  ;;  %3205 = vmatmul.bf16.vlgmr.msra.gmra.mxu0 %v7883_v20  ;;  %3218 = vmatmul.bf16.vlgmr.msra.gmra.mxu1 %v7886_v21  ;;  %v5004_v11 = vld [vmem:[#allocation6 + $0x1e0] sm:$0xf0] }
  0x75   :  { %v7500_v17 = vld [vmem:[#allocation6 + $0xd1c] sm:$0xf0]  ;;  %3252 = vmatpush.bf16.msrb.mxu0 %v5931_v22  ;;  %v7264_v15 = vld [vmem:[#allocation6 + $0x5c4] sm:$0xf] }
  0x76   :  { %v6698_v18 = vld [vmem:[#allocation6 + $0xf00] sm:$0xf]  ;;  %v6443_v24 = vor.u32 %v7500_v17, %v6442_v16  ;;  %3265 = vmatpush.bf16.msrb.mxu1 %v6187_v23  ;;  %v5516_v16 = vld [vmem:[#allocation6 + $0x5e0] sm:$0xf0]  ;;  %v619_v17 = vunpack.c.l.b16 %v96_v3 }
  0x77   :  { %v7564_v19 = vld [vmem:[#allocation6 + $0xf1c] sm:$0xf0]  ;;  %v7328_v22 = vld [vmem:[#allocation6 + $0x7c4] sm:$0xf] }
  0x78   :  { %v5898_v25 = vld [vmem:[#allocation6 + $0x8c0] sm:$0xf]  ;;  %v6699_v28 = vor.u32 %v7564_v19, %v6698_v18  ;;  %3278 = vmatpush.bf16.msrb.mxu2 %v6443_v24  ;;  %v5772_v23 = vld [vmem:[#allocation6 + $0x7e0] sm:$0xf0]  ;;  %v617_v24 = vunpack.c.l.b16 %v95_v9 }
  0x79   :  { %v7364_v26 = vld [vmem:[#allocation6 + $0x8dc] sm:$0xf0] }
  0x7a   :  { %v6154_v27 = vld [vmem:[#allocation6 + $0xac0] sm:$0xf]  ;;  %v5899_v34 = vor.u32 %v7364_v26, %v5898_v25  ;;  %3291 = vmatpush.bf16.msrb.mxu3 %v6699_v28  ;;  %v620_v25 = vunpack.c.h.b16 %v96_v3  ;;  %v618_v28 = vunpack.c.h.b16 %v95_v9  ;;  %v5676_v3 = vld [vmem:[#allocation6 + $0x720] sm:$0xf0] }
  0x7b   :  { %v7428_v29 = vld [vmem:[#allocation6 + $0xadc] sm:$0xf0]  ;;  %v7104_v9 = vld [vmem:[#allocation6 + $0xc4] sm:$0xf] }
  0x7c   :  { %v6410_v30 = vld [vmem:[#allocation6 + $0xcc0] sm:$0xf]  ;;  %v6155_v35 = vor.u32 %v7428_v29, %v6154_v27  ;;  %3253 = vmatpush.bf16.msrb.mxu0 %v5899_v34  ;;  %v5007_v27 = vor.u32 %v7136_v10, %v5004_v11  ;;  %v5263_v29 = vor.u32 %v7200_v12, %v5260_v14  ;;  %v5775_v34 = vor.u32 %v7328_v22, %v5772_v23  ;;  %v4876_v10 = vld [vmem:[#allocation6 + $0xe0] sm:$0xf0] }
  0x7d   :  { %v7492_v31 = vld [vmem:[#allocation6 + $0xcdc] sm:$0xf0]  ;;  %v7168_v11 = vld [vmem:[#allocation6 + $0x2c4] sm:$0xf] }
  0x7e   :  { %v6666_v32 = vld [vmem:[#allocation6 + $0xec0] sm:$0xf]  ;;  %v6411_v36 = vor.u32 %v7492_v31, %v6410_v30  ;;  %3266 = vmatpush.bf16.msrb.mxu1 %v6155_v35  ;;  %v5519_v30 = vor.u32 %v7264_v15, %v5516_v16  ;;  %v7128_v31 = vld [vmem:[#allocation6 + $0x184] sm:$0xf] }
  0x7f   :  { %v7556_v33 = vld [vmem:[#allocation6 + $0xedc] sm:$0xf0]  ;;  %v5228_v35 = vld [vmem:[#allocation6 + $0x3a0] sm:$0xf0] }
  0x80   :  { %v5866_v37 = vld [vmem:[#allocation6 + $0x880] sm:$0xf]  ;;  %v6667_v40 = vor.u32 %v7556_v33, %v6666_v32  ;;  %3279 = vmatpush.bf16.msrb.mxu2 %v6411_v36  ;;  %v4972_v32 = vld [vmem:[#allocation6 + $0x1a0] sm:$0xf0] }
  0x81   :  { %v7356_v38 = vld [vmem:[#allocation6 + $0x89c] sm:$0xf0]  ;;  %v7192_v33 = vld [vmem:[#allocation6 + $0x384] sm:$0xf] }
  0x82   :  { %v6122_v39 = vld [vmem:[#allocation6 + $0xa80] sm:$0xf]  ;;  %v5867_v46 = vor.u32 %v7356_v38, %v5866_v37  ;;  %3292 = vmatpush.bf16.msrb.mxu3 %v6667_v40  ;;  %v7256_v36 = vld [vmem:[#allocation6 + $0x584] sm:$0xf]  ;;  %v7890_v38 = vpack.c.b16 %v619_v17, %v619_v17 }
  0x83   :  { %v7420_v41 = vld [vmem:[#allocation6 + $0xa9c] sm:$0xf0]  ;;  %v5484_v37 = vld [vmem:[#allocation6 + $0x5a0] sm:$0xf0] }
  0x84   :  { %v6378_v42 = vld [vmem:[#allocation6 + $0xc80] sm:$0xf]  ;;  %v6123_v47 = vor.u32 %v7420_v41, %v6122_v39  ;;  %3254 = vmatpush.bf16.msrb.mxu0 %v5867_v46  ;;  %v7320_v39 = vld [vmem:[#allocation6 + $0x784] sm:$0xf]  ;;  %v7892_v41 = vpack.c.b16 %v617_v24, %v617_v24  ;;  %v5487_v46 = vor.u32 %v7256_v36, %v5484_v37 }
  0x85   :  { %v7484_v43 = vld [vmem:[#allocation6 + $0xc9c] sm:$0xf0]  ;;  %v5740_v40 = vld [vmem:[#allocation6 + $0x7a0] sm:$0xf0] }
  0x86   :  { %v6634_v44 = vld [vmem:[#allocation6 + $0xe80] sm:$0xf]  ;;  %v6379_v48 = vor.u32 %v7484_v43, %v6378_v42  ;;  %3267 = vmatpush.bf16.msrb.mxu1 %v6123_v47  ;;  %v7894_v42 = vpack.c.b16 %v620_v25, %v620_v25  ;;  %v4975_v43 = vor.u32 %v7128_v31, %v4972_v32  ;;  %v7120_v47 = vld [vmem:[#allocation6 + $0x144] sm:$0xf] }
  0x87   :  { %v7548_v45 = vld [vmem:[#allocation6 + $0xe9c] sm:$0xf0]  ;;  %v7232_v14 = vld [vmem:[#allocation6 + $0x4c4] sm:$0xf] }
  0x88   :  { %v5834_v49 = vld [vmem:[#allocation6 + $0x840] sm:$0xf]  ;;  %v6635_v52 = vor.u32 %v7548_v45, %v6634_v44  ;;  %3280 = vmatpush.bf16.msrb.mxu2 %v6379_v48  ;;  %v7896_v44 = vpack.c.b16 %v618_v28, %v618_v28  ;;  %v5231_v45 = vor.u32 %v7192_v33, %v5228_v35  ;;  %v4940_v48 = vld [vmem:[#allocation6 + $0x160] sm:$0xf0] }
  0x89   :  { %v7348_v50 = vld [vmem:[#allocation6 + $0x85c] sm:$0xf0]  ;;  %v5388_v15 = vld [vmem:[#allocation6 + $0x4e0] sm:$0xf0] }
  0x8a   :  { %v6090_v51 = vld [vmem:[#allocation6 + $0xa40] sm:$0xf]  ;;  %v5835_v59 = vor.u32 %v7348_v50, %v5834_v49  ;;  %3293 = vmatpush.bf16.msrb.mxu3 %v6635_v52  ;;  %v7184_v49 = vld [vmem:[#allocation6 + $0x344] sm:$0xf]  ;;  %v5743_v50 = vor.u32 %v7320_v39, %v5740_v40  ;;  %v5391_v22 = vor.u32 %v7232_v14, %v5388_v15 }
  0x8b   :  { %v7412_v53 = vld [vmem:[#allocation6 + $0xa5c] sm:$0xf0]  ;;  %v7248_v52 = vld [vmem:[#allocation6 + $0x544] sm:$0xf] }
  0x8c   :  { %v6346_v54 = vld [vmem:[#allocation6 + $0xc40] sm:$0xf]  ;;  %v6091_v63 = vor.u32 %v7412_v53, %v6090_v51  ;;  %3255 = vmatpush.bf16.msrb.mxu0 %v5835_v59  ;;  %v5196_v51 = vld [vmem:[#allocation6 + $0x360] sm:$0xf0] }
  0x8d   :  { %v7476_v55 = vld [vmem:[#allocation6 + $0xc5c] sm:$0xf0]  ;;  %v5452_v53 = vld [vmem:[#allocation6 + $0x560] sm:$0xf0] }
  0x8e   :  { %v6602_v56 = vld [vmem:[#allocation6 + $0xe40] sm:$0xf]  ;;  %v6347_v0 = vor.u32 %v7476_v55, %v6346_v54  ;;  %3268 = vmatpush.bf16.msrb.mxu1 %v6091_v63  ;;  %v7312_v54 = vld [vmem:[#allocation6 + $0x744] sm:$0xf] }
  0x8f   :  { %v7540_v57 = vld [vmem:[#allocation6 + $0xe5c] sm:$0xf0]  ;;  %v5708_v55 = vld [vmem:[#allocation6 + $0x760] sm:$0xf0] }
  0x90   :  { %v5802_v58 = vld [vmem:[#allocation6 + $0x800] sm:$0xf]  ;;  %v6603_v5 = vor.u32 %v7540_v57, %v6602_v56  ;;  %3281 = vmatpush.bf16.msrb.mxu2 %v6347_v0  ;;  %v4943_v56 = vor.u32 %v7120_v47, %v4940_v48  ;;  %v5199_v57 = vor.u32 %v7184_v49, %v5196_v51  ;;  %v7112_v59 = vld [vmem:[#allocation6 + $0x104] sm:$0xf] }
  0x91   :  { %v7340_v60 = vld [vmem:[#allocation6 + $0x81c] sm:$0xf0]  ;;  %v5164_v63 = vld [vmem:[#allocation6 + $0x320] sm:$0xf0] }
  0x92   :  { %v6058_v61 = vld [vmem:[#allocation6 + $0xa00] sm:$0xf]  ;;  %v5803_v13 = vor.u32 %v7340_v60, %v5802_v58  ;;  %3294 = vmatpush.bf16.msrb.mxu3 %v6603_v5  ;;  %v5455_v58 = vor.u32 %v7248_v52, %v5452_v53  ;;  %v4908_v60 = vld [vmem:[#allocation6 + $0x120] sm:$0xf0] }
  0x93   :  { %v7404_v62 = vld [vmem:[#allocation6 + $0xa1c] sm:$0xf0]  ;;  %v7240_v0 = vld [vmem:[#allocation6 + $0x504] sm:$0xf]  ;;  %v4911_v5 = vor.u32 %v7112_v59, %v4908_v60 }
  0x94   :  { %v6314_v1 = vld [vmem:[#allocation6 + $0xc00] sm:$0xf]  ;;  %v6059_v18 = vor.u32 %v7404_v62, %v6058_v61  ;;  %3256 = vmatpush.bf16.msrb.mxu0 %v5803_v13  ;;  %v7176_v61 = vld [vmem:[#allocation6 + $0x304] sm:$0xf]  ;;  %v5711_v62 = vor.u32 %v7312_v54, %v5708_v55 }
  0x95   :  { %v7468_v2 = vld [vmem:[#allocation6 + $0xc1c] sm:$0xf0]  ;;  %v5132_v13 = vld [vmem:[#allocation6 + $0x2e0] sm:$0xf0] }
  0x96   :  { %v6570_v7 = vld [vmem:[#allocation6 + $0xe00] sm:$0xf]  ;;  %v6315_v19 = vor.u32 %v7468_v2, %v6314_v1  ;;  %3269 = vmatpush.bf16.msrb.mxu1 %v6059_v18  ;;  %v5420_v1 = vld [vmem:[#allocation6 + $0x520] sm:$0xf0]  ;;  %v4879_v18 = vor.u32 %v7104_v9, %v4876_v10 }
  0x97   :  { %v7532_v8 = vld [vmem:[#allocation6 + $0xe1c] sm:$0xf0]  ;;  %3257 = vmatmul.bf16.vlgmr.msrb.gmra.mxu0 %v7892_v41  ;;  %v7304_v2 = vld [vmem:[#allocation6 + $0x704] sm:$0xf] }
  0x98   :  { %v6571_v26 = vor.u32 %v7532_v8, %v6570_v7  ;;  %3282 = vmatpush.bf16.msrb.mxu2 %v6315_v19  ;;  %3301 = vmatpush.bf16.msra.mxu0 %v5007_v27  ;;  %v5167_v7 = vor.u32 %v7176_v61, %v5164_v63  ;;  %v5423_v8 = vor.u32 %v7240_v0, %v5420_v1  ;;  %v7296_v16 = vld [vmem:[#allocation6 + $0x6c4] sm:$0xf] }
  0x99   :  { %3270 = vmatmul.bf16.vlgmr.msrb.gmra.mxu1 %v7896_v44  ;;  %v5679_v12 = vor.u32 %v7304_v2, %v5676_v3  ;;  %v5644_v17 = vld [vmem:[#allocation6 + $0x6e0] sm:$0xf0]  ;;  %v5135_v19 = vor.u32 %v7168_v11, %v5132_v13 }
  0x9a   :  { %3295 = vmatpush.bf16.msrb.mxu3 %v6571_v26  ;;  %3314 = vmatpush.bf16.msra.mxu1 %v5263_v29  ;;  %v7096_v23 = vld [vmem:[#allocation6 + $0x84] sm:$0xf]  ;;  %v5647_v26 = vor.u32 %v7296_v16, %v5644_v17 }
  0x9b   :  { %3283 = vmatmul.bf16.vlgmr.msrb.gmra.mxu2 %v7890_v38  ;;  %v4844_v24 = vld [vmem:[#allocation6 + $0xa0] sm:$0xf0] }
  0x9c   :  { %3327 = vmatpush.bf16.msra.mxu2 %v5519_v30  ;;  %3302 = vmatpush.bf16.msra.mxu0 %v4975_v43  ;;  %v7160_v25 = vld [vmem:[#allocation6 + $0x284] sm:$0xf]  ;;  %v4847_v32 = vor.u32 %v7096_v23, %v4844_v24 }
  0x9d   :  { %3296 = vmatmul.bf16.vlgmr.msrb.gmra.mxu3 %v7894_v42  ;;  %v5100_v27 = vld [vmem:[#allocation6 + $0x2a0] sm:$0xf0] }
  0x9e   :  { %3340 = vmatpush.bf16.msra.mxu3 %v5775_v34  ;;  %3315 = vmatpush.bf16.msra.mxu1 %v5231_v45  ;;  %v7224_v28 = vld [vmem:[#allocation6 + $0x484] sm:$0xf]  ;;  %v5103_v33 = vor.u32 %v7160_v25, %v5100_v27 }
  0x9f   :  { %v5356_v29 = vld [vmem:[#allocation6 + $0x4a0] sm:$0xf0] }
  0xa0   :  { %3328 = vmatpush.bf16.msra.mxu2 %v5487_v46  ;;  %3303 = vmatpush.bf16.msra.mxu0 %v4943_v56  ;;  %v7288_v30 = vld [vmem:[#allocation6 + $0x684] sm:$0xf]  ;;  %v5359_v34 = vor.u32 %v7224_v28, %v5356_v29 }
  0xa1   :  { %v5612_v31 = vld [vmem:[#allocation6 + $0x6a0] sm:$0xf0] }
  0xa2   :  { %3341 = vmatpush.bf16.msra.mxu3 %v5743_v50  ;;  %3316 = vmatpush.bf16.msra.mxu1 %v5199_v57  ;;  %v7088_v35 = vld [vmem:[#allocation6 + $0x44] sm:$0xf]  ;;  %v5615_v39 = vor.u32 %v7288_v30, %v5612_v31 }
  0xa3   :  { %v4812_v36 = vld [vmem:[#allocation6 + $0x60] sm:$0xf0] }
  0xa4   :  { %3329 = vmatpush.bf16.msra.mxu2 %v5455_v58  ;;  %3304 = vmatpush.bf16.msra.mxu0 %v4911_v5  ;;  %v7152_v37 = vld [vmem:[#allocation6 + $0x244] sm:$0xf]  ;;  %v4815_v48 = vor.u32 %v7088_v35, %v4812_v36 }
  0xa5   :  { %v5068_v40 = vld [vmem:[#allocation6 + $0x260] sm:$0xf0] }
  0xa6   :  { %3342 = vmatpush.bf16.msra.mxu3 %v5711_v62  ;;  %3317 = vmatpush.bf16.msra.mxu1 %v5167_v7  ;;  %v7216_v43 = vld [vmem:[#allocation6 + $0x444] sm:$0xf]  ;;  %v5071_v51 = vor.u32 %v7152_v37, %v5068_v40 }
  0xa7   :  { %v5324_v45 = vld [vmem:[#allocation6 + $0x460] sm:$0xf0] }
  0xa8   :  { %3330 = vmatpush.bf16.msra.mxu2 %v5423_v8  ;;  %3305 = vmatpush.bf16.msra.mxu0 %v4879_v18  ;;  %v7280_v46 = vld [vmem:[#allocation6 + $0x644] sm:$0xf]  ;;  %v5327_v52 = vor.u32 %v7216_v43, %v5324_v45 }
  0xa9   :  { %v5580_v47 = vld [vmem:[#allocation6 + $0x660] sm:$0xf0] }
  0xaa   :  { %3343 = vmatpush.bf16.msra.mxu3 %v5679_v12  ;;  %3318 = vmatpush.bf16.msra.mxu1 %v5135_v19  ;;  %v7080_v49 = vld [vmem:[#allocation6 + $0x4] sm:$0xf]  ;;  %v5583_v56 = vor.u32 %v7280_v46, %v5580_v47 }
  0xab   :  { %v4780_v50 = vld [vmem:[#allocation6 + $0x20] sm:$0xf0] }
  0xac   :  { %3331 = vmatpush.bf16.msra.mxu2 %v5391_v22  ;;  %3306 = vmatpush.bf16.msra.mxu0 %v4847_v32  ;;  %v7144_v53 = vld [vmem:[#allocation6 + $0x204] sm:$0xf]  ;;  %v4783_v63 = vor.u32 %v7080_v49, %v4780_v50 }
  0xad   :  { %v5036_v54 = vld [vmem:[#allocation6 + $0x220] sm:$0xf0] }
  0xae   :  { %3344 = vmatpush.bf16.msra.mxu3 %v5647_v26  ;;  %3319 = vmatpush.bf16.msra.mxu1 %v5103_v33  ;;  %v7208_v55 = vld [vmem:[#allocation6 + $0x404] sm:$0xf]  ;;  %v5039_v3 = vor.u32 %v7144_v53, %v5036_v54 }
  0xaf   :  { %v5292_v57 = vld [vmem:[#allocation6 + $0x420] sm:$0xf0] }
  0xb0   :  { %3332 = vmatpush.bf16.msra.mxu2 %v5359_v34  ;;  %v7272_v58 = vld [vmem:[#allocation6 + $0x604] sm:$0xf]  ;;  %3307 = vmatpush.bf16.msra.mxu0 %v4815_v48  ;;  %v5295_v5 = vor.u32 %v7208_v55, %v5292_v57 }
  0xb1   :  { %v5548_v59 = vld [vmem:[#allocation6 + $0x620] sm:$0xf0] }
  0xb2   :  { %3345 = vmatpush.bf16.msra.mxu3 %v5615_v39  ;;  %v7392_v60 = vld [vmem:[#allocation6 + $0x9c4] sm:$0xf]  ;;  %3320 = vmatpush.bf16.msra.mxu1 %v5071_v51  ;;  %v5551_v9 = vor.u32 %v7272_v58, %v5548_v59 }
  0xb3   :  { %v6028_v61 = vld [vmem:[#allocation6 + $0x9e0] sm:$0xf0] }
  0xb4   :  { %v7456_v62 = vld [vmem:[#allocation6 + $0xbc4] sm:$0xf]  ;;  %3333 = vmatpush.bf16.msra.mxu2 %v5327_v52  ;;  %v6031_v10 = vor.u32 %v7392_v60, %v6028_v61  ;;  %3308 = vmatpush.bf16.msra.mxu0 %v4783_v63 }
  0xb5   :  { %v6284_v0 = vld [vmem:[#allocation6 + $0xbe0] sm:$0xf0] }
  0xb6   :  { %v7520_v1 = vld [vmem:[#allocation6 + $0xdc4] sm:$0xf]  ;;  %3346 = vmatpush.bf16.msra.mxu3 %v5583_v56  ;;  %v6287_v11 = vor.u32 %v7456_v62, %v6284_v0  ;;  %3321 = vmatpush.bf16.msra.mxu1 %v5039_v3 }
  0xb7   :  { %v6540_v2 = vld [vmem:[#allocation6 + $0xde0] sm:$0xf0]  ;;  %3309 = vmatmul.bf16.vlgmr.msra.gmra.mxu0 %v7883_v20 }
  0xb8   :  { %v7584_v7 = vld [vmem:[#allocation6 + $0xfc4] sm:$0xf]  ;;  %v6543_v12 = vor.u32 %v7520_v1, %v6540_v2  ;;  %3334 = vmatpush.bf16.msra.mxu2 %v5295_v5  ;;  %3353 = vmatpush.bf16.msrb.mxu0 %v6031_v10 }
  0xb9   :  { %v6796_v8 = vld [vmem:[#allocation6 + $0xfe0] sm:$0xf0]  ;;  %3322 = vmatmul.bf16.vlgmr.msra.gmra.mxu1 %v7886_v21 }
  0xba   :  { %v7384_v13 = vld [vmem:[#allocation6 + $0x984] sm:$0xf]  ;;  %v6799_v16 = vor.u32 %v7584_v7, %v6796_v8  ;;  %3347 = vmatpush.bf16.msra.mxu3 %v5551_v9  ;;  %3366 = vmatpush.bf16.msrb.mxu1 %v6287_v11 }
  0xbb   :  { %v5996_v14 = vld [vmem:[#allocation6 + $0x9a0] sm:$0xf0]  ;;  %3335 = vmatmul.bf16.vlgmr.msra.gmra.mxu2 %v7878_v4 }
  0xbc   :  { %v7448_v15 = vld [vmem:[#allocation6 + $0xb84] sm:$0xf]  ;;  %v5999_v24 = vor.u32 %v7384_v13, %v5996_v14  ;;  %3379 = vmatpush.bf16.msrb.mxu2 %v6543_v12 }
  0xbd   :  { %v6252_v17 = vld [vmem:[#allocation6 + $0xba0] sm:$0xf0]  ;;  %3348 = vmatmul.bf16.vlgmr.msra.gmra.mxu3 %v7880_v6 }
  0xbe   :  { %v7512_v18 = vld [vmem:[#allocation6 + $0xd84] sm:$0xf]  ;;  %v6255_v25 = vor.u32 %v7448_v15, %v6252_v17  ;;  %3392 = vmatpush.bf16.msrb.mxu3 %v6799_v16  ;;  %3354 = vmatpush.bf16.msrb.mxu0 %v5999_v24 }
  0xbf   :  { %v6508_v19 = vld [vmem:[#allocation6 + $0xda0] sm:$0xf0] }
  0xc0   :  { %v7576_v22 = vld [vmem:[#allocation6 + $0xf84] sm:$0xf]  ;;  %v6511_v26 = vor.u32 %v7512_v18, %v6508_v19  ;;  %3367 = vmatpush.bf16.msrb.mxu1 %v6255_v25 }
  0xc1   :  { %v6764_v23 = vld [vmem:[#allocation6 + $0xfa0] sm:$0xf0] }
  0xc2   :  { %v7376_v27 = vld [vmem:[#allocation6 + $0x944] sm:$0xf]  ;;  %v6767_v30 = vor.u32 %v7576_v22, %v6764_v23  ;;  %3380 = vmatpush.bf16.msrb.mxu2 %v6511_v26 }
  0xc3   :  { %v5964_v28 = vld [vmem:[#allocation6 + $0x960] sm:$0xf0] }
  0xc4   :  { %v7440_v29 = vld [vmem:[#allocation6 + $0xb44] sm:$0xf]  ;;  %v5967_v36 = vor.u32 %v7376_v27, %v5964_v28  ;;  %3393 = vmatpush.bf16.msrb.mxu3 %v6767_v30 }
  0xc5   :  { %v6220_v31 = vld [vmem:[#allocation6 + $0xb60] sm:$0xf0] }
  0xc6   :  { %v7504_v32 = vld [vmem:[#allocation6 + $0xd44] sm:$0xf]  ;;  %v6223_v37 = vor.u32 %v7440_v29, %v6220_v31  ;;  %3355 = vmatpush.bf16.msrb.mxu0 %v5967_v36 }
  0xc7   :  { %v6476_v33 = vld [vmem:[#allocation6 + $0xd60] sm:$0xf0] }
  0xc8   :  { %v7568_v34 = vld [vmem:[#allocation6 + $0xf44] sm:$0xf]  ;;  %v6479_v39 = vor.u32 %v7504_v32, %v6476_v33  ;;  %3368 = vmatpush.bf16.msrb.mxu1 %v6223_v37 }
  0xc9   :  { %v6732_v35 = vld [vmem:[#allocation6 + $0xf60] sm:$0xf0] }
  0xca   :  { %v7368_v40 = vld [vmem:[#allocation6 + $0x904] sm:$0xf]  ;;  %v6735_v46 = vor.u32 %v7568_v34, %v6732_v35  ;;  %3381 = vmatpush.bf16.msrb.mxu2 %v6479_v39 }
  0xcb   :  { %v5932_v43 = vld [vmem:[#allocation6 + $0x920] sm:$0xf0] }
  0xcc   :  { %v7432_v45 = vld [vmem:[#allocation6 + $0xb04] sm:$0xf]  ;;  %v5935_v52 = vor.u32 %v7368_v40, %v5932_v43  ;;  %3394 = vmatpush.bf16.msrb.mxu3 %v6735_v46  ;;  %v5010_v43 = vld [vmem:[#allocation6 + $0x1c8] sm:$0xf] }
  0xcd   :  { %v6188_v47 = vld [vmem:[#allocation6 + $0xb20] sm:$0xf0]  ;;  %v5266_v46 = vld [vmem:[#allocation6 + $0x3c8] sm:$0xf] }
  0xce   :  { %v7496_v48 = vld [vmem:[#allocation6 + $0xd04] sm:$0xf]  ;;  %v6191_v53 = vor.u32 %v7432_v45, %v6188_v47  ;;  %3356 = vmatpush.bf16.msrb.mxu0 %v5935_v52  ;;  %v7141_v45 = vld [vmem:[#allocation6 + $0x1e4] sm:$0xf0] }
  0xcf   :  { %v6444_v49 = vld [vmem:[#allocation6 + $0xd20] sm:$0xf0] }
  0xd0   :  { %v7560_v50 = vld [vmem:[#allocation6 + $0xf04] sm:$0xf]  ;;  %v6447_v54 = vor.u32 %v7496_v48, %v6444_v49  ;;  %3369 = vmatpush.bf16.msrb.mxu1 %v6191_v53  ;;  %v7205_v48 = vld [vmem:[#allocation6 + $0x3e4] sm:$0xf0] }
  0xd1   :  { %v6700_v51 = vld [vmem:[#allocation6 + $0xf20] sm:$0xf0]  ;;  %v5522_v49 = vld [vmem:[#allocation6 + $0x5c8] sm:$0xf] }
  0xd2   :  { %v7360_v55 = vld [vmem:[#allocation6 + $0x8c4] sm:$0xf]  ;;  %v6703_v58 = vor.u32 %v7560_v50, %v6700_v51  ;;  %3382 = vmatpush.bf16.msrb.mxu2 %v6447_v54  ;;  %v7269_v50 = vld [vmem:[#allocation6 + $0x5e4] sm:$0xf0] }
  0xd3   :  { %v5900_v56 = vld [vmem:[#allocation6 + $0x8e0] sm:$0xf0]  ;;  %v5778_v53 = vld [vmem:[#allocation6 + $0x7c8] sm:$0xf] }
  0xd4   :  { %v7424_v57 = vld [vmem:[#allocation6 + $0xac4] sm:$0xf]  ;;  %v5903_v0 = vor.u32 %v7360_v55, %v5900_v56  ;;  %3395 = vmatpush.bf16.msrb.mxu3 %v6703_v58  ;;  %v7333_v54 = vld [vmem:[#allocation6 + $0x7e4] sm:$0xf0]  ;;  %v5011_v56 = vor.u32 %v7141_v45, %v5010_v43  ;;  %v5523_v58 = vor.u32 %v7269_v50, %v5522_v49 }
  0xd5   :  { %v6156_v59 = vld [vmem:[#allocation6 + $0xae0] sm:$0xf0]  ;;  %v5394_v43 = vld [vmem:[#allocation6 + $0x4c8] sm:$0xf] }
  0xd6   :  { %v7488_v60 = vld [vmem:[#allocation6 + $0xcc4] sm:$0xf]  ;;  %v6159_v1 = vor.u32 %v7424_v57, %v6156_v59  ;;  %3357 = vmatpush.bf16.msrb.mxu0 %v5903_v0  ;;  %v5267_v57 = vor.u32 %v7205_v48, %v5266_v46  ;;  %v4978_v59 = vld [vmem:[#allocation6 + $0x188] sm:$0xf] }
  0xd7   :  { %v6412_v61 = vld [vmem:[#allocation6 + $0xce0] sm:$0xf0]  ;;  %v5490_v0 = vld [vmem:[#allocation6 + $0x588] sm:$0xf] }
  0xd8   :  { %v7552_v62 = vld [vmem:[#allocation6 + $0xec4] sm:$0xf]  ;;  %v6415_v2 = vor.u32 %v7488_v60, %v6412_v61  ;;  %3370 = vmatpush.bf16.msrb.mxu1 %v6159_v1  ;;  %v7133_v60 = vld [vmem:[#allocation6 + $0x1a4] sm:$0xf0] }
  0xd9   :  { %v6668_v63 = vld [vmem:[#allocation6 + $0xee0] sm:$0xf0]  ;;  %v5234_v61 = vld [vmem:[#allocation6 + $0x388] sm:$0xf] }
  0xda   :  { %v7352_v3 = vld [vmem:[#allocation6 + $0x884] sm:$0xf]  ;;  %v6671_v8 = vor.u32 %v7552_v62, %v6668_v63  ;;  %3383 = vmatpush.bf16.msrb.mxu2 %v6415_v2  ;;  %v5779_v62 = vor.u32 %v7333_v54, %v5778_v53  ;;  %v7197_v63 = vld [vmem:[#allocation6 + $0x3a4] sm:$0xf0] }
  0xdb   :  { %v5868_v5 = vld [vmem:[#allocation6 + $0x8a0] sm:$0xf0]  ;;  %v7261_v1 = vld [vmem:[#allocation6 + $0x5a4] sm:$0xf0] }
  0xdc   :  { %v7416_v7 = vld [vmem:[#allocation6 + $0xa84] sm:$0xf]  ;;  %v5871_v14 = vor.u32 %v7352_v3, %v5868_v5  ;;  %3396 = vmatpush.bf16.msrb.mxu3 %v6671_v8  ;;  %v5746_v2 = vld [vmem:[#allocation6 + $0x788] sm:$0xf]  ;;  %v4979_v5 = vor.u32 %v7133_v60, %v4978_v59  ;;  %v5491_v8 = vor.u32 %v7261_v1, %v5490_v0 }
  0xdd   :  { %v6124_v9 = vld [vmem:[#allocation6 + $0xaa0] sm:$0xf0]  ;;  %v7325_v3 = vld [vmem:[#allocation6 + $0x7a4] sm:$0xf0] }
  0xde   :  { %v7480_v10 = vld [vmem:[#allocation6 + $0xc84] sm:$0xf]  ;;  %v6127_v15 = vor.u32 %v7416_v7, %v6124_v9  ;;  %3358 = vmatpush.bf16.msrb.mxu0 %v5871_v14  ;;  %v5235_v7 = vor.u32 %v7197_v63, %v5234_v61  ;;  %v4946_v9 = vld [vmem:[#allocation6 + $0x148] sm:$0xf] }
  0xdf   :  { %v6380_v11 = vld [vmem:[#allocation6 + $0xca0] sm:$0xf0]  ;;  %v5458_v14 = vld [vmem:[#allocation6 + $0x548] sm:$0xf] }
  0xe0   :  { %v7544_v12 = vld [vmem:[#allocation6 + $0xe84] sm:$0xf]  ;;  %v6383_v16 = vor.u32 %v7480_v10, %v6380_v11  ;;  %3371 = vmatpush.bf16.msrb.mxu1 %v6127_v15  ;;  %v7125_v10 = vld [vmem:[#allocation6 + $0x164] sm:$0xf0] }
  0xe1   :  { %v6636_v13 = vld [vmem:[#allocation6 + $0xea0] sm:$0xf0]  ;;  %v5202_v11 = vld [vmem:[#allocation6 + $0x348] sm:$0xf] }
  0xe2   :  { %v7344_v17 = vld [vmem:[#allocation6 + $0x844] sm:$0xf]  ;;  %v6639_v22 = vor.u32 %v7544_v12, %v6636_v13  ;;  %3384 = vmatpush.bf16.msrb.mxu2 %v6383_v16  ;;  %v5747_v12 = vor.u32 %v7325_v3, %v5746_v2  ;;  %v7189_v13 = vld [vmem:[#allocation6 + $0x364] sm:$0xf0] }
  0xe3   :  { %v5836_v18 = vld [vmem:[#allocation6 + $0x860] sm:$0xf0]  ;;  %v7253_v15 = vld [vmem:[#allocation6 + $0x564] sm:$0xf0] }
  0xe4   :  { %v7408_v19 = vld [vmem:[#allocation6 + $0xa44] sm:$0xf]  ;;  %v5839_v28 = vor.u32 %v7344_v17, %v5836_v18  ;;  %3397 = vmatpush.bf16.msrb.mxu3 %v6639_v22  ;;  %v5714_v16 = vld [vmem:[#allocation6 + $0x748] sm:$0xf]  ;;  %v4947_v18 = vor.u32 %v7125_v10, %v4946_v9  ;;  %v5459_v22 = vor.u32 %v7253_v15, %v5458_v14 }
  0xe5   :  { %v6092_v23 = vld [vmem:[#allocation6 + $0xa60] sm:$0xf0]  ;;  %v7317_v17 = vld [vmem:[#allocation6 + $0x764] sm:$0xf0] }
  0xe6   :  { %v7472_v24 = vld [vmem:[#allocation6 + $0xc44] sm:$0xf]  ;;  %v6095_v31 = vor.u32 %v7408_v19, %v6092_v23  ;;  %3359 = vmatpush.bf16.msrb.mxu0 %v5839_v28  ;;  %v5203_v19 = vor.u32 %v7189_v13, %v5202_v11  ;;  %v4914_v23 = vld [vmem:[#allocation6 + $0x108] sm:$0xf] }
  0xe7   :  { %v6348_v25 = vld [vmem:[#allocation6 + $0xc60] sm:$0xf0]  ;;  %v5426_v28 = vld [vmem:[#allocation6 + $0x508] sm:$0xf] }
  0xe8   :  { %v7536_v26 = vld [vmem:[#allocation6 + $0xe44] sm:$0xf]  ;;  %v6351_v32 = vor.u32 %v7472_v24, %v6348_v25  ;;  %3372 = vmatpush.bf16.msrb.mxu1 %v6095_v31  ;;  %v7117_v24 = vld [vmem:[#allocation6 + $0x124] sm:$0xf0] }
  0xe9   :  { %v6604_v27 = vld [vmem:[#allocation6 + $0xe60] sm:$0xf0]  ;;  %v5170_v25 = vld [vmem:[#allocation6 + $0x308] sm:$0xf] }
  0xea   :  { %v7336_v29 = vld [vmem:[#allocation6 + $0x804] sm:$0xf]  ;;  %v6607_v36 = vor.u32 %v7536_v26, %v6604_v27  ;;  %3385 = vmatpush.bf16.msrb.mxu2 %v6351_v32  ;;  %v5715_v26 = vor.u32 %v7317_v17, %v5714_v16  ;;  %v7181_v27 = vld [vmem:[#allocation6 + $0x324] sm:$0xf0]  ;;  %v4915_v32 = vor.u32 %v7117_v24, %v4914_v23 }
  0xeb   :  { %v5804_v30 = vld [vmem:[#allocation6 + $0x820] sm:$0xf0]  ;;  %v7309_v31 = vld [vmem:[#allocation6 + $0x724] sm:$0xf0] }
  0xec   :  { %v7400_v33 = vld [vmem:[#allocation6 + $0xa04] sm:$0xf]  ;;  %v5807_v47 = vor.u32 %v7336_v29, %v5804_v30  ;;  %3398 = vmatpush.bf16.msrb.mxu3 %v6607_v36  ;;  %v7245_v29 = vld [vmem:[#allocation6 + $0x524] sm:$0xf0] }
  0xed   :  { %v6060_v34 = vld [vmem:[#allocation6 + $0xa20] sm:$0xf0]  ;;  %v5682_v30 = vld [vmem:[#allocation6 + $0x708] sm:$0xf] }
  0xee   :  { %v7464_v35 = vld [vmem:[#allocation6 + $0xc04] sm:$0xf]  ;;  %v6063_v51 = vor.u32 %v7400_v33, %v6060_v34  ;;  %3360 = vmatpush.bf16.msrb.mxu0 %v5807_v47  ;;  %v5171_v33 = vor.u32 %v7181_v27, %v5170_v25  ;;  %v5427_v34 = vor.u32 %v7245_v29, %v5426_v28  ;;  %v7109_v36 = vld [vmem:[#allocation6 + $0xe4] sm:$0xf0] }
  0xef   :  { %v6316_v37 = vld [vmem:[#allocation6 + $0xc20] sm:$0xf0]  ;;  %v7237_v45 = vld [vmem:[#allocation6 + $0x4e4] sm:$0xf0] }
  0xf0   :  { %v7528_v39 = vld [vmem:[#allocation6 + $0xe04] sm:$0xf]  ;;  %v6319_v52 = vor.u32 %v7464_v35, %v6316_v37  ;;  %3373 = vmatpush.bf16.msrb.mxu1 %v6063_v51  ;;  %v4882_v35 = vld [vmem:[#allocation6 + $0xc8] sm:$0xf]  ;;  %v5395_v50 = vor.u32 %v7237_v45, %v5394_v43 }
  0xf1   :  { %v6572_v40 = vld [vmem:[#allocation6 + $0xe20] sm:$0xf0]  ;;  %3361 = vmatmul.bf16.vlgmr.msrb.gmra.mxu0 %v7892_v41  ;;  %v5138_v37 = vld [vmem:[#allocation6 + $0x2c8] sm:$0xf]  ;;  %v4883_v48 = vor.u32 %v7109_v36, %v4882_v35 }
  0xf2   :  { %v6575_v55 = vor.u32 %v7528_v39, %v6572_v40  ;;  %3386 = vmatpush.bf16.msrb.mxu2 %v6319_v52  ;;  %3405 = vmatpush.bf16.msra.mxu0 %v5011_v56  ;;  %v5683_v39 = vor.u32 %v7309_v31, %v5682_v30  ;;  %v7173_v40 = vld [vmem:[#allocation6 + $0x2e4] sm:$0xf0] }
  0xf3   :  { %3374 = vmatmul.bf16.vlgmr.msrb.gmra.mxu1 %v7896_v44  ;;  %v5650_v46 = vld [vmem:[#allocation6 + $0x6c8] sm:$0xf]  ;;  %v5139_v49 = vor.u32 %v7173_v40, %v5138_v37 }
  0xf4   :  { %3399 = vmatpush.bf16.msrb.mxu3 %v6575_v55  ;;  %3418 = vmatpush.bf16.msra.mxu1 %v5267_v57  ;;  %v7301_v47 = vld [vmem:[#allocation6 + $0x6e4] sm:$0xf0] }
  0xf5   :  { %3387 = vmatmul.bf16.vlgmr.msrb.gmra.mxu2 %v7890_v38  ;;  %v4850_v51 = vld [vmem:[#allocation6 + $0x88] sm:$0xf]  ;;  %v5651_v54 = vor.u32 %v7301_v47, %v5650_v46 }
  0xf6   :  { %3431 = vmatpush.bf16.msra.mxu2 %v5523_v58  ;;  %3406 = vmatpush.bf16.msra.mxu0 %v4979_v5  ;;  %v7101_v52 = vld [vmem:[#allocation6 + $0xa4] sm:$0xf0] }
  0xf7   :  { %3400 = vmatmul.bf16.vlgmr.msrb.gmra.mxu3 %v7894_v42  ;;  %v5106_v53 = vld [vmem:[#allocation6 + $0x288] sm:$0xf]  ;;  %v4851_v60 = vor.u32 %v7101_v52, %v4850_v51 }
  0xf8   :  { %3444 = vmatpush.bf16.msra.mxu3 %v5779_v62  ;;  %3419 = vmatpush.bf16.msra.mxu1 %v5235_v7  ;;  %v7165_v55 = vld [vmem:[#allocation6 + $0x2a4] sm:$0xf0] }
  0xf9   :  { %v5362_v56 = vld [vmem:[#allocation6 + $0x488] sm:$0xf]  ;;  %v5107_v61 = vor.u32 %v7165_v55, %v5106_v53 }
  0xfa   :  { %3432 = vmatpush.bf16.msra.mxu2 %v5491_v8  ;;  %3407 = vmatpush.bf16.msra.mxu0 %v4947_v18  ;;  %v7229_v57 = vld [vmem:[#allocation6 + $0x4a4] sm:$0xf0] }
  0xfb   :  { %v5618_v58 = vld [vmem:[#allocation6 + $0x688] sm:$0xf]  ;;  %v5363_v62 = vor.u32 %v7229_v57, %v5362_v56 }
  0xfc   :  { %3445 = vmatpush.bf16.msra.mxu3 %v5747_v12  ;;  %3420 = vmatpush.bf16.msra.mxu1 %v5203_v19  ;;  %v7293_v59 = vld [vmem:[#allocation6 + $0x6a4] sm:$0xf0] }
  0xfd   :  { %v4818_v63 = vld [vmem:[#allocation6 + $0x48] sm:$0xf]  ;;  %v5619_v2 = vor.u32 %v7293_v59, %v5618_v58 }
  0xfe   :  { %3433 = vmatpush.bf16.msra.mxu2 %v5459_v22  ;;  %3408 = vmatpush.bf16.msra.mxu0 %v4915_v32  ;;  %v7093_v0 = vld [vmem:[#allocation6 + $0x64] sm:$0xf0] }
  0xff   :  { %v5074_v1 = vld [vmem:[#allocation6 + $0x248] sm:$0xf]  ;;  %v4819_v10 = vor.u32 %v7093_v0, %v4818_v63 }
 0x100   :  { %3446 = vmatpush.bf16.msra.mxu3 %v5715_v26  ;;  %3421 = vmatpush.bf16.msra.mxu1 %v5171_v33  ;;  %v7157_v3 = vld [vmem:[#allocation6 + $0x264] sm:$0xf0] }
 0x101   :  { %v5330_v5 = vld [vmem:[#allocation6 + $0x448] sm:$0xf]  ;;  %v5075_v13 = vor.u32 %v7157_v3, %v5074_v1 }
 0x102   :  { %3434 = vmatpush.bf16.msra.mxu2 %v5427_v34  ;;  %3409 = vmatpush.bf16.msra.mxu0 %v4883_v48  ;;  %v7221_v7 = vld [vmem:[#allocation6 + $0x464] sm:$0xf0] }
 0x103   :  { %v5586_v8 = vld [vmem:[#allocation6 + $0x648] sm:$0xf]  ;;  %v5331_v14 = vor.u32 %v7221_v7, %v5330_v5 }
 0x104   :  { %3447 = vmatpush.bf16.msra.mxu3 %v5683_v39  ;;  %3422 = vmatpush.bf16.msra.mxu1 %v5139_v49  ;;  %v7285_v9 = vld [vmem:[#allocation6 + $0x664] sm:$0xf0] }
 0x105   :  { %v4786_v11 = vld [vmem:[#allocation6 + $0x8] sm:$0xf]  ;;  %v5587_v18 = vor.u32 %v7285_v9, %v5586_v8 }
 0x106   :  { %3435 = vmatpush.bf16.msra.mxu2 %v5395_v50  ;;  %3410 = vmatpush.bf16.msra.mxu0 %v4851_v60  ;;  %v7085_v12 = vld [vmem:[#allocation6 + $0x24] sm:$0xf0] }
 0x107   :  { %v5042_v15 = vld [vmem:[#allocation6 + $0x208] sm:$0xf]  ;;  %v4787_v27 = vor.u32 %v7085_v12, %v4786_v11 }
 0x108   :  { %3448 = vmatpush.bf16.msra.mxu3 %v5651_v54  ;;  %3423 = vmatpush.bf16.msra.mxu1 %v5107_v61  ;;  %v7149_v16 = vld [vmem:[#allocation6 + $0x224] sm:$0xf0] }
 0x109   :  { %v5298_v17 = vld [vmem:[#allocation6 + $0x408] sm:$0xf]  ;;  %v5043_v31 = vor.u32 %v7149_v16, %v5042_v15 }
 0x10a   :  { %3436 = vmatpush.bf16.msra.mxu2 %v5363_v62  ;;  %v7213_v19 = vld [vmem:[#allocation6 + $0x424] sm:$0xf0]  ;;  %3411 = vmatpush.bf16.msra.mxu0 %v4819_v10 }
 0x10b   :  { %v5554_v22 = vld [vmem:[#allocation6 + $0x608] sm:$0xf]  ;;  %v5299_v32 = vor.u32 %v7213_v19, %v5298_v17 }
 0x10c   :  { %3449 = vmatpush.bf16.msra.mxu3 %v5619_v2  ;;  %v7277_v23 = vld [vmem:[#allocation6 + $0x624] sm:$0xf0]  ;;  %3424 = vmatpush.bf16.msra.mxu1 %v5075_v13 }
 0x10d   :  { %v6034_v24 = vld [vmem:[#allocation6 + $0x9c8] sm:$0xf]  ;;  %v5555_v35 = vor.u32 %v7277_v23, %v5554_v22 }
 0x10e   :  { %v7397_v25 = vld [vmem:[#allocation6 + $0x9e4] sm:$0xf0]  ;;  %3437 = vmatpush.bf16.msra.mxu2 %v5331_v14  ;;  %3412 = vmatpush.bf16.msra.mxu0 %v4787_v27 }
 0x10f   :  { %v6290_v26 = vld [vmem:[#allocation6 + $0xbc8] sm:$0xf]  ;;  %v6035_v36 = vor.u32 %v7397_v25, %v6034_v24 }
 0x110   :  { %v7461_v28 = vld [vmem:[#allocation6 + $0xbe4] sm:$0xf0]  ;;  %3450 = vmatpush.bf16.msra.mxu3 %v5587_v18  ;;  %3425 = vmatpush.bf16.msra.mxu1 %v5043_v31 }
 0x111   :  { %v6546_v29 = vld [vmem:[#allocation6 + $0xdc8] sm:$0xf]  ;;  %v6291_v37 = vor.u32 %v7461_v28, %v6290_v26  ;;  %3413 = vmatmul.bf16.vlgmr.msra.gmra.mxu0 %v7883_v20 }
 0x112   :  { %v7525_v30 = vld [vmem:[#allocation6 + $0xde4] sm:$0xf0]  ;;  %3438 = vmatpush.bf16.msra.mxu2 %v5299_v32  ;;  %3457 = vmatpush.bf16.msrb.mxu0 %v6035_v36 }
 0x113   :  { %v6802_v33 = vld [vmem:[#allocation6 + $0xfc8] sm:$0xf]  ;;  %v6547_v39 = vor.u32 %v7525_v30, %v6546_v29  ;;  %3426 = vmatmul.bf16.vlgmr.msra.gmra.mxu1 %v7886_v21 }
 0x114   :  { %v7589_v34 = vld [vmem:[#allocation6 + $0xfe4] sm:$0xf0]  ;;  %3451 = vmatpush.bf16.msra.mxu3 %v5555_v35  ;;  %3470 = vmatpush.bf16.msrb.mxu1 %v6291_v37 }
 0x115   :  { %v6002_v40 = vld [vmem:[#allocation6 + $0x988] sm:$0xf]  ;;  %v6803_v46 = vor.u32 %v7589_v34, %v6802_v33  ;;  %3439 = vmatmul.bf16.vlgmr.msra.gmra.mxu2 %v7878_v4 }
 0x116   :  { %v7389_v43 = vld [vmem:[#allocation6 + $0x9a4] sm:$0xf0]  ;;  %3483 = vmatpush.bf16.msrb.mxu2 %v6547_v39 }
 0x117   :  { %v6258_v45 = vld [vmem:[#allocation6 + $0xb88] sm:$0xf]  ;;  %v6003_v52 = vor.u32 %v7389_v43, %v6002_v40  ;;  %3452 = vmatmul.bf16.vlgmr.msra.gmra.mxu3 %v7880_v6  ;;  %v3206_v43 = vpop.f32.mrf.mxu0 }
 0x118   :  { %v7453_v47 = vld [vmem:[#allocation6 + $0xba4] sm:$0xf0]  ;;  %3496 = vmatpush.bf16.msrb.mxu3 %v6803_v46  ;;  %v3219_v46 = vpop.f32.mrf.mxu1 }
 0x119   :  { %v6514_v48 = vld [vmem:[#allocation6 + $0xd88] sm:$0xf]  ;;  %v6259_v53 = vor.u32 %v7453_v47, %v6258_v45  ;;  %3458 = vmatpush.bf16.msrb.mxu0 %v6003_v52  ;;  %v3220_v52 = vadd.f32 %v3219_v46, %v3206_v43  ;;  %v5492_v43 = vld [vmem:[#allocation6 + $0x5a8] sm:$0xf0] }
 0x11a   :  { %v7517_v49 = vld [vmem:[#allocation6 + $0xda4] sm:$0xf0]  ;;  %v5748_v46 = vld [vmem:[#allocation6 + $0x7a8] sm:$0xf0] }
 0x11b   :  { %v6770_v50 = vld [vmem:[#allocation6 + $0xf88] sm:$0xf]  ;;  %v6515_v54 = vor.u32 %v7517_v49, %v6514_v48  ;;  %3471 = vmatpush.bf16.msrb.mxu1 %v6259_v53  ;;  %v3232_v53 = vpop.f32.mrf.mxu2 }
 0x11c   :  { %v7581_v51 = vld [vmem:[#allocation6 + $0xfa4] sm:$0xf0] }
 0x11d   :  { %v5970_v55 = vld [vmem:[#allocation6 + $0x948] sm:$0xf]  ;;  %v6771_v58 = vor.u32 %v7581_v51, %v6770_v50  ;;  %3484 = vmatpush.bf16.msrb.mxu2 %v6515_v54 }
 0x11e   :  { %v7381_v56 = vld [vmem:[#allocation6 + $0x964] sm:$0xf0] }
 0x11f   :  { %v6226_v57 = vld [vmem:[#allocation6 + $0xb48] sm:$0xf]  ;;  %v5971_v0 = vor.u32 %v7381_v56, %v5970_v55  ;;  %3497 = vmatpush.bf16.msrb.mxu3 %v6771_v58  ;;  %v3245_v58 = vpop.f32.mrf.mxu3 }
 0x120   :  { %v7445_v59 = vld [vmem:[#allocation6 + $0xb64] sm:$0xf0] }
 0x121   :  { %v6482_v60 = vld [vmem:[#allocation6 + $0xd48] sm:$0xf]  ;;  %v6227_v1 = vor.u32 %v7445_v59, %v6226_v57  ;;  %3459 = vmatpush.bf16.msrb.mxu0 %v5971_v0 }
 0x122   :  { %v7509_v61 = vld [vmem:[#allocation6 + $0xd64] sm:$0xf0] }
 0x123   :  { %v6738_v62 = vld [vmem:[#allocation6 + $0xf48] sm:$0xf]  ;;  %v6483_v2 = vor.u32 %v7509_v61, %v6482_v60  ;;  %3472 = vmatpush.bf16.msrb.mxu1 %v6227_v1  ;;  %v3233_v61 = vadd.f32 %v3232_v53, %v3220_v52  ;;  %v7185_v52 = vld [vmem:[#allocation6 + $0x34c] sm:$0xf] }
 0x124   :  { %v7573_v63 = vld [vmem:[#allocation6 + $0xf64] sm:$0xf0] }
 0x125   :  { %v5938_v3 = vld [vmem:[#allocation6 + $0x908] sm:$0xf]  ;;  %v6739_v8 = vor.u32 %v7573_v63, %v6738_v62  ;;  %3485 = vmatpush.bf16.msrb.mxu2 %v6483_v2 }
 0x126   :  { %v7373_v5 = vld [vmem:[#allocation6 + $0x924] sm:$0xf0] }
 0x127   :  { %v6194_v7 = vld [vmem:[#allocation6 + $0xb08] sm:$0xf]  ;;  %v5939_v14 = vor.u32 %v7373_v5, %v5938_v3  ;;  %3498 = vmatpush.bf16.msrb.mxu3 %v6739_v8  ;;  %v7914_v8 = vadd.f32 %v3245_v58, %v3233_v61  ;;  %v5716_v58 = vld [vmem:[#allocation6 + $0x768] sm:$0xf0] }
 0x128   :  { %v7437_v9 = vld [vmem:[#allocation6 + $0xb24] sm:$0xf0] }
 0x129   :  { %v6450_v10 = vld [vmem:[#allocation6 + $0xd08] sm:$0xf]  ;;  %v6195_v15 = vor.u32 %v7437_v9, %v6194_v7  ;;  %3460 = vmatpush.bf16.msrb.mxu0 %v5939_v14  ;;  %v5012_v14 = vld [vmem:[#allocation6 + $0x1e8] sm:$0xf0] }
 0x12a   :  { %v7501_v11 = vld [vmem:[#allocation6 + $0xd24] sm:$0xf0] }
 0x12b   :  { %v6706_v12 = vld [vmem:[#allocation6 + $0xf08] sm:$0xf]  ;;  %v6451_v16 = vor.u32 %v7501_v11, %v6450_v10  ;;  %3473 = vmatpush.bf16.msrb.mxu1 %v6195_v15  ;;  %v7201_v15 = vld [vmem:[#allocation6 + $0x3cc] sm:$0xf] }
 0x12c   :  { %v7565_v13 = vld [vmem:[#allocation6 + $0xf24] sm:$0xf0] }
 0x12d   :  { %v5906_v17 = vld [vmem:[#allocation6 + $0x8c8] sm:$0xf]  ;;  %v6707_v22 = vor.u32 %v7565_v13, %v6706_v12  ;;  %3486 = vmatpush.bf16.msrb.mxu2 %v6451_v16  ;;  %v7137_v13 = vld [vmem:[#allocation6 + $0x1cc] sm:$0xf]  ;;  %v3208_v16 = vpop.f32.mrf.mxu0 }
 0x12e   :  { %v7365_v18 = vld [vmem:[#allocation6 + $0x8e4] sm:$0xf0]  ;;  %v7169_v16 = vld [vmem:[#allocation6 + $0x2cc] sm:$0xf] }
 0x12f   :  { %v6162_v19 = vld [vmem:[#allocation6 + $0xac8] sm:$0xf]  ;;  %v5907_v28 = vor.u32 %v7365_v18, %v5906_v17  ;;  %3499 = vmatpush.bf16.msrb.mxu3 %v6707_v22  ;;  %v5268_v18 = vld [vmem:[#allocation6 + $0x3e8] sm:$0xf0] }
 0x130   :  { %v7429_v23 = vld [vmem:[#allocation6 + $0xae4] sm:$0xf0]  ;;  %v5524_v22 = vld [vmem:[#allocation6 + $0x5e8] sm:$0xf0] }
 0x131   :  { %v6418_v24 = vld [vmem:[#allocation6 + $0xcc8] sm:$0xf]  ;;  %v6163_v29 = vor.u32 %v7429_v23, %v6162_v19  ;;  %3461 = vmatpush.bf16.msrb.mxu0 %v5907_v28  ;;  %v7265_v19 = vld [vmem:[#allocation6 + $0x5cc] sm:$0xf]  ;;  %v3221_v23 = vpop.f32.mrf.mxu1  ;;  %v3234_v28 = vpop.f32.mrf.mxu2 }
 0x132   :  { %v7493_v25 = vld [vmem:[#allocation6 + $0xce4] sm:$0xf0]  ;;  %v7233_v23 = vld [vmem:[#allocation6 + $0x4cc] sm:$0xf] }
 0x133   :  { %v6674_v26 = vld [vmem:[#allocation6 + $0xec8] sm:$0xf]  ;;  %v6419_v30 = vor.u32 %v7493_v25, %v6418_v24  ;;  %3474 = vmatpush.bf16.msrb.mxu1 %v6163_v29 }
 0x134   :  { %v7557_v27 = vld [vmem:[#allocation6 + $0xee4] sm:$0xf0] }
 0x135   :  { %v5874_v31 = vld [vmem:[#allocation6 + $0x888] sm:$0xf]  ;;  %v6675_v34 = vor.u32 %v7557_v27, %v6674_v26  ;;  %3487 = vmatpush.bf16.msrb.mxu2 %v6419_v30  ;;  %v7329_v26 = vld [vmem:[#allocation6 + $0x7cc] sm:$0xf]  ;;  %v5015_v30 = vor.u32 %v7137_v13, %v5012_v14 }
 0x136   :  { %v7357_v32 = vld [vmem:[#allocation6 + $0x8a4] sm:$0xf0]  ;;  %v5780_v27 = vld [vmem:[#allocation6 + $0x7e8] sm:$0xf0] }
 0x137   :  { %v6130_v33 = vld [vmem:[#allocation6 + $0xa88] sm:$0xf]  ;;  %v5875_v45 = vor.u32 %v7357_v32, %v5874_v31  ;;  %3500 = vmatpush.bf16.msrb.mxu3 %v6675_v34  ;;  %v3247_v31 = vpop.f32.mrf.mxu3  ;;  %v5271_v32 = vor.u32 %v7201_v15, %v5268_v18  ;;  %v7129_v34 = vld [vmem:[#allocation6 + $0x18c] sm:$0xf] }
 0x138   :  { %v7421_v35 = vld [vmem:[#allocation6 + $0xaa4] sm:$0xf0]  ;;  %v7105_v14 = vld [vmem:[#allocation6 + $0xcc] sm:$0xf] }
 0x139   :  { %v6386_v36 = vld [vmem:[#allocation6 + $0xc88] sm:$0xf]  ;;  %v6131_v47 = vor.u32 %v7421_v35, %v6130_v33  ;;  %3462 = vmatpush.bf16.msrb.mxu0 %v5875_v45  ;;  %v5527_v33 = vor.u32 %v7265_v19, %v5524_v22  ;;  %v4980_v35 = vld [vmem:[#allocation6 + $0x1a8] sm:$0xf0]  ;;  %v3271_v18 = vpop.f32.mrf.mxu1 }
 0x13a   :  { %v7485_v37 = vld [vmem:[#allocation6 + $0xca4] sm:$0xf0]  ;;  %v7321_v45 = vld [vmem:[#allocation6 + $0x78c] sm:$0xf] }
 0x13b   :  { %v6642_v39 = vld [vmem:[#allocation6 + $0xe88] sm:$0xf]  ;;  %v6387_v48 = vor.u32 %v7485_v37, %v6386_v36  ;;  %3475 = vmatpush.bf16.msrb.mxu1 %v6131_v47  ;;  %v7193_v36 = vld [vmem:[#allocation6 + $0x38c] sm:$0xf]  ;;  %v5783_v37 = vor.u32 %v7329_v26, %v5780_v27  ;;  %v4983_v47 = vor.u32 %v7129_v34, %v4980_v35  ;;  %v5751_v53 = vor.u32 %v7321_v45, %v5748_v46  ;;  %v3284_v34 = vpop.f32.mrf.mxu2 }
 0x13c   :  { %v7549_v40 = vld [vmem:[#allocation6 + $0xea4] sm:$0xf0]  ;;  %v4884_v15 = vld [vmem:[#allocation6 + $0xe8] sm:$0xf0] }
 0x13d   :  { %v5842_v49 = vld [vmem:[#allocation6 + $0x848] sm:$0xf]  ;;  %v6643_v54 = vor.u32 %v7549_v40, %v6642_v39  ;;  %3488 = vmatpush.bf16.msrb.mxu2 %v6387_v48  ;;  %v5236_v39 = vld [vmem:[#allocation6 + $0x3a8] sm:$0xf0]  ;;  %v4887_v28 = vor.u32 %v7105_v14, %v4884_v15 }
 0x13e   :  { %v7349_v50 = vld [vmem:[#allocation6 + $0x864] sm:$0xf0]  ;;  %v7257_v40 = vld [vmem:[#allocation6 + $0x58c] sm:$0xf]  ;;  %v5239_v48 = vor.u32 %v7193_v36, %v5236_v39 }
 0x13f   :  { %v6098_v51 = vld [vmem:[#allocation6 + $0xa48] sm:$0xf]  ;;  %v5843_v62 = vor.u32 %v7349_v50, %v5842_v49  ;;  %3501 = vmatpush.bf16.msrb.mxu3 %v6643_v54  ;;  %v5495_v49 = vor.u32 %v7257_v40, %v5492_v43  ;;  %v7121_v50 = vld [vmem:[#allocation6 + $0x14c] sm:$0xf]  ;;  %v3297_v40 = vpop.f32.mrf.mxu3 }
 0x140   :  { %v7413_v55 = vld [vmem:[#allocation6 + $0xa64] sm:$0xf0]  ;;  %v5204_v54 = vld [vmem:[#allocation6 + $0x368] sm:$0xf0] }
 0x141   :  { %v6354_v56 = vld [vmem:[#allocation6 + $0xc48] sm:$0xf]  ;;  %v6099_v1 = vor.u32 %v7413_v55, %v6098_v51  ;;  %3463 = vmatpush.bf16.msrb.mxu0 %v5843_v62  ;;  %v4948_v51 = vld [vmem:[#allocation6 + $0x168] sm:$0xf0] }
 0x142   :  { %v7477_v57 = vld [vmem:[#allocation6 + $0xc64] sm:$0xf0]  ;;  %v7249_v55 = vld [vmem:[#allocation6 + $0x54c] sm:$0xf] }
 0x143   :  { %v6610_v59 = vld [vmem:[#allocation6 + $0xe48] sm:$0xf]  ;;  %v6355_v2 = vor.u32 %v7477_v57, %v6354_v56  ;;  %3476 = vmatpush.bf16.msrb.mxu1 %v6099_v1  ;;  %v5460_v56 = vld [vmem:[#allocation6 + $0x568] sm:$0xf0] }
 0x144   :  { %v7541_v60 = vld [vmem:[#allocation6 + $0xe64] sm:$0xf0]  ;;  %v7313_v57 = vld [vmem:[#allocation6 + $0x74c] sm:$0xf]  ;;  %v5463_v61 = vor.u32 %v7249_v55, %v5460_v56 }
 0x145   :  { %v5810_v63 = vld [vmem:[#allocation6 + $0x808] sm:$0xf]  ;;  %v6611_v9 = vor.u32 %v7541_v60, %v6610_v59  ;;  %3489 = vmatpush.bf16.msrb.mxu2 %v6355_v2  ;;  %v4951_v59 = vor.u32 %v7121_v50, %v4948_v51  ;;  %v5207_v60 = vor.u32 %v7185_v52, %v5204_v54  ;;  %v7113_v62 = vld [vmem:[#allocation6 + $0x10c] sm:$0xf]  ;;  %v5719_v1 = vor.u32 %v7313_v57, %v5716_v58  ;;  %v3273_v54 = vpop.f32.mrf.mxu1 }
 0x146   :  { %v7341_v0 = vld [vmem:[#allocation6 + $0x824] sm:$0xf0]  ;;  %v5172_v2 = vld [vmem:[#allocation6 + $0x328] sm:$0xf0] }
 0x147   :  { %v6066_v3 = vld [vmem:[#allocation6 + $0xa08] sm:$0xf]  ;;  %v5811_v17 = vor.u32 %v7341_v0, %v5810_v63  ;;  %3502 = vmatpush.bf16.msrb.mxu3 %v6611_v9  ;;  %v4916_v63 = vld [vmem:[#allocation6 + $0x128] sm:$0xf0] }
 0x148   :  { %v7405_v5 = vld [vmem:[#allocation6 + $0xa24] sm:$0xf0]  ;;  %v7177_v0 = vld [vmem:[#allocation6 + $0x30c] sm:$0xf] }
 0x149   :  { %v6322_v7 = vld [vmem:[#allocation6 + $0xc08] sm:$0xf]  ;;  %v6067_v24 = vor.u32 %v7405_v5, %v6066_v3  ;;  %3464 = vmatpush.bf16.msrb.mxu0 %v5811_v17  ;;  %v7241_v3 = vld [vmem:[#allocation6 + $0x50c] sm:$0xf] }
 0x14a   :  { %v7469_v10 = vld [vmem:[#allocation6 + $0xc24] sm:$0xf0]  ;;  %v5428_v5 = vld [vmem:[#allocation6 + $0x528] sm:$0xf0] }
 0x14b   :  { %v6578_v11 = vld [vmem:[#allocation6 + $0xe08] sm:$0xf]  ;;  %v6323_v25 = vor.u32 %v7469_v10, %v6322_v7  ;;  %3477 = vmatpush.bf16.msrb.mxu1 %v6067_v24  ;;  %v7305_v7 = vld [vmem:[#allocation6 + $0x70c] sm:$0xf]  ;;  %v4919_v10 = vor.u32 %v7113_v62, %v4916_v63  ;;  %v5431_v13 = vor.u32 %v7241_v3, %v5428_v5 }
 0x14c   :  { %v7533_v12 = vld [vmem:[#allocation6 + $0xe24] sm:$0xf0]  ;;  %3465 = vmatmul.bf16.vlgmr.msrb.gmra.mxu0 %v7892_v41  ;;  %v5684_v9 = vld [vmem:[#allocation6 + $0x728] sm:$0xf0] }
 0x14d   :  { %v6579_v29 = vor.u32 %v7533_v12, %v6578_v11  ;;  %3490 = vmatpush.bf16.msrb.mxu2 %v6323_v25  ;;  %3509 = vmatpush.bf16.msra.mxu0 %v5015_v30  ;;  %v3258_v11 = vpop.f32.mrf.mxu0  ;;  %v5175_v12 = vor.u32 %v7177_v0, %v5172_v2  ;;  %v5687_v19 = vor.u32 %v7305_v7, %v5684_v9  ;;  %v5140_v22 = vld [vmem:[#allocation6 + $0x2e8] sm:$0xf0]  ;;  %v3286_v7 = vpop.f32.mrf.mxu2 }
 0x14e   :  { %3478 = vmatmul.bf16.vlgmr.msrb.gmra.mxu1 %v7896_v44  ;;  %v3259_v17 = vadd.f32 %v3258_v11, %v7914_v8  ;;  %v5396_v24 = vld [vmem:[#allocation6 + $0x4e8] sm:$0xf0] }
 0x14f   :  { %3503 = vmatpush.bf16.msrb.mxu3 %v6579_v29  ;;  %3522 = vmatpush.bf16.msra.mxu1 %v5271_v32  ;;  %v7297_v25 = vld [vmem:[#allocation6 + $0x6cc] sm:$0xf]  ;;  %v5143_v29 = vor.u32 %v7169_v16, %v5140_v22  ;;  %v5399_v30 = vor.u32 %v7233_v23, %v5396_v24 }
 0x150   :  { %3491 = vmatmul.bf16.vlgmr.msrb.gmra.mxu2 %v7890_v38  ;;  %v5652_v26 = vld [vmem:[#allocation6 + $0x6e8] sm:$0xf0]  ;;  %v3272_v27 = vadd.f32 %v3271_v18, %v3259_v17 }
 0x151   :  { %3535 = vmatpush.bf16.msra.mxu2 %v5527_v33  ;;  %3510 = vmatpush.bf16.msra.mxu0 %v4983_v47  ;;  %v7097_v31 = vld [vmem:[#allocation6 + $0x8c] sm:$0xf]  ;;  %v5655_v8 = vor.u32 %v7297_v25, %v5652_v26 }
 0x152   :  { %3504 = vmatmul.bf16.vlgmr.msrb.gmra.mxu3 %v7894_v42  ;;  %v4852_v32 = vld [vmem:[#allocation6 + $0xa8] sm:$0xf0]  ;;  %v3285_v39 = vadd.f32 %v3284_v34, %v3272_v27 }
 0x153   :  { %3548 = vmatpush.bf16.msra.mxu3 %v5783_v37  ;;  %3523 = vmatpush.bf16.msra.mxu1 %v5239_v48  ;;  %v7161_v33 = vld [vmem:[#allocation6 + $0x28c] sm:$0xf]  ;;  %v4855_v46 = vor.u32 %v7097_v31, %v4852_v32 }
 0x154   :  { %v5108_v35 = vld [vmem:[#allocation6 + $0x2a8] sm:$0xf0]  ;;  %v7921_v47 = vadd.f32 %v3297_v40, %v3285_v39 }
 0x155   :  { %3536 = vmatpush.bf16.msra.mxu2 %v5495_v49  ;;  %3511 = vmatpush.bf16.msra.mxu0 %v4951_v59  ;;  %v7225_v36 = vld [vmem:[#allocation6 + $0x48c] sm:$0xf]  ;;  %v3260_v48 = vpop.f32.mrf.mxu0  ;;  %v5111_v49 = vor.u32 %v7161_v33, %v5108_v35 }
 0x156   :  { %v5364_v37 = vld [vmem:[#allocation6 + $0x4a8] sm:$0xf0] }
 0x157   :  { %3549 = vmatpush.bf16.msra.mxu3 %v5751_v53  ;;  %3524 = vmatpush.bf16.msra.mxu1 %v5207_v60  ;;  %v7289_v43 = vld [vmem:[#allocation6 + $0x68c] sm:$0xf]  ;;  %v5367_v50 = vor.u32 %v7225_v36, %v5364_v37 }
 0x158   :  { %v5620_v45 = vld [vmem:[#allocation6 + $0x6a8] sm:$0xf0] }
 0x159   :  { %3537 = vmatpush.bf16.msra.mxu2 %v5463_v61  ;;  %3512 = vmatpush.bf16.msra.mxu0 %v4919_v10  ;;  %v7089_v51 = vld [vmem:[#allocation6 + $0x4c] sm:$0xf]  ;;  %v5623_v55 = vor.u32 %v7289_v43, %v5620_v45 }
 0x15a   :  { %v4820_v52 = vld [vmem:[#allocation6 + $0x68] sm:$0xf0] }
 0x15b   :  { %3550 = vmatpush.bf16.msra.mxu3 %v5719_v1  ;;  %3525 = vmatpush.bf16.msra.mxu1 %v5175_v12  ;;  %v7153_v53 = vld [vmem:[#allocation6 + $0x24c] sm:$0xf]  ;;  %v4823_v61 = vor.u32 %v7089_v51, %v4820_v52 }
 0x15c   :  { %v5076_v56 = vld [vmem:[#allocation6 + $0x268] sm:$0xf0] }
 0x15d   :  { %3538 = vmatpush.bf16.msra.mxu2 %v5431_v13  ;;  %3513 = vmatpush.bf16.msra.mxu0 %v4887_v28  ;;  %v7217_v57 = vld [vmem:[#allocation6 + $0x44c] sm:$0xf]  ;;  %v5079_v0 = vor.u32 %v7153_v53, %v5076_v56  ;;  %v3299_v13 = vpop.f32.mrf.mxu3  ;;  %v3310_v7 = vpop.f32.mrf.mxu0 }
 0x15e   :  { %v5332_v58 = vld [vmem:[#allocation6 + $0x468] sm:$0xf0] }
 0x15f   :  { %3551 = vmatpush.bf16.msra.mxu3 %v5687_v19  ;;  %3526 = vmatpush.bf16.msra.mxu1 %v5143_v29  ;;  %v7281_v59 = vld [vmem:[#allocation6 + $0x64c] sm:$0xf]  ;;  %v5335_v1 = vor.u32 %v7217_v57, %v5332_v58 }
 0x160   :  { %v5588_v60 = vld [vmem:[#allocation6 + $0x668] sm:$0xf0] }
 0x161   :  { %3539 = vmatpush.bf16.msra.mxu2 %v5399_v30  ;;  %3514 = vmatpush.bf16.msra.mxu0 %v4855_v46  ;;  %v7081_v62 = vld [vmem:[#allocation6 + $0xc] sm:$0xf]  ;;  %v5591_v9 = vor.u32 %v7281_v59, %v5588_v60 }
 0x162   :  { %v4788_v63 = vld [vmem:[#allocation6 + $0x28] sm:$0xf0] }
 0x163   :  { %3552 = vmatpush.bf16.msra.mxu3 %v5655_v8  ;;  %3527 = vmatpush.bf16.msra.mxu1 %v5111_v49  ;;  %v7145_v2 = vld [vmem:[#allocation6 + $0x20c] sm:$0xf]  ;;  %v4791_v17 = vor.u32 %v7081_v62, %v4788_v63 }
 0x164   :  { %v5044_v3 = vld [vmem:[#allocation6 + $0x228] sm:$0xf0] }
 0x165   :  { %3540 = vmatpush.bf16.msra.mxu2 %v5367_v50  ;;  %v7209_v5 = vld [vmem:[#allocation6 + $0x40c] sm:$0xf]  ;;  %3515 = vmatpush.bf16.msra.mxu0 %v4823_v61  ;;  %v5047_v23 = vor.u32 %v7145_v2, %v5044_v3 }
 0x166   :  { %v5300_v10 = vld [vmem:[#allocation6 + $0x428] sm:$0xf0] }
 0x167   :  { %3553 = vmatpush.bf16.msra.mxu3 %v5623_v55  ;;  %v7273_v11 = vld [vmem:[#allocation6 + $0x60c] sm:$0xf]  ;;  %3528 = vmatpush.bf16.msra.mxu1 %v5079_v0  ;;  %v5303_v24 = vor.u32 %v7209_v5, %v5300_v10 }
 0x168   :  { %v5556_v12 = vld [vmem:[#allocation6 + $0x628] sm:$0xf0] }
 0x169   :  { %v7393_v14 = vld [vmem:[#allocation6 + $0x9cc] sm:$0xf]  ;;  %3541 = vmatpush.bf16.msra.mxu2 %v5335_v1  ;;  %v5559_v27 = vor.u32 %v7273_v11, %v5556_v12  ;;  %3516 = vmatpush.bf16.msra.mxu0 %v4791_v17 }
 0x16a   :  { %v6036_v15 = vld [vmem:[#allocation6 + $0x9e8] sm:$0xf0] }
 0x16b   :  { %v7457_v16 = vld [vmem:[#allocation6 + $0xbcc] sm:$0xf]  ;;  %3554 = vmatpush.bf16.msra.mxu3 %v5591_v9  ;;  %v6039_v28 = vor.u32 %v7393_v14, %v6036_v15  ;;  %3529 = vmatpush.bf16.msra.mxu1 %v5047_v23  ;;  %v3323_v14 = vpop.f32.mrf.mxu1 }
 0x16c   :  { %v6292_v18 = vld [vmem:[#allocation6 + $0xbe8] sm:$0xf0]  ;;  %3517 = vmatmul.bf16.vlgmr.msra.gmra.mxu0 %v7883_v20 }
 0x16d   :  { %v7521_v19 = vld [vmem:[#allocation6 + $0xdcc] sm:$0xf]  ;;  %v6295_v29 = vor.u32 %v7457_v16, %v6292_v18  ;;  %3542 = vmatpush.bf16.msra.mxu2 %v5303_v24  ;;  %3561 = vmatpush.bf16.msrb.mxu0 %v6039_v28 }
 0x16e   :  { %v6548_v22 = vld [vmem:[#allocation6 + $0xde8] sm:$0xf0]  ;;  %3530 = vmatmul.bf16.vlgmr.msra.gmra.mxu1 %v7886_v21 }
 0x16f   :  { %v7585_v25 = vld [vmem:[#allocation6 + $0xfcc] sm:$0xf]  ;;  %v6551_v30 = vor.u32 %v7521_v19, %v6548_v22  ;;  %3555 = vmatpush.bf16.msra.mxu3 %v5559_v27  ;;  %3574 = vmatpush.bf16.msrb.mxu1 %v6295_v29  ;;  %v3324_v19 = vadd.f32 %v3323_v14, %v3310_v7 }
 0x170   :  { %v6804_v26 = vld [vmem:[#allocation6 + $0xfe8] sm:$0xf0]  ;;  %3543 = vmatmul.bf16.vlgmr.msra.gmra.mxu2 %v7878_v4 }
 0x171   :  { %v7385_v31 = vld [vmem:[#allocation6 + $0x98c] sm:$0xf]  ;;  %v6807_v34 = vor.u32 %v7585_v25, %v6804_v26  ;;  %3587 = vmatpush.bf16.msrb.mxu2 %v6551_v30  ;;  %v3336_v30 = vpop.f32.mrf.mxu2 }
 0x172   :  { %v6004_v32 = vld [vmem:[#allocation6 + $0x9a8] sm:$0xf0]  ;;  %3556 = vmatmul.bf16.vlgmr.msra.gmra.mxu3 %v7880_v6 }
 0x173   :  { %v7449_v33 = vld [vmem:[#allocation6 + $0xb8c] sm:$0xf]  ;;  %v6007_v40 = vor.u32 %v7385_v31, %v6004_v32  ;;  %3600 = vmatpush.bf16.msrb.mxu3 %v6807_v34 }
 0x174   :  { %v6260_v8 = vld [vmem:[#allocation6 + $0xba8] sm:$0xf0] }
 0x175   :  { %v7513_v35 = vld [vmem:[#allocation6 + $0xd8c] sm:$0xf]  ;;  %v6263_v43 = vor.u32 %v7449_v33, %v6260_v8  ;;  %3562 = vmatpush.bf16.msrb.mxu0 %v6007_v40  ;;  %v3337_v8 = vadd.f32 %v3336_v30, %v3324_v19  ;;  %v5242_v30 = vld [vmem:[#allocation6 + $0x390] sm:$0xf] }
 0x176   :  { %v6516_v36 = vld [vmem:[#allocation6 + $0xda8] sm:$0xf0] }
 0x177   :  { %v7577_v37 = vld [vmem:[#allocation6 + $0xf8c] sm:$0xf]  ;;  %v6519_v45 = vor.u32 %v7513_v35, %v6516_v36  ;;  %3575 = vmatpush.bf16.msrb.mxu1 %v6263_v43  ;;  %v3349_v35 = vpop.f32.mrf.mxu3  ;;  %v3312_v43 = vpop.f32.mrf.mxu0 }
 0x178   :  { %v6772_v39 = vld [vmem:[#allocation6 + $0xfa8] sm:$0xf0]  ;;  %v7927_v40 = vadd.f32 %v3349_v35, %v3337_v8  ;;  %v5754_v8 = vld [vmem:[#allocation6 + $0x790] sm:$0xf] }
 0x179   :  { %v7377_v46 = vld [vmem:[#allocation6 + $0x94c] sm:$0xf]  ;;  %v6775_v50 = vor.u32 %v7577_v37, %v6772_v39  ;;  %3588 = vmatpush.bf16.msrb.mxu2 %v6519_v45  ;;  %v7326_v35 = vld [vmem:[#allocation6 + $0x7ac] sm:$0xf0] }
 0x17a   :  { %v5972_v48 = vld [vmem:[#allocation6 + $0x968] sm:$0xf0]  ;;  %v4954_v43 = vld [vmem:[#allocation6 + $0x150] sm:$0xf] }
 0x17b   :  { %v7441_v49 = vld [vmem:[#allocation6 + $0xb4c] sm:$0xf]  ;;  %v5975_v56 = vor.u32 %v7377_v46, %v5972_v48  ;;  %3601 = vmatpush.bf16.msrb.mxu3 %v6775_v50 }
 0x17c   :  { %v6228_v51 = vld [vmem:[#allocation6 + $0xb68] sm:$0xf0] }
 0x17d   :  { %v7505_v52 = vld [vmem:[#allocation6 + $0xd4c] sm:$0xf]  ;;  %v6231_v57 = vor.u32 %v7441_v49, %v6228_v51  ;;  %3563 = vmatpush.bf16.msrb.mxu0 %v5975_v56  ;;  %v3325_v51 = vpop.f32.mrf.mxu1 }
 0x17e   :  { %v6484_v53 = vld [vmem:[#allocation6 + $0xd68] sm:$0xf0]  ;;  %v7254_v51 = vld [vmem:[#allocation6 + $0x56c] sm:$0xf0] }
 0x17f   :  { %v7569_v54 = vld [vmem:[#allocation6 + $0xf4c] sm:$0xf]  ;;  %v6487_v58 = vor.u32 %v7505_v52, %v6484_v53  ;;  %3576 = vmatpush.bf16.msrb.mxu1 %v6231_v57 }
 0x180   :  { %v6740_v55 = vld [vmem:[#allocation6 + $0xf68] sm:$0xf0] }
 0x181   :  { %v7369_v59 = vld [vmem:[#allocation6 + $0x90c] sm:$0xf]  ;;  %v6743_v62 = vor.u32 %v7569_v54, %v6740_v55  ;;  %3589 = vmatpush.bf16.msrb.mxu2 %v6487_v58 }
 0x182   :  { %v5940_v60 = vld [vmem:[#allocation6 + $0x928] sm:$0xf0] }
 0x183   :  { %v7433_v61 = vld [vmem:[#allocation6 + $0xb0c] sm:$0xf]  ;;  %v5943_v5 = vor.u32 %v7369_v59, %v5940_v60  ;;  %3602 = vmatpush.bf16.msrb.mxu3 %v6743_v62 }
 0x184   :  { %v6196_v63 = vld [vmem:[#allocation6 + $0xb28] sm:$0xf0] }
 0x185   :  { %v7497_v0 = vld [vmem:[#allocation6 + $0xd0c] sm:$0xf]  ;;  %v6199_v9 = vor.u32 %v7433_v61, %v6196_v63  ;;  %3564 = vmatpush.bf16.msrb.mxu0 %v5943_v5 }
 0x186   :  { %v6452_v1 = vld [vmem:[#allocation6 + $0xd28] sm:$0xf0] }
 0x187   :  { %v7561_v2 = vld [vmem:[#allocation6 + $0xf0c] sm:$0xf]  ;;  %v6455_v10 = vor.u32 %v7497_v0, %v6452_v1  ;;  %3577 = vmatpush.bf16.msrb.mxu1 %v6199_v9 }
 0x188   :  { %v6708_v3 = vld [vmem:[#allocation6 + $0xf28] sm:$0xf0] }
 0x189   :  { %v7361_v11 = vld [vmem:[#allocation6 + $0x8cc] sm:$0xf]  ;;  %v6711_v15 = vor.u32 %v7561_v2, %v6708_v3  ;;  %3590 = vmatpush.bf16.msrb.mxu2 %v6455_v10  ;;  %v3338_v2 = vpop.f32.mrf.mxu2  ;;  %v3351_v10 = vpop.f32.mrf.mxu3 }
 0x18a   :  { %v5908_v12 = vld [vmem:[#allocation6 + $0x8e8] sm:$0xf0]  ;;  %v7110_v10 = vld [vmem:[#allocation6 + $0xec] sm:$0xf0] }
 0x18b   :  { %v7425_v13 = vld [vmem:[#allocation6 + $0xacc] sm:$0xf]  ;;  %v5911_v24 = vor.u32 %v7361_v11, %v5908_v12  ;;  %3603 = vmatpush.bf16.msrb.mxu3 %v6711_v15  ;;  %v5018_v11 = vld [vmem:[#allocation6 + $0x1d0] sm:$0xf] }
 0x18c   :  { %v6164_v16 = vld [vmem:[#allocation6 + $0xae8] sm:$0xf0]  ;;  %v7142_v12 = vld [vmem:[#allocation6 + $0x1ec] sm:$0xf0] }
 0x18d   :  { %v7489_v17 = vld [vmem:[#allocation6 + $0xccc] sm:$0xf]  ;;  %v6167_v25 = vor.u32 %v7425_v13, %v6164_v16  ;;  %3565 = vmatpush.bf16.msrb.mxu0 %v5911_v24  ;;  %v5274_v13 = vld [vmem:[#allocation6 + $0x3d0] sm:$0xf] }
 0x18e   :  { %v6420_v18 = vld [vmem:[#allocation6 + $0xce8] sm:$0xf0]  ;;  %v7206_v15 = vld [vmem:[#allocation6 + $0x3ec] sm:$0xf0] }
 0x18f   :  { %v7553_v22 = vld [vmem:[#allocation6 + $0xecc] sm:$0xf]  ;;  %v6423_v26 = vor.u32 %v7489_v17, %v6420_v18  ;;  %3578 = vmatpush.bf16.msrb.mxu1 %v6167_v25  ;;  %v5530_v16 = vld [vmem:[#allocation6 + $0x5d0] sm:$0xf]  ;;  %v5019_v25 = vor.u32 %v7142_v12, %v5018_v11 }
 0x190   :  { %v6676_v23 = vld [vmem:[#allocation6 + $0xee8] sm:$0xf0]  ;;  %v7270_v17 = vld [vmem:[#allocation6 + $0x5ec] sm:$0xf0] }
 0x191   :  { %v7353_v27 = vld [vmem:[#allocation6 + $0x88c] sm:$0xf]  ;;  %v6679_v31 = vor.u32 %v7553_v22, %v6676_v23  ;;  %3591 = vmatpush.bf16.msrb.mxu2 %v6423_v26  ;;  %v5786_v22 = vld [vmem:[#allocation6 + $0x7d0] sm:$0xf]  ;;  %v5275_v26 = vor.u32 %v7206_v15, %v5274_v13  ;;  %v3375_v13 = vpop.f32.mrf.mxu1 }
 0x192   :  { %v5876_v28 = vld [vmem:[#allocation6 + $0x8a8] sm:$0xf0]  ;;  %v7334_v23 = vld [vmem:[#allocation6 + $0x7ec] sm:$0xf0] }
 0x193   :  { %v7417_v29 = vld [vmem:[#allocation6 + $0xa8c] sm:$0xf]  ;;  %v5879_v39 = vor.u32 %v7353_v27, %v5876_v28  ;;  %3604 = vmatpush.bf16.msrb.mxu3 %v6679_v31  ;;  %v5531_v27 = vor.u32 %v7270_v17, %v5530_v16  ;;  %v4986_v28 = vld [vmem:[#allocation6 + $0x190] sm:$0xf]  ;;  %v5787_v31 = vor.u32 %v7334_v23, %v5786_v22 }
 0x194   :  { %v6132_v32 = vld [vmem:[#allocation6 + $0xaa8] sm:$0xf0]  ;;  %v5146_v11 = vld [vmem:[#allocation6 + $0x2d0] sm:$0xf] }
 0x195   :  { %v7481_v33 = vld [vmem:[#allocation6 + $0xc8c] sm:$0xf]  ;;  %v6135_v45 = vor.u32 %v7417_v29, %v6132_v32  ;;  %3566 = vmatpush.bf16.msrb.mxu0 %v5879_v39  ;;  %v7134_v29 = vld [vmem:[#allocation6 + $0x1ac] sm:$0xf0] }
 0x196   :  { %v6388_v34 = vld [vmem:[#allocation6 + $0xca8] sm:$0xf0]  ;;  %v7198_v32 = vld [vmem:[#allocation6 + $0x3ac] sm:$0xf0] }
 0x197   :  { %v7545_v36 = vld [vmem:[#allocation6 + $0xe8c] sm:$0xf]  ;;  %v6391_v46 = vor.u32 %v7481_v33, %v6388_v34  ;;  %3579 = vmatpush.bf16.msrb.mxu1 %v6135_v45  ;;  %v5498_v33 = vld [vmem:[#allocation6 + $0x590] sm:$0xf] }
 0x198   :  { %v6644_v37 = vld [vmem:[#allocation6 + $0xea8] sm:$0xf0]  ;;  %v7262_v34 = vld [vmem:[#allocation6 + $0x5ac] sm:$0xf0] }
 0x199   :  { %v7345_v48 = vld [vmem:[#allocation6 + $0x84c] sm:$0xf]  ;;  %v6647_v52 = vor.u32 %v7545_v36, %v6644_v37  ;;  %3592 = vmatpush.bf16.msrb.mxu2 %v6391_v46  ;;  %v4987_v36 = vor.u32 %v7134_v29, %v4986_v28  ;;  %v5243_v37 = vor.u32 %v7198_v32, %v5242_v30  ;;  %v5499_v39 = vor.u32 %v7262_v34, %v5498_v33  ;;  %v7126_v45 = vld [vmem:[#allocation6 + $0x16c] sm:$0xf0]  ;;  %v3388_v29 = vpop.f32.mrf.mxu2  ;;  %v3401_v34 = vpop.f32.mrf.mxu3 }
 0x19a   :  { %v5844_v49 = vld [vmem:[#allocation6 + $0x868] sm:$0xf0]  ;;  %v5210_v46 = vld [vmem:[#allocation6 + $0x350] sm:$0xf] }
 0x19b   :  { %v7409_v50 = vld [vmem:[#allocation6 + $0xa4c] sm:$0xf]  ;;  %v5847_v58 = vor.u32 %v7345_v48, %v5844_v49  ;;  %3605 = vmatpush.bf16.msrb.mxu3 %v6647_v52  ;;  %v5755_v48 = vor.u32 %v7326_v35, %v5754_v8  ;;  %v7190_v49 = vld [vmem:[#allocation6 + $0x36c] sm:$0xf0] }
 0x19c   :  { %v6100_v53 = vld [vmem:[#allocation6 + $0xa68] sm:$0xf0]  ;;  %v5722_v52 = vld [vmem:[#allocation6 + $0x750] sm:$0xf] }
 0x19d   :  { %v7473_v54 = vld [vmem:[#allocation6 + $0xc4c] sm:$0xf]  ;;  %v6103_v61 = vor.u32 %v7409_v50, %v6100_v53  ;;  %3567 = vmatpush.bf16.msrb.mxu0 %v5847_v58  ;;  %v5466_v50 = vld [vmem:[#allocation6 + $0x550] sm:$0xf] }
 0x19e   :  { %v6356_v55 = vld [vmem:[#allocation6 + $0xc68] sm:$0xf0]  ;;  %v7318_v53 = vld [vmem:[#allocation6 + $0x76c] sm:$0xf0] }
 0x19f   :  { %v7537_v56 = vld [vmem:[#allocation6 + $0xe4c] sm:$0xf]  ;;  %v6359_v62 = vor.u32 %v7473_v54, %v6356_v55  ;;  %3580 = vmatpush.bf16.msrb.mxu1 %v6103_v61  ;;  %v4955_v54 = vor.u32 %v7126_v45, %v4954_v43  ;;  %v5211_v55 = vor.u32 %v7190_v49, %v5210_v46  ;;  %v7118_v58 = vld [vmem:[#allocation6 + $0x12c] sm:$0xf0] }
 0x1a0   :  { %v6612_v57 = vld [vmem:[#allocation6 + $0xe68] sm:$0xf0]  ;;  %v7182_v61 = vld [vmem:[#allocation6 + $0x32c] sm:$0xf0] }
 0x1a1   :  { %v7337_v59 = vld [vmem:[#allocation6 + $0x80c] sm:$0xf]  ;;  %v6615_v3 = vor.u32 %v7537_v56, %v6612_v57  ;;  %3593 = vmatpush.bf16.msrb.mxu2 %v6359_v62  ;;  %v5467_v56 = vor.u32 %v7254_v51, %v5466_v50  ;;  %v4922_v57 = vld [vmem:[#allocation6 + $0x110] sm:$0xf]  ;;  %v3377_v50 = vpop.f32.mrf.mxu1 }
 0x1a2   :  { %v5812_v60 = vld [vmem:[#allocation6 + $0x828] sm:$0xf0]  ;;  %v5434_v62 = vld [vmem:[#allocation6 + $0x510] sm:$0xf]  ;;  %v4923_v2 = vor.u32 %v7118_v58, %v4922_v57 }
 0x1a3   :  { %v7401_v63 = vld [vmem:[#allocation6 + $0xa0c] sm:$0xf]  ;;  %v5815_v14 = vor.u32 %v7337_v59, %v5812_v60  ;;  %3606 = vmatpush.bf16.msrb.mxu3 %v6615_v3  ;;  %v5178_v59 = vld [vmem:[#allocation6 + $0x310] sm:$0xf]  ;;  %v5723_v60 = vor.u32 %v7318_v53, %v5722_v52  ;;  %v3362_v3 = vpop.f32.mrf.mxu0 }
 0x1a4   :  { %v6068_v0 = vld [vmem:[#allocation6 + $0xa28] sm:$0xf0]  ;;  %v3363_v12 = vadd.f32 %v3362_v3, %v7927_v40  ;;  %v7174_v15 = vld [vmem:[#allocation6 + $0x2ec] sm:$0xf0] }
 0x1a5   :  { %v7465_v1 = vld [vmem:[#allocation6 + $0xc0c] sm:$0xf]  ;;  %v6071_v18 = vor.u32 %v7401_v63, %v6068_v0  ;;  %3568 = vmatpush.bf16.msrb.mxu0 %v5815_v14  ;;  %v7246_v63 = vld [vmem:[#allocation6 + $0x52c] sm:$0xf0] }
 0x1a6   :  { %v6324_v5 = vld [vmem:[#allocation6 + $0xc28] sm:$0xf0]  ;;  %v5690_v0 = vld [vmem:[#allocation6 + $0x710] sm:$0xf]  ;;  %v3376_v22 = vadd.f32 %v3375_v13, %v3363_v12 }
 0x1a7   :  { %v7529_v7 = vld [vmem:[#allocation6 + $0xe0c] sm:$0xf]  ;;  %v6327_v19 = vor.u32 %v7465_v1, %v6324_v5  ;;  %3581 = vmatpush.bf16.msrb.mxu1 %v6071_v18  ;;  %v7310_v1 = vld [vmem:[#allocation6 + $0x72c] sm:$0xf0]  ;;  %v5179_v5 = vor.u32 %v7182_v61, %v5178_v59 }
 0x1a8   :  { %v6580_v9 = vld [vmem:[#allocation6 + $0xe28] sm:$0xf0]  ;;  %3569 = vmatmul.bf16.vlgmr.msrb.gmra.mxu0 %v7892_v41  ;;  %v5691_v14 = vor.u32 %v7310_v1, %v5690_v0  ;;  %v5402_v16 = vld [vmem:[#allocation6 + $0x4d0] sm:$0xf]  ;;  %v3389_v33 = vadd.f32 %v3388_v29, %v3376_v22  ;;  %v3390_v1 = vpop.f32.mrf.mxu2 }
 0x1a9   :  { %v6583_v24 = vor.u32 %v7529_v7, %v6580_v9  ;;  %3594 = vmatpush.bf16.msrb.mxu2 %v6327_v19  ;;  %3613 = vmatpush.bf16.msra.mxu0 %v5019_v25  ;;  %v5435_v7 = vor.u32 %v7246_v63, %v5434_v62  ;;  %v4890_v9 = vld [vmem:[#allocation6 + $0xd0] sm:$0xf] }
 0x1aa   :  { %3582 = vmatmul.bf16.vlgmr.msrb.gmra.mxu1 %v7896_v44  ;;  %v7238_v17 = vld [vmem:[#allocation6 + $0x4ec] sm:$0xf0]  ;;  %v4891_v23 = vor.u32 %v7110_v10, %v4890_v9  ;;  %v3403_v9 = vpop.f32.mrf.mxu3 }
 0x1ab   :  { %3607 = vmatpush.bf16.msrb.mxu3 %v6583_v24  ;;  %3626 = vmatpush.bf16.msra.mxu1 %v5275_v26  ;;  %v5658_v18 = vld [vmem:[#allocation6 + $0x6d0] sm:$0xf]  ;;  %v5147_v24 = vor.u32 %v7174_v15, %v5146_v11  ;;  %v5403_v25 = vor.u32 %v7238_v17, %v5402_v16 }
 0x1ac   :  { %3595 = vmatmul.bf16.vlgmr.msrb.gmra.mxu2 %v7890_v38  ;;  %v7302_v19 = vld [vmem:[#allocation6 + $0x6ec] sm:$0xf0] }
 0x1ad   :  { %3639 = vmatpush.bf16.msra.mxu2 %v5531_v27  ;;  %3614 = vmatpush.bf16.msra.mxu0 %v4987_v36  ;;  %v4858_v26 = vld [vmem:[#allocation6 + $0x90] sm:$0xf]  ;;  %v5659_v40 = vor.u32 %v7302_v19, %v5658_v18 }
 0x1ae   :  { %3608 = vmatmul.bf16.vlgmr.msrb.gmra.mxu3 %v7894_v42  ;;  %v7102_v27 = vld [vmem:[#allocation6 + $0xac] sm:$0xf0] }
 0x1af   :  { %3652 = vmatpush.bf16.msra.mxu3 %v5787_v31  ;;  %3627 = vmatpush.bf16.msra.mxu1 %v5243_v37  ;;  %v5114_v28 = vld [vmem:[#allocation6 + $0x290] sm:$0xf]  ;;  %v4859_v36 = vor.u32 %v7102_v27, %v4858_v26  ;;  %v7934_v37 = vadd.f32 %v3401_v34, %v3389_v33 }
 0x1b0   :  { %v7166_v30 = vld [vmem:[#allocation6 + $0x2ac] sm:$0xf0] }
 0x1b1   :  { %3640 = vmatpush.bf16.msra.mxu2 %v5499_v39  ;;  %3615 = vmatpush.bf16.msra.mxu0 %v4955_v54  ;;  %v5370_v31 = vld [vmem:[#allocation6 + $0x490] sm:$0xf]  ;;  %v3364_v39 = vpop.f32.mrf.mxu0  ;;  %v5115_v43 = vor.u32 %v7166_v30, %v5114_v28 }
 0x1b2   :  { %v7230_v32 = vld [vmem:[#allocation6 + $0x4ac] sm:$0xf0] }
 0x1b3   :  { %3653 = vmatpush.bf16.msra.mxu3 %v5755_v48  ;;  %3628 = vmatpush.bf16.msra.mxu1 %v5211_v55  ;;  %v5626_v8 = vld [vmem:[#allocation6 + $0x690] sm:$0xf]  ;;  %v5371_v45 = vor.u32 %v7230_v32, %v5370_v31 }
 0x1b4   :  { %v7294_v35 = vld [vmem:[#allocation6 + $0x6ac] sm:$0xf0] }
 0x1b5   :  { %3641 = vmatpush.bf16.msra.mxu2 %v5467_v56  ;;  %3616 = vmatpush.bf16.msra.mxu0 %v4923_v2  ;;  %v4826_v46 = vld [vmem:[#allocation6 + $0x50] sm:$0xf]  ;;  %v5627_v51 = vor.u32 %v7294_v35, %v5626_v8 }
 0x1b6   :  { %v7094_v48 = vld [vmem:[#allocation6 + $0x6c] sm:$0xf0] }
 0x1b7   :  { %3654 = vmatpush.bf16.msra.mxu3 %v5723_v60  ;;  %3629 = vmatpush.bf16.msra.mxu1 %v5179_v5  ;;  %v5082_v49 = vld [vmem:[#allocation6 + $0x250] sm:$0xf]  ;;  %v4827_v57 = vor.u32 %v7094_v48, %v4826_v46 }
 0x1b8   :  { %v7158_v52 = vld [vmem:[#allocation6 + $0x26c] sm:$0xf0] }
 0x1b9   :  { %3642 = vmatpush.bf16.msra.mxu2 %v5435_v7  ;;  %3617 = vmatpush.bf16.msra.mxu0 %v4891_v23  ;;  %v5338_v53 = vld [vmem:[#allocation6 + $0x450] sm:$0xf]  ;;  %v5083_v60 = vor.u32 %v7158_v52, %v5082_v49 }
 0x1ba   :  { %v7222_v54 = vld [vmem:[#allocation6 + $0x46c] sm:$0xf0] }
 0x1bb   :  { %3655 = vmatpush.bf16.msra.mxu3 %v5691_v14  ;;  %3630 = vmatpush.bf16.msra.mxu1 %v5147_v24  ;;  %v5594_v55 = vld [vmem:[#allocation6 + $0x650] sm:$0xf]  ;;  %v5339_v61 = vor.u32 %v7222_v54, %v5338_v53 }
 0x1bc   :  { %v7286_v56 = vld [vmem:[#allocation6 + $0x66c] sm:$0xf0] }
 0x1bd   :  { %3643 = vmatpush.bf16.msra.mxu2 %v5403_v25  ;;  %3618 = vmatpush.bf16.msra.mxu0 %v4859_v36  ;;  %v4794_v58 = vld [vmem:[#allocation6 + $0x10] sm:$0xf]  ;;  %v5595_v2 = vor.u32 %v7286_v56, %v5594_v55 }
 0x1be   :  { %v7086_v59 = vld [vmem:[#allocation6 + $0x2c] sm:$0xf0] }
 0x1bf   :  { %3656 = vmatpush.bf16.msra.mxu3 %v5659_v40  ;;  %3631 = vmatpush.bf16.msra.mxu1 %v5115_v43  ;;  %v5050_v62 = vld [vmem:[#allocation6 + $0x210] sm:$0xf]  ;;  %v4795_v13 = vor.u32 %v7086_v59, %v4794_v58 }
 0x1c0   :  { %v7150_v63 = vld [vmem:[#allocation6 + $0x22c] sm:$0xf0] }
 0x1c1   :  { %3644 = vmatpush.bf16.msra.mxu2 %v5371_v45  ;;  %v5306_v0 = vld [vmem:[#allocation6 + $0x410] sm:$0xf]  ;;  %3619 = vmatpush.bf16.msra.mxu0 %v4827_v57  ;;  %v5051_v17 = vor.u32 %v7150_v63, %v5050_v62 }
 0x1c2   :  { %v7214_v3 = vld [vmem:[#allocation6 + $0x42c] sm:$0xf0] }
 0x1c3   :  { %3657 = vmatpush.bf16.msra.mxu3 %v5627_v51  ;;  %v5562_v5 = vld [vmem:[#allocation6 + $0x610] sm:$0xf]  ;;  %3632 = vmatpush.bf16.msra.mxu1 %v5083_v60  ;;  %v5307_v18 = vor.u32 %v7214_v3, %v5306_v0 }
 0x1c4   :  { %v7278_v7 = vld [vmem:[#allocation6 + $0x62c] sm:$0xf0] }
 0x1c5   :  { %v6042_v10 = vld [vmem:[#allocation6 + $0x9d0] sm:$0xf]  ;;  %3645 = vmatpush.bf16.msra.mxu2 %v5339_v61  ;;  %v5563_v23 = vor.u32 %v7278_v7, %v5562_v5  ;;  %3620 = vmatpush.bf16.msra.mxu0 %v4795_v13 }
 0x1c6   :  { %v7398_v11 = vld [vmem:[#allocation6 + $0x9ec] sm:$0xf0] }
 0x1c7   :  { %v6298_v12 = vld [vmem:[#allocation6 + $0xbd0] sm:$0xf]  ;;  %3658 = vmatpush.bf16.msra.mxu3 %v5595_v2  ;;  %v6043_v24 = vor.u32 %v7398_v11, %v6042_v10  ;;  %3633 = vmatpush.bf16.msra.mxu1 %v5051_v17  ;;  %v3414_v2 = vpop.f32.mrf.mxu0  ;;  %v3427_v11 = vpop.f32.mrf.mxu1 }
 0x1c8   :  { %v7462_v14 = vld [vmem:[#allocation6 + $0xbec] sm:$0xf0]  ;;  %3621 = vmatmul.bf16.vlgmr.msra.gmra.mxu0 %v7883_v20 }
 0x1c9   :  { %v6554_v15 = vld [vmem:[#allocation6 + $0xdd0] sm:$0xf]  ;;  %v6299_v25 = vor.u32 %v7462_v14, %v6298_v12  ;;  %3646 = vmatpush.bf16.msra.mxu2 %v5307_v18  ;;  %3665 = vmatpush.bf16.msrb.mxu0 %v6043_v24 }
 0x1ca   :  { %v7526_v16 = vld [vmem:[#allocation6 + $0xdec] sm:$0xf0]  ;;  %3634 = vmatmul.bf16.vlgmr.msra.gmra.mxu1 %v7886_v21 }
 0x1cb   :  { %v6810_v19 = vld [vmem:[#allocation6 + $0xfd0] sm:$0xf]  ;;  %v6555_v26 = vor.u32 %v7526_v16, %v6554_v15  ;;  %3659 = vmatpush.bf16.msra.mxu3 %v5563_v23  ;;  %3678 = vmatpush.bf16.msrb.mxu1 %v6299_v25  ;;  %v3428_v16 = vadd.f32 %v3427_v11, %v3414_v2  ;;  %v7202_v11 = vld [vmem:[#allocation6 + $0x3d4] sm:$0xf] }
 0x1cc   :  { %v7590_v22 = vld [vmem:[#allocation6 + $0xfec] sm:$0xf0]  ;;  %3647 = vmatmul.bf16.vlgmr.msra.gmra.mxu2 %v7878_v4 }
 0x1cd   :  { %v6010_v27 = vld [vmem:[#allocation6 + $0x990] sm:$0xf]  ;;  %v6811_v40 = vor.u32 %v7590_v22, %v6810_v19  ;;  %3691 = vmatpush.bf16.msrb.mxu2 %v6555_v26 }
 0x1ce   :  { %v7390_v28 = vld [vmem:[#allocation6 + $0x9ac] sm:$0xf0]  ;;  %3660 = vmatmul.bf16.vlgmr.msra.gmra.mxu3 %v7880_v6 }
 0x1cf   :  { %v6266_v29 = vld [vmem:[#allocation6 + $0xb90] sm:$0xf]  ;;  %v6011_v8 = vor.u32 %v7390_v28, %v6010_v27  ;;  %3704 = vmatpush.bf16.msrb.mxu3 %v6811_v40  ;;  %v3440_v27 = vpop.f32.mrf.mxu2 }
 0x1d0   :  { %v7454_v30 = vld [vmem:[#allocation6 + $0xbac] sm:$0xf0] }
 0x1d1   :  { %v6522_v31 = vld [vmem:[#allocation6 + $0xd90] sm:$0xf]  ;;  %v6267_v35 = vor.u32 %v7454_v30, %v6266_v29  ;;  %3666 = vmatpush.bf16.msrb.mxu0 %v6011_v8 }
 0x1d2   :  { %v7518_v32 = vld [vmem:[#allocation6 + $0xdac] sm:$0xf0] }
 0x1d3   :  { %v6778_v33 = vld [vmem:[#allocation6 + $0xf90] sm:$0xf]  ;;  %v6523_v36 = vor.u32 %v7518_v32, %v6522_v31  ;;  %3679 = vmatpush.bf16.msrb.mxu1 %v6267_v35  ;;  %v3441_v31 = vadd.f32 %v3440_v27, %v3428_v16  ;;  %v3453_v32 = vpop.f32.mrf.mxu3  ;;  %v4988_v27 = vld [vmem:[#allocation6 + $0x1b0] sm:$0xf0] }
 0x1d4   :  { %v7582_v34 = vld [vmem:[#allocation6 + $0xfac] sm:$0xf0] }
 0x1d5   :  { %v5978_v39 = vld [vmem:[#allocation6 + $0x950] sm:$0xf]  ;;  %v6779_v46 = vor.u32 %v7582_v34, %v6778_v33  ;;  %3692 = vmatpush.bf16.msrb.mxu2 %v6523_v36  ;;  %v7940_v35 = vadd.f32 %v3453_v32, %v3441_v31  ;;  %v3416_v36 = vpop.f32.mrf.mxu0  ;;  %v5500_v31 = vld [vmem:[#allocation6 + $0x5b0] sm:$0xf0] }
 0x1d6   :  { %v7382_v43 = vld [vmem:[#allocation6 + $0x96c] sm:$0xf0]  ;;  %v7322_v32 = vld [vmem:[#allocation6 + $0x794] sm:$0xf] }
 0x1d7   :  { %v6234_v45 = vld [vmem:[#allocation6 + $0xb50] sm:$0xf]  ;;  %v5979_v53 = vor.u32 %v7382_v43, %v5978_v39  ;;  %3705 = vmatpush.bf16.msrb.mxu3 %v6779_v46 }
 0x1d8   :  { %v7446_v48 = vld [vmem:[#allocation6 + $0xb6c] sm:$0xf0] }
 0x1d9   :  { %v6490_v49 = vld [vmem:[#allocation6 + $0xd50] sm:$0xf]  ;;  %v6235_v54 = vor.u32 %v7446_v48, %v6234_v45  ;;  %3667 = vmatpush.bf16.msrb.mxu0 %v5979_v53 }
 0x1da   :  { %v7510_v50 = vld [vmem:[#allocation6 + $0xd6c] sm:$0xf0] }
 0x1db   :  { %v6746_v51 = vld [vmem:[#allocation6 + $0xf50] sm:$0xf]  ;;  %v6491_v55 = vor.u32 %v7510_v50, %v6490_v49  ;;  %3680 = vmatpush.bf16.msrb.mxu1 %v6235_v54  ;;  %v3429_v49 = vpop.f32.mrf.mxu1 }
 0x1dc   :  { %v7574_v52 = vld [vmem:[#allocation6 + $0xf6c] sm:$0xf0]  ;;  %v7250_v49 = vld [vmem:[#allocation6 + $0x554] sm:$0xf] }
 0x1dd   :  { %v5946_v56 = vld [vmem:[#allocation6 + $0x910] sm:$0xf]  ;;  %v6747_v59 = vor.u32 %v7574_v52, %v6746_v51  ;;  %3693 = vmatpush.bf16.msrb.mxu2 %v6491_v55 }
 0x1de   :  { %v7374_v57 = vld [vmem:[#allocation6 + $0x92c] sm:$0xf0] }
 0x1df   :  { %v6202_v58 = vld [vmem:[#allocation6 + $0xb10] sm:$0xf]  ;;  %v5947_v1 = vor.u32 %v7374_v57, %v5946_v56  ;;  %3706 = vmatpush.bf16.msrb.mxu3 %v6747_v59 }
 0x1e0   :  { %v7438_v60 = vld [vmem:[#allocation6 + $0xb2c] sm:$0xf0] }
 0x1e1   :  { %v6458_v61 = vld [vmem:[#allocation6 + $0xd10] sm:$0xf]  ;;  %v6203_v3 = vor.u32 %v7438_v60, %v6202_v58  ;;  %3668 = vmatpush.bf16.msrb.mxu0 %v5947_v1 }
 0x1e2   :  { %v7502_v62 = vld [vmem:[#allocation6 + $0xd2c] sm:$0xf0] }
 0x1e3   :  { %v6714_v63 = vld [vmem:[#allocation6 + $0xf10] sm:$0xf]  ;;  %v6459_v5 = vor.u32 %v7502_v62, %v6458_v61  ;;  %3681 = vmatpush.bf16.msrb.mxu1 %v6203_v3 }
 0x1e4   :  { %v7566_v0 = vld [vmem:[#allocation6 + $0xf2c] sm:$0xf0] }
 0x1e5   :  { %v5914_v7 = vld [vmem:[#allocation6 + $0x8d0] sm:$0xf]  ;;  %v6715_v12 = vor.u32 %v7566_v0, %v6714_v63  ;;  %3694 = vmatpush.bf16.msrb.mxu2 %v6459_v5  ;;  %v3442_v0 = vpop.f32.mrf.mxu2 }
 0x1e6   :  { %v7366_v9 = vld [vmem:[#allocation6 + $0x8ec] sm:$0xf0]  ;;  %v5692_v0 = vld [vmem:[#allocation6 + $0x730] sm:$0xf0] }
 0x1e7   :  { %v6170_v10 = vld [vmem:[#allocation6 + $0xad0] sm:$0xf]  ;;  %v5915_v19 = vor.u32 %v7366_v9, %v5914_v7  ;;  %3707 = vmatpush.bf16.msrb.mxu3 %v6715_v12  ;;  %v3455_v7 = vpop.f32.mrf.mxu3  ;;  %v7138_v9 = vld [vmem:[#allocation6 + $0x1d4] sm:$0xf] }
 0x1e8   :  { %v7430_v13 = vld [vmem:[#allocation6 + $0xaec] sm:$0xf0]  ;;  %v7106_v7 = vld [vmem:[#allocation6 + $0xd4] sm:$0xf] }
 0x1e9   :  { %v6426_v14 = vld [vmem:[#allocation6 + $0xcd0] sm:$0xf]  ;;  %v6171_v22 = vor.u32 %v7430_v13, %v6170_v10  ;;  %3669 = vmatpush.bf16.msrb.mxu0 %v5915_v19  ;;  %v5020_v10 = vld [vmem:[#allocation6 + $0x1f0] sm:$0xf0] }
 0x1ea   :  { %v7494_v15 = vld [vmem:[#allocation6 + $0xcec] sm:$0xf0]  ;;  %v5276_v13 = vld [vmem:[#allocation6 + $0x3f0] sm:$0xf0] }
 0x1eb   :  { %v6682_v17 = vld [vmem:[#allocation6 + $0xed0] sm:$0xf]  ;;  %v6427_v23 = vor.u32 %v7494_v15, %v6426_v14  ;;  %3682 = vmatpush.bf16.msrb.mxu1 %v6171_v22  ;;  %v7266_v14 = vld [vmem:[#allocation6 + $0x5d4] sm:$0xf] }
 0x1ec   :  { %v7558_v18 = vld [vmem:[#allocation6 + $0xeec] sm:$0xf0]  ;;  %v5532_v15 = vld [vmem:[#allocation6 + $0x5f0] sm:$0xf0] }
 0x1ed   :  { %v5882_v24 = vld [vmem:[#allocation6 + $0x890] sm:$0xf]  ;;  %v6683_v28 = vor.u32 %v7558_v18, %v6682_v17  ;;  %3695 = vmatpush.bf16.msrb.mxu2 %v6427_v23  ;;  %v7330_v18 = vld [vmem:[#allocation6 + $0x7d4] sm:$0xf]  ;;  %v5023_v23 = vor.u32 %v7138_v9, %v5020_v10 }
 0x1ee   :  { %v7358_v25 = vld [vmem:[#allocation6 + $0x8ac] sm:$0xf0]  ;;  %v5788_v19 = vld [vmem:[#allocation6 + $0x7f0] sm:$0xf0] }
 0x1ef   :  { %v6138_v26 = vld [vmem:[#allocation6 + $0xa90] sm:$0xf]  ;;  %v5883_v8 = vor.u32 %v7358_v25, %v5882_v24  ;;  %3708 = vmatpush.bf16.msrb.mxu3 %v6683_v28  ;;  %v5279_v24 = vor.u32 %v7202_v11, %v5276_v13  ;;  %v5535_v25 = vor.u32 %v7266_v14, %v5532_v15  ;;  %v7194_v28 = vld [vmem:[#allocation6 + $0x394] sm:$0xf] }
 0x1f0   :  { %v7422_v29 = vld [vmem:[#allocation6 + $0xaac] sm:$0xf0]  ;;  %v4892_v9 = vld [vmem:[#allocation6 + $0xf0] sm:$0xf0] }
 0x1f1   :  { %v6394_v40 = vld [vmem:[#allocation6 + $0xc90] sm:$0xf]  ;;  %v6139_v39 = vor.u32 %v7422_v29, %v6138_v26  ;;  %3670 = vmatpush.bf16.msrb.mxu0 %v5883_v8  ;;  %v7130_v26 = vld [vmem:[#allocation6 + $0x194] sm:$0xf]  ;;  %v5791_v29 = vor.u32 %v7330_v18, %v5788_v19 }
 0x1f2   :  { %v7486_v30 = vld [vmem:[#allocation6 + $0xcac] sm:$0xf0]  ;;  %v7170_v10 = vld [vmem:[#allocation6 + $0x2d4] sm:$0xf] }
 0x1f3   :  { %v6650_v33 = vld [vmem:[#allocation6 + $0xe90] sm:$0xf]  ;;  %v6395_v43 = vor.u32 %v7486_v30, %v6394_v40  ;;  %3683 = vmatpush.bf16.msrb.mxu1 %v6139_v39  ;;  %v5244_v40 = vld [vmem:[#allocation6 + $0x3b0] sm:$0xf0] }
 0x1f4   :  { %v7550_v34 = vld [vmem:[#allocation6 + $0xeac] sm:$0xf0]  ;;  %v7258_v30 = vld [vmem:[#allocation6 + $0x594] sm:$0xf]  ;;  %v5247_v8 = vor.u32 %v7194_v28, %v5244_v40  ;;  %v3492_v28 = vpop.f32.mrf.mxu2 }
 0x1f5   :  { %v5850_v45 = vld [vmem:[#allocation6 + $0x850] sm:$0xf]  ;;  %v6651_v50 = vor.u32 %v7550_v34, %v6650_v33  ;;  %3696 = vmatpush.bf16.msrb.mxu2 %v6395_v43  ;;  %v5756_v33 = vld [vmem:[#allocation6 + $0x7b0] sm:$0xf0]  ;;  %v4991_v34 = vor.u32 %v7130_v26, %v4988_v27  ;;  %v5503_v36 = vor.u32 %v7258_v30, %v5500_v31 }
 0x1f6   :  { %v7350_v46 = vld [vmem:[#allocation6 + $0x86c] sm:$0xf0]  ;;  %v7122_v39 = vld [vmem:[#allocation6 + $0x154] sm:$0xf] }
 0x1f7   :  { %v6106_v48 = vld [vmem:[#allocation6 + $0xa50] sm:$0xf]  ;;  %v5851_v56 = vor.u32 %v7350_v46, %v5850_v45  ;;  %3709 = vmatpush.bf16.msrb.mxu3 %v6651_v50  ;;  %v4956_v43 = vld [vmem:[#allocation6 + $0x170] sm:$0xf0]  ;;  %v5759_v46 = vor.u32 %v7322_v32, %v5756_v33  ;;  %v3505_v32 = vpop.f32.mrf.mxu3 }
 0x1f8   :  { %v7414_v51 = vld [vmem:[#allocation6 + $0xa6c] sm:$0xf0]  ;;  %v7186_v45 = vld [vmem:[#allocation6 + $0x354] sm:$0xf] }
 0x1f9   :  { %v6362_v52 = vld [vmem:[#allocation6 + $0xc50] sm:$0xf]  ;;  %v6107_v59 = vor.u32 %v7414_v51, %v6106_v48  ;;  %3671 = vmatpush.bf16.msrb.mxu0 %v5851_v56  ;;  %v5212_v48 = vld [vmem:[#allocation6 + $0x370] sm:$0xf0] }
 0x1fa   :  { %v7478_v53 = vld [vmem:[#allocation6 + $0xc6c] sm:$0xf0]  ;;  %v5468_v50 = vld [vmem:[#allocation6 + $0x570] sm:$0xf0] }
 0x1fb   :  { %v6618_v54 = vld [vmem:[#allocation6 + $0xe50] sm:$0xf]  ;;  %v6363_v60 = vor.u32 %v7478_v53, %v6362_v52  ;;  %3684 = vmatpush.bf16.msrb.mxu1 %v6107_v59  ;;  %v7314_v51 = vld [vmem:[#allocation6 + $0x754] sm:$0xf]  ;;  %v4959_v53 = vor.u32 %v7122_v39, %v4956_v43 }
 0x1fc   :  { %v7542_v55 = vld [vmem:[#allocation6 + $0xe6c] sm:$0xf0]  ;;  %v5724_v52 = vld [vmem:[#allocation6 + $0x770] sm:$0xf0] }
 0x1fd   :  { %v5818_v57 = vld [vmem:[#allocation6 + $0x810] sm:$0xf]  ;;  %v6619_v1 = vor.u32 %v7542_v55, %v6618_v54  ;;  %3697 = vmatpush.bf16.msrb.mxu2 %v6363_v60  ;;  %v5215_v54 = vor.u32 %v7186_v45, %v5212_v48  ;;  %v5471_v55 = vor.u32 %v7250_v49, %v5468_v50  ;;  %v7114_v56 = vld [vmem:[#allocation6 + $0x114] sm:$0xf]  ;;  %v5727_v59 = vor.u32 %v7314_v51, %v5724_v52 }
 0x1fe   :  { %v7342_v58 = vld [vmem:[#allocation6 + $0x82c] sm:$0xf0]  ;;  %v5180_v60 = vld [vmem:[#allocation6 + $0x330] sm:$0xf0] }
 0x1ff   :  { %v6074_v61 = vld [vmem:[#allocation6 + $0xa10] sm:$0xf]  ;;  %v5819_v12 = vor.u32 %v7342_v58, %v5818_v57  ;;  %3710 = vmatpush.bf16.msrb.mxu3 %v6619_v1  ;;  %v4924_v57 = vld [vmem:[#allocation6 + $0x130] sm:$0xf0] }
 0x200   :  { %v7406_v62 = vld [vmem:[#allocation6 + $0xa2c] sm:$0xf0]  ;;  %v7178_v58 = vld [vmem:[#allocation6 + $0x314] sm:$0xf]  ;;  %v4927_v1 = vor.u32 %v7114_v56, %v4924_v57 }
 0x201   :  { %v6330_v63 = vld [vmem:[#allocation6 + $0xc10] sm:$0xf]  ;;  %v6075_v16 = vor.u32 %v7406_v62, %v6074_v61  ;;  %3672 = vmatpush.bf16.msrb.mxu0 %v5819_v12  ;;  %v7242_v61 = vld [vmem:[#allocation6 + $0x514] sm:$0xf]  ;;  %v3479_v12 = vpop.f32.mrf.mxu1 }
 0x202   :  { %v7470_v2 = vld [vmem:[#allocation6 + $0xc2c] sm:$0xf0]  ;;  %v5436_v62 = vld [vmem:[#allocation6 + $0x530] sm:$0xf0] }
 0x203   :  { %v6586_v3 = vld [vmem:[#allocation6 + $0xe10] sm:$0xf]  ;;  %v6331_v17 = vor.u32 %v7470_v2, %v6330_v63  ;;  %3685 = vmatpush.bf16.msrb.mxu1 %v6075_v16  ;;  %v7306_v63 = vld [vmem:[#allocation6 + $0x714] sm:$0xf]  ;;  %v3466_v2 = vpop.f32.mrf.mxu0 }
 0x204   :  { %v7534_v5 = vld [vmem:[#allocation6 + $0xe2c] sm:$0xf0]  ;;  %3673 = vmatmul.bf16.vlgmr.msrb.gmra.mxu0 %v7892_v41  ;;  %v3467_v11 = vadd.f32 %v3466_v2, %v7940_v35  ;;  %v5695_v13 = vor.u32 %v7306_v63, %v5692_v0  ;;  %v5148_v14 = vld [vmem:[#allocation6 + $0x2f0] sm:$0xf0] }
 0x205   :  { %v6587_v22 = vor.u32 %v7534_v5, %v6586_v3  ;;  %3698 = vmatpush.bf16.msrb.mxu2 %v6331_v17  ;;  %3717 = vmatpush.bf16.msra.mxu0 %v5023_v23  ;;  %v5183_v3 = vor.u32 %v7178_v58, %v5180_v60  ;;  %v5439_v5 = vor.u32 %v7242_v61, %v5436_v62  ;;  %v7234_v15 = vld [vmem:[#allocation6 + $0x4d4] sm:$0xf] }
 0x206   :  { %3686 = vmatmul.bf16.vlgmr.msrb.gmra.mxu1 %v7896_v44  ;;  %v5404_v16 = vld [vmem:[#allocation6 + $0x4f0] sm:$0xf0]  ;;  %v3480_v19 = vadd.f32 %v3479_v12, %v3467_v11  ;;  %v5151_v23 = vor.u32 %v7170_v10, %v5148_v14 }
 0x207   :  { %3711 = vmatpush.bf16.msrb.mxu3 %v6587_v22  ;;  %3730 = vmatpush.bf16.msra.mxu1 %v5279_v24  ;;  %v7298_v17 = vld [vmem:[#allocation6 + $0x6d4] sm:$0xf]  ;;  %v4895_v22 = vor.u32 %v7106_v7, %v4892_v9  ;;  %v5407_v24 = vor.u32 %v7234_v15, %v5404_v16  ;;  %v3507_v9 = vpop.f32.mrf.mxu3 }
 0x208   :  { %3699 = vmatmul.bf16.vlgmr.msrb.gmra.mxu2 %v7890_v38  ;;  %v5660_v18 = vld [vmem:[#allocation6 + $0x6f0] sm:$0xf0]  ;;  %v3493_v31 = vadd.f32 %v3492_v28, %v3480_v19 }
 0x209   :  { %3743 = vmatpush.bf16.msra.mxu2 %v5535_v25  ;;  %3718 = vmatpush.bf16.msra.mxu0 %v4991_v34  ;;  %v7098_v25 = vld [vmem:[#allocation6 + $0x94] sm:$0xf]  ;;  %v5663_v35 = vor.u32 %v7298_v17, %v5660_v18  ;;  %v3481_v50 = vpop.f32.mrf.mxu1 }
 0x20a   :  { %3712 = vmatmul.bf16.vlgmr.msrb.gmra.mxu3 %v7894_v42  ;;  %v4860_v26 = vld [vmem:[#allocation6 + $0xb0] sm:$0xf0] }
 0x20b   :  { %3756 = vmatpush.bf16.msra.mxu3 %v5791_v29  ;;  %3731 = vmatpush.bf16.msra.mxu1 %v5247_v8  ;;  %v7162_v27 = vld [vmem:[#allocation6 + $0x294] sm:$0xf]  ;;  %v4863_v8 = vor.u32 %v7098_v25, %v4860_v26  ;;  %v3468_v39 = vpop.f32.mrf.mxu0 }
 0x20c   :  { %v5116_v29 = vld [vmem:[#allocation6 + $0x2b0] sm:$0xf0] }
 0x20d   :  { %3744 = vmatpush.bf16.msra.mxu2 %v5503_v36  ;;  %3719 = vmatpush.bf16.msra.mxu0 %v4959_v53  ;;  %v7226_v40 = vld [vmem:[#allocation6 + $0x494] sm:$0xf]  ;;  %v7947_v36 = vadd.f32 %v3505_v32, %v3493_v31  ;;  %v5119_v43 = vor.u32 %v7162_v27, %v5116_v29 }
 0x20e   :  { %v5372_v30 = vld [vmem:[#allocation6 + $0x4b0] sm:$0xf0] }
 0x20f   :  { %3757 = vmatpush.bf16.msra.mxu3 %v5759_v46  ;;  %3732 = vmatpush.bf16.msra.mxu1 %v5215_v54  ;;  %v7290_v33 = vld [vmem:[#allocation6 + $0x694] sm:$0xf]  ;;  %v5375_v45 = vor.u32 %v7226_v40, %v5372_v30 }
 0x210   :  { %v5628_v34 = vld [vmem:[#allocation6 + $0x6b0] sm:$0xf0] }
 0x211   :  { %3745 = vmatpush.bf16.msra.mxu2 %v5471_v55  ;;  %3720 = vmatpush.bf16.msra.mxu0 %v4927_v1  ;;  %v7090_v46 = vld [vmem:[#allocation6 + $0x54] sm:$0xf]  ;;  %v5631_v51 = vor.u32 %v7290_v33, %v5628_v34  ;;  %v3494_v1 = vpop.f32.mrf.mxu2 }
 0x212   :  { %v4828_v48 = vld [vmem:[#allocation6 + $0x70] sm:$0xf0] }
 0x213   :  { %3758 = vmatpush.bf16.msra.mxu3 %v5727_v59  ;;  %3733 = vmatpush.bf16.msra.mxu1 %v5183_v3  ;;  %v7154_v49 = vld [vmem:[#allocation6 + $0x254] sm:$0xf]  ;;  %v4831_v57 = vor.u32 %v7090_v46, %v4828_v48 }
 0x214   :  { %v5084_v52 = vld [vmem:[#allocation6 + $0x270] sm:$0xf0] }
 0x215   :  { %3746 = vmatpush.bf16.msra.mxu2 %v5439_v5  ;;  %3721 = vmatpush.bf16.msra.mxu0 %v4895_v22  ;;  %v7218_v53 = vld [vmem:[#allocation6 + $0x454] sm:$0xf]  ;;  %v5087_v60 = vor.u32 %v7154_v49, %v5084_v52 }
 0x216   :  { %v5340_v54 = vld [vmem:[#allocation6 + $0x470] sm:$0xf0] }
 0x217   :  { %3759 = vmatpush.bf16.msra.mxu3 %v5695_v13  ;;  %3734 = vmatpush.bf16.msra.mxu1 %v5151_v23  ;;  %v7282_v55 = vld [vmem:[#allocation6 + $0x654] sm:$0xf]  ;;  %v5343_v61 = vor.u32 %v7218_v53, %v5340_v54 }
 0x218   :  { %v5596_v56 = vld [vmem:[#allocation6 + $0x670] sm:$0xf0] }
 0x219   :  { %3747 = vmatpush.bf16.msra.mxu2 %v5407_v24  ;;  %3722 = vmatpush.bf16.msra.mxu0 %v4863_v8  ;;  %v7082_v58 = vld [vmem:[#allocation6 + $0x14] sm:$0xf]  ;;  %v5599_v2 = vor.u32 %v7282_v55, %v5596_v56 }
 0x21a   :  { %v4796_v59 = vld [vmem:[#allocation6 + $0x30] sm:$0xf0] }
 0x21b   :  { %3760 = vmatpush.bf16.msra.mxu3 %v5663_v35  ;;  %3735 = vmatpush.bf16.msra.mxu1 %v5119_v43  ;;  %v7146_v62 = vld [vmem:[#allocation6 + $0x214] sm:$0xf]  ;;  %v4799_v13 = vor.u32 %v7082_v58, %v4796_v59 }
 0x21c   :  { %v5052_v63 = vld [vmem:[#allocation6 + $0x230] sm:$0xf0] }
 0x21d   :  { %3748 = vmatpush.bf16.msra.mxu2 %v5375_v45  ;;  %v7210_v0 = vld [vmem:[#allocation6 + $0x414] sm:$0xf]  ;;  %3723 = vmatpush.bf16.msra.mxu0 %v4831_v57  ;;  %v5055_v17 = vor.u32 %v7146_v62, %v5052_v63 }
 0x21e   :  { %v5308_v3 = vld [vmem:[#allocation6 + $0x430] sm:$0xf0] }
 0x21f   :  { %3761 = vmatpush.bf16.msra.mxu3 %v5631_v51  ;;  %v7274_v5 = vld [vmem:[#allocation6 + $0x614] sm:$0xf]  ;;  %3736 = vmatpush.bf16.msra.mxu1 %v5087_v60  ;;  %v5311_v18 = vor.u32 %v7210_v0, %v5308_v3  ;;  %v3518_v3 = vpop.f32.mrf.mxu0 }
 0x220   :  { %v5564_v7 = vld [vmem:[#allocation6 + $0x630] sm:$0xf0] }
 0x221   :  { %v7394_v10 = vld [vmem:[#allocation6 + $0x9d4] sm:$0xf]  ;;  %3749 = vmatpush.bf16.msra.mxu2 %v5343_v61  ;;  %v5567_v23 = vor.u32 %v7274_v5, %v5564_v7  ;;  %3724 = vmatpush.bf16.msra.mxu0 %v4799_v13 }
 0x222   :  { %v6044_v11 = vld [vmem:[#allocation6 + $0x9f0] sm:$0xf0] }
 0x223   :  { %v7458_v12 = vld [vmem:[#allocation6 + $0xbd4] sm:$0xf]  ;;  %3762 = vmatpush.bf16.msra.mxu3 %v5599_v2  ;;  %v6047_v24 = vor.u32 %v7394_v10, %v6044_v11  ;;  %3737 = vmatpush.bf16.msra.mxu1 %v5055_v17 }
 0x224   :  { %v6300_v14 = vld [vmem:[#allocation6 + $0xbf0] sm:$0xf0]  ;;  %3725 = vmatmul.bf16.vlgmr.msra.gmra.mxu0 %v7883_v20 }
 0x225   :  { %v7522_v15 = vld [vmem:[#allocation6 + $0xdd4] sm:$0xf]  ;;  %v6303_v25 = vor.u32 %v7458_v12, %v6300_v14  ;;  %3750 = vmatpush.bf16.msra.mxu2 %v5311_v18  ;;  %3769 = vmatpush.bf16.msrb.mxu0 %v6047_v24  ;;  %v3531_v12 = vpop.f32.mrf.mxu1 }
 0x226   :  { %v6556_v16 = vld [vmem:[#allocation6 + $0xdf0] sm:$0xf0]  ;;  %3738 = vmatmul.bf16.vlgmr.msra.gmra.mxu1 %v7886_v21  ;;  %v3532_v17 = vadd.f32 %v3531_v12, %v3518_v3  ;;  %v7143_v12 = vld [vmem:[#allocation6 + $0x1f4] sm:$0xf0] }
 0x227   :  { %v7586_v19 = vld [vmem:[#allocation6 + $0xfd4] sm:$0xf]  ;;  %v6559_v26 = vor.u32 %v7522_v15, %v6556_v16  ;;  %3763 = vmatpush.bf16.msra.mxu3 %v5567_v23  ;;  %3782 = vmatpush.bf16.msrb.mxu1 %v6303_v25 }
 0x228   :  { %v6812_v22 = vld [vmem:[#allocation6 + $0xff0] sm:$0xf0]  ;;  %3751 = vmatmul.bf16.vlgmr.msra.gmra.mxu2 %v7878_v4 }
 0x229   :  { %v7386_v27 = vld [vmem:[#allocation6 + $0x994] sm:$0xf]  ;;  %v6815_v29 = vor.u32 %v7586_v19, %v6812_v22  ;;  %3795 = vmatpush.bf16.msrb.mxu2 %v6559_v26 }
 0x22a   :  { %v6012_v28 = vld [vmem:[#allocation6 + $0x9b0] sm:$0xf0]  ;;  %3764 = vmatmul.bf16.vlgmr.msra.gmra.mxu3 %v7880_v6 }
 0x22b   :  { %v7450_v35 = vld [vmem:[#allocation6 + $0xb94] sm:$0xf]  ;;  %v6015_v34 = vor.u32 %v7386_v27, %v6012_v28  ;;  %3808 = vmatpush.bf16.msrb.mxu3 %v6815_v29  ;;  %v3544_v28 = vpop.f32.mrf.mxu2 }
 0x22c   :  { %v6268_v40 = vld [vmem:[#allocation6 + $0xbb0] sm:$0xf0] }
 0x22d   :  { %v7514_v30 = vld [vmem:[#allocation6 + $0xd94] sm:$0xf]  ;;  %v6271_v8 = vor.u32 %v7450_v35, %v6268_v40  ;;  %3770 = vmatpush.bf16.msrb.mxu0 %v6015_v34 }
 0x22e   :  { %v6524_v31 = vld [vmem:[#allocation6 + $0xdb0] sm:$0xf0] }
 0x22f   :  { %v7578_v32 = vld [vmem:[#allocation6 + $0xf94] sm:$0xf]  ;;  %v6527_v39 = vor.u32 %v7514_v30, %v6524_v31  ;;  %3783 = vmatpush.bf16.msrb.mxu1 %v6271_v8  ;;  %v3545_v31 = vadd.f32 %v3544_v28, %v3532_v17  ;;  %v7271_v17 = vld [vmem:[#allocation6 + $0x5f4] sm:$0xf0] }
 0x230   :  { %v6780_v33 = vld [vmem:[#allocation6 + $0xfb0] sm:$0xf0]  ;;  %v4994_v28 = vld [vmem:[#allocation6 + $0x198] sm:$0xf] }
 0x231   :  { %v7378_v43 = vld [vmem:[#allocation6 + $0x954] sm:$0xf]  ;;  %v6783_v48 = vor.u32 %v7578_v32, %v6780_v33  ;;  %3796 = vmatpush.bf16.msrb.mxu2 %v6527_v39  ;;  %v3557_v32 = vpop.f32.mrf.mxu3 }
 0x232   :  { %v5980_v45 = vld [vmem:[#allocation6 + $0x970] sm:$0xf0]  ;;  %v7953_v39 = vadd.f32 %v3557_v32, %v3545_v31  ;;  %v5506_v31 = vld [vmem:[#allocation6 + $0x598] sm:$0xf] }
 0x233   :  { %v7442_v46 = vld [vmem:[#allocation6 + $0xb54] sm:$0xf]  ;;  %v5983_v54 = vor.u32 %v7378_v43, %v5980_v45  ;;  %3809 = vmatpush.bf16.msrb.mxu3 %v6783_v48  ;;  %v3520_v43 = vpop.f32.mrf.mxu0  ;;  %v7263_v32 = vld [vmem:[#allocation6 + $0x5b4] sm:$0xf0] }
 0x234   :  { %v6236_v49 = vld [vmem:[#allocation6 + $0xb70] sm:$0xf0] }
 0x235   :  { %v7506_v50 = vld [vmem:[#allocation6 + $0xd54] sm:$0xf]  ;;  %v6239_v55 = vor.u32 %v7442_v46, %v6236_v49  ;;  %3771 = vmatpush.bf16.msrb.mxu0 %v5983_v54 }
 0x236   :  { %v6492_v51 = vld [vmem:[#allocation6 + $0xd70] sm:$0xf0] }
 0x237   :  { %v7570_v52 = vld [vmem:[#allocation6 + $0xf54] sm:$0xf]  ;;  %v6495_v56 = vor.u32 %v7506_v50, %v6492_v51  ;;  %3784 = vmatpush.bf16.msrb.mxu1 %v6239_v55  ;;  %v3533_v51 = vpop.f32.mrf.mxu1 }
 0x238   :  { %v6748_v53 = vld [vmem:[#allocation6 + $0xf70] sm:$0xf0]  ;;  %v7191_v51 = vld [vmem:[#allocation6 + $0x374] sm:$0xf0] }
 0x239   :  { %v7370_v57 = vld [vmem:[#allocation6 + $0x914] sm:$0xf]  ;;  %v6751_v60 = vor.u32 %v7570_v52, %v6748_v53  ;;  %3797 = vmatpush.bf16.msrb.mxu2 %v6495_v56 }
 0x23a   :  { %v5948_v58 = vld [vmem:[#allocation6 + $0x930] sm:$0xf0] }
 0x23b   :  { %v7434_v59 = vld [vmem:[#allocation6 + $0xb14] sm:$0xf]  ;;  %v5951_v2 = vor.u32 %v7370_v57, %v5948_v58  ;;  %3810 = vmatpush.bf16.msrb.mxu3 %v6751_v60 }
 0x23c   :  { %v6204_v61 = vld [vmem:[#allocation6 + $0xb30] sm:$0xf0] }
 0x23d   :  { %v7498_v62 = vld [vmem:[#allocation6 + $0xd14] sm:$0xf]  ;;  %v6207_v5 = vor.u32 %v7434_v59, %v6204_v61  ;;  %3772 = vmatpush.bf16.msrb.mxu0 %v5951_v2  ;;  %v3546_v2 = vpop.f32.mrf.mxu2 }
 0x23e   :  { %v6460_v63 = vld [vmem:[#allocation6 + $0xd30] sm:$0xf0]  ;;  %v5698_v2 = vld [vmem:[#allocation6 + $0x718] sm:$0xf] }
 0x23f   :  { %v7562_v0 = vld [vmem:[#allocation6 + $0xf14] sm:$0xf]  ;;  %v6463_v7 = vor.u32 %v7498_v62, %v6460_v63  ;;  %3785 = vmatpush.bf16.msrb.mxu1 %v6207_v5 }
 0x240   :  { %v6716_v1 = vld [vmem:[#allocation6 + $0xf30] sm:$0xf0] }
 0x241   :  { %v7362_v9 = vld [vmem:[#allocation6 + $0x8d4] sm:$0xf]  ;;  %v6719_v13 = vor.u32 %v7562_v0, %v6716_v1  ;;  %3798 = vmatpush.bf16.msrb.mxu2 %v6463_v7 }
 0x242   :  { %v5916_v10 = vld [vmem:[#allocation6 + $0x8f0] sm:$0xf0] }
 0x243   :  { %v7426_v11 = vld [vmem:[#allocation6 + $0xad4] sm:$0xf]  ;;  %v5919_v22 = vor.u32 %v7362_v9, %v5916_v10  ;;  %3811 = vmatpush.bf16.msrb.mxu3 %v6719_v13  ;;  %v3559_v10 = vpop.f32.mrf.mxu3  ;;  %v5282_v13 = vld [vmem:[#allocation6 + $0x3d8] sm:$0xf] }
 0x244   :  { %v6172_v14 = vld [vmem:[#allocation6 + $0xaf0] sm:$0xf0] }
 0x245   :  { %v7490_v15 = vld [vmem:[#allocation6 + $0xcd4] sm:$0xf]  ;;  %v6175_v23 = vor.u32 %v7426_v11, %v6172_v14  ;;  %3773 = vmatpush.bf16.msrb.mxu0 %v5919_v22  ;;  %v5026_v11 = vld [vmem:[#allocation6 + $0x1d8] sm:$0xf] }
 0x246   :  { %v6428_v16 = vld [vmem:[#allocation6 + $0xcf0] sm:$0xf0]  ;;  %v5794_v22 = vld [vmem:[#allocation6 + $0x7d8] sm:$0xf] }
 0x247   :  { %v7554_v18 = vld [vmem:[#allocation6 + $0xed4] sm:$0xf]  ;;  %v6431_v24 = vor.u32 %v7490_v15, %v6428_v16  ;;  %3786 = vmatpush.bf16.msrb.mxu1 %v6175_v23  ;;  %v7207_v15 = vld [vmem:[#allocation6 + $0x3f4] sm:$0xf0] }
 0x248   :  { %v6684_v19 = vld [vmem:[#allocation6 + $0xef0] sm:$0xf0]  ;;  %v5538_v16 = vld [vmem:[#allocation6 + $0x5d8] sm:$0xf] }
 0x249   :  { %v7354_v25 = vld [vmem:[#allocation6 + $0x894] sm:$0xf]  ;;  %v6687_v35 = vor.u32 %v7554_v18, %v6684_v19  ;;  %3799 = vmatpush.bf16.msrb.mxu2 %v6431_v24  ;;  %v7335_v23 = vld [vmem:[#allocation6 + $0x7f4] sm:$0xf0] }
 0x24a   :  { %v5884_v26 = vld [vmem:[#allocation6 + $0x8b0] sm:$0xf0] }
 0x24b   :  { %v7418_v27 = vld [vmem:[#allocation6 + $0xa94] sm:$0xf]  ;;  %v5887_v8 = vor.u32 %v7354_v25, %v5884_v26  ;;  %3812 = vmatpush.bf16.msrb.mxu3 %v6687_v35  ;;  %v5027_v25 = vor.u32 %v7143_v12, %v5026_v11  ;;  %v5283_v26 = vor.u32 %v7207_v15, %v5282_v13  ;;  %v7135_v35 = vld [vmem:[#allocation6 + $0x1b4] sm:$0xf0]  ;;  %v3583_v15 = vpop.f32.mrf.mxu1 }
 0x24c   :  { %v6140_v29 = vld [vmem:[#allocation6 + $0xab0] sm:$0xf0]  ;;  %v4898_v11 = vld [vmem:[#allocation6 + $0xd8] sm:$0xf] }
 0x24d   :  { %v7482_v40 = vld [vmem:[#allocation6 + $0xc94] sm:$0xf]  ;;  %v6143_v45 = vor.u32 %v7418_v27, %v6140_v29  ;;  %3774 = vmatpush.bf16.msrb.mxu0 %v5887_v8  ;;  %v5539_v27 = vor.u32 %v7271_v17, %v5538_v16  ;;  %v5250_v29 = vld [vmem:[#allocation6 + $0x398] sm:$0xf]  ;;  %v4995_v8 = vor.u32 %v7135_v35, %v4994_v28 }
 0x24e   :  { %v6396_v30 = vld [vmem:[#allocation6 + $0xcb0] sm:$0xf0]  ;;  %v7111_v12 = vld [vmem:[#allocation6 + $0xf4] sm:$0xf0] }
 0x24f   :  { %v7546_v33 = vld [vmem:[#allocation6 + $0xe94] sm:$0xf]  ;;  %v6399_v46 = vor.u32 %v7482_v40, %v6396_v30  ;;  %3787 = vmatpush.bf16.msrb.mxu1 %v6143_v45  ;;  %v5795_v40 = vor.u32 %v7335_v23, %v5794_v22  ;;  %v7199_v30 = vld [vmem:[#allocation6 + $0x3b4] sm:$0xf0]  ;;  %v5507_v45 = vor.u32 %v7263_v32, %v5506_v31 }
 0x250   :  { %v6652_v34 = vld [vmem:[#allocation6 + $0xeb0] sm:$0xf0]  ;;  %v5251_v43 = vor.u32 %v7199_v30, %v5250_v29  ;;  %v5154_v13 = vld [vmem:[#allocation6 + $0x2d8] sm:$0xf] }
 0x251   :  { %v7346_v48 = vld [vmem:[#allocation6 + $0x854] sm:$0xf]  ;;  %v6655_v52 = vor.u32 %v7546_v33, %v6652_v34  ;;  %3800 = vmatpush.bf16.msrb.mxu2 %v6399_v46  ;;  %v5762_v33 = vld [vmem:[#allocation6 + $0x798] sm:$0xf] }
 0x252   :  { %v5852_v49 = vld [vmem:[#allocation6 + $0x870] sm:$0xf0]  ;;  %v7327_v34 = vld [vmem:[#allocation6 + $0x7b4] sm:$0xf0] }
 0x253   :  { %v7410_v50 = vld [vmem:[#allocation6 + $0xa54] sm:$0xf]  ;;  %v5855_v58 = vor.u32 %v7346_v48, %v5852_v49  ;;  %3813 = vmatpush.bf16.msrb.mxu3 %v6655_v52  ;;  %v4962_v46 = vld [vmem:[#allocation6 + $0x158] sm:$0xf] }
 0x254   :  { %v6108_v53 = vld [vmem:[#allocation6 + $0xa70] sm:$0xf0]  ;;  %v7127_v48 = vld [vmem:[#allocation6 + $0x174] sm:$0xf0] }
 0x255   :  { %v7474_v54 = vld [vmem:[#allocation6 + $0xc54] sm:$0xf]  ;;  %v6111_v61 = vor.u32 %v7410_v50, %v6108_v53  ;;  %3775 = vmatpush.bf16.msrb.mxu0 %v5855_v58  ;;  %v5218_v49 = vld [vmem:[#allocation6 + $0x358] sm:$0xf]  ;;  %v5763_v50 = vor.u32 %v7327_v34, %v5762_v33  ;;  %v3609_v34 = vpop.f32.mrf.mxu3 }
 0x256   :  { %v6364_v55 = vld [vmem:[#allocation6 + $0xc70] sm:$0xf0]  ;;  %v5474_v52 = vld [vmem:[#allocation6 + $0x558] sm:$0xf] }
 0x257   :  { %v7538_v56 = vld [vmem:[#allocation6 + $0xe54] sm:$0xf]  ;;  %v6367_v62 = vor.u32 %v7474_v54, %v6364_v55  ;;  %3788 = vmatpush.bf16.msrb.mxu1 %v6111_v61  ;;  %v7255_v53 = vld [vmem:[#allocation6 + $0x574] sm:$0xf0] }
 0x258   :  { %v6620_v57 = vld [vmem:[#allocation6 + $0xe70] sm:$0xf0]  ;;  %v5730_v54 = vld [vmem:[#allocation6 + $0x758] sm:$0xf]  ;;  %v5475_v58 = vor.u32 %v7255_v53, %v5474_v52 }
 0x259   :  { %v7338_v59 = vld [vmem:[#allocation6 + $0x814] sm:$0xf]  ;;  %v6623_v3 = vor.u32 %v7538_v56, %v6620_v57  ;;  %3801 = vmatpush.bf16.msrb.mxu2 %v6367_v62  ;;  %v7319_v55 = vld [vmem:[#allocation6 + $0x774] sm:$0xf0]  ;;  %v4963_v56 = vor.u32 %v7127_v48, %v4962_v46  ;;  %v5219_v57 = vor.u32 %v7191_v51, %v5218_v49 }
 0x25a   :  { %v5820_v60 = vld [vmem:[#allocation6 + $0x830] sm:$0xf0]  ;;  %v5186_v61 = vld [vmem:[#allocation6 + $0x318] sm:$0xf]  ;;  %v5731_v62 = vor.u32 %v7319_v55, %v5730_v54  ;;  %v3585_v54 = vpop.f32.mrf.mxu1 }
 0x25b   :  { %v7402_v63 = vld [vmem:[#allocation6 + $0xa14] sm:$0xf]  ;;  %v5823_v14 = vor.u32 %v7338_v59, %v5820_v60  ;;  %3814 = vmatpush.bf16.msrb.mxu3 %v6623_v3  ;;  %v4930_v59 = vld [vmem:[#allocation6 + $0x118] sm:$0xf] }
 0x25c   :  { %v6076_v0 = vld [vmem:[#allocation6 + $0xa30] sm:$0xf0]  ;;  %v7119_v60 = vld [vmem:[#allocation6 + $0x134] sm:$0xf0] }
 0x25d   :  { %v7466_v1 = vld [vmem:[#allocation6 + $0xc14] sm:$0xf]  ;;  %v6079_v18 = vor.u32 %v7402_v63, %v6076_v0  ;;  %3776 = vmatpush.bf16.msrb.mxu0 %v5823_v14  ;;  %v7183_v63 = vld [vmem:[#allocation6 + $0x334] sm:$0xf0] }
 0x25e   :  { %v6332_v5 = vld [vmem:[#allocation6 + $0xc30] sm:$0xf0]  ;;  %v5442_v0 = vld [vmem:[#allocation6 + $0x518] sm:$0xf] }
 0x25f   :  { %v7530_v7 = vld [vmem:[#allocation6 + $0xe14] sm:$0xf]  ;;  %v6335_v19 = vor.u32 %v7466_v1, %v6332_v5  ;;  %3789 = vmatpush.bf16.msrb.mxu1 %v6079_v18  ;;  %v7247_v1 = vld [vmem:[#allocation6 + $0x534] sm:$0xf0]  ;;  %v4931_v5 = vor.u32 %v7119_v60, %v4930_v59 }
 0x260   :  { %v6588_v9 = vld [vmem:[#allocation6 + $0xe30] sm:$0xf0]  ;;  %3777 = vmatmul.bf16.vlgmr.msrb.gmra.mxu0 %v7892_v41  ;;  %v7311_v3 = vld [vmem:[#allocation6 + $0x734] sm:$0xf0]  ;;  %v5443_v10 = vor.u32 %v7247_v1, %v5442_v0 }
 0x261   :  { %v6591_v24 = vor.u32 %v7530_v7, %v6588_v9  ;;  %3802 = vmatpush.bf16.msrb.mxu2 %v6335_v19  ;;  %3821 = vmatpush.bf16.msra.mxu0 %v5027_v25  ;;  %v3570_v7 = vpop.f32.mrf.mxu0  ;;  %v5187_v9 = vor.u32 %v7183_v63, %v5186_v61  ;;  %v5699_v16 = vor.u32 %v7311_v3, %v5698_v2  ;;  %v7175_v17 = vld [vmem:[#allocation6 + $0x2f4] sm:$0xf0] }
 0x262   :  { %3790 = vmatmul.bf16.vlgmr.msrb.gmra.mxu1 %v7896_v44  ;;  %v3571_v14 = vadd.f32 %v3570_v7, %v7953_v39  ;;  %v5410_v18 = vld [vmem:[#allocation6 + $0x4d8] sm:$0xf]  ;;  %v4899_v25 = vor.u32 %v7111_v12, %v4898_v11 }
 0x263   :  { %3815 = vmatpush.bf16.msrb.mxu3 %v6591_v24  ;;  %3834 = vmatpush.bf16.msra.mxu1 %v5283_v26  ;;  %v7239_v19 = vld [vmem:[#allocation6 + $0x4f4] sm:$0xf0]  ;;  %v5155_v26 = vor.u32 %v7175_v17, %v5154_v13  ;;  %v3611_v13 = vpop.f32.mrf.mxu3 }
 0x264   :  { %3803 = vmatmul.bf16.vlgmr.msrb.gmra.mxu2 %v7890_v38  ;;  %v5666_v22 = vld [vmem:[#allocation6 + $0x6d8] sm:$0xf]  ;;  %v3584_v24 = vadd.f32 %v3583_v15, %v3571_v14 }
 0x265   :  { %3847 = vmatpush.bf16.msra.mxu2 %v5539_v27  ;;  %3822 = vmatpush.bf16.msra.mxu0 %v4995_v8  ;;  %v7303_v23 = vld [vmem:[#allocation6 + $0x6f4] sm:$0xf0]  ;;  %v5411_v27 = vor.u32 %v7239_v19, %v5410_v18 }
 0x266   :  { %3816 = vmatmul.bf16.vlgmr.msrb.gmra.mxu3 %v7894_v42  ;;  %v4866_v28 = vld [vmem:[#allocation6 + $0x98] sm:$0xf]  ;;  %v5667_v39 = vor.u32 %v7303_v23, %v5666_v22 }
 0x267   :  { %3860 = vmatpush.bf16.msra.mxu3 %v5795_v40  ;;  %3835 = vmatpush.bf16.msra.mxu1 %v5251_v43  ;;  %v7103_v35 = vld [vmem:[#allocation6 + $0xb4] sm:$0xf0]  ;;  %v3596_v40 = vpop.f32.mrf.mxu2 }
 0x268   :  { %v5122_v29 = vld [vmem:[#allocation6 + $0x298] sm:$0xf]  ;;  %v3597_v33 = vadd.f32 %v3596_v40, %v3584_v24 }
 0x269   :  { %3848 = vmatpush.bf16.msra.mxu2 %v5507_v45  ;;  %3823 = vmatpush.bf16.msra.mxu0 %v4963_v56  ;;  %v7167_v30 = vld [vmem:[#allocation6 + $0x2b4] sm:$0xf0]  ;;  %v4867_v45 = vor.u32 %v7103_v35, %v4866_v28  ;;  %v3572_v48 = vpop.f32.mrf.mxu0 }
 0x26a   :  { %v5378_v31 = vld [vmem:[#allocation6 + $0x498] sm:$0xf]  ;;  %v7960_v46 = vadd.f32 %v3609_v34, %v3597_v33  ;;  %v5123_v49 = vor.u32 %v7167_v30, %v5122_v29 }
 0x26b   :  { %3861 = vmatpush.bf16.msra.mxu3 %v5763_v50  ;;  %3836 = vmatpush.bf16.msra.mxu1 %v5219_v57  ;;  %v7231_v32 = vld [vmem:[#allocation6 + $0x4b4] sm:$0xf0] }
 0x26c   :  { %v5634_v8 = vld [vmem:[#allocation6 + $0x698] sm:$0xf]  ;;  %v5379_v50 = vor.u32 %v7231_v32, %v5378_v31 }
 0x26d   :  { %3849 = vmatpush.bf16.msra.mxu2 %v5475_v58  ;;  %3824 = vmatpush.bf16.msra.mxu0 %v4931_v5  ;;  %v7295_v43 = vld [vmem:[#allocation6 + $0x6b4] sm:$0xf0] }
 0x26e   :  { %v4834_v51 = vld [vmem:[#allocation6 + $0x58] sm:$0xf]  ;;  %v5635_v55 = vor.u32 %v7295_v43, %v5634_v8 }
 0x26f   :  { %3862 = vmatpush.bf16.msra.mxu3 %v5731_v62  ;;  %3837 = vmatpush.bf16.msra.mxu1 %v5187_v9  ;;  %v7095_v52 = vld [vmem:[#allocation6 + $0x74] sm:$0xf0]  ;;  %v3598_v7 = vpop.f32.mrf.mxu2 }
 0x270   :  { %v5090_v53 = vld [vmem:[#allocation6 + $0x258] sm:$0xf]  ;;  %v4835_v61 = vor.u32 %v7095_v52, %v4834_v51 }
 0x271   :  { %3850 = vmatpush.bf16.msra.mxu2 %v5443_v10  ;;  %3825 = vmatpush.bf16.msra.mxu0 %v4899_v25  ;;  %v7159_v56 = vld [vmem:[#allocation6 + $0x274] sm:$0xf0] }
 0x272   :  { %v5346_v57 = vld [vmem:[#allocation6 + $0x458] sm:$0xf]  ;;  %v5091_v0 = vor.u32 %v7159_v56, %v5090_v53 }
 0x273   :  { %3863 = vmatpush.bf16.msra.mxu3 %v5699_v16  ;;  %3838 = vmatpush.bf16.msra.mxu1 %v5155_v26  ;;  %v7223_v58 = vld [vmem:[#allocation6 + $0x474] sm:$0xf0] }
 0x274   :  { %v5602_v59 = vld [vmem:[#allocation6 + $0x658] sm:$0xf]  ;;  %v5347_v1 = vor.u32 %v7223_v58, %v5346_v57 }
 0x275   :  { %3851 = vmatpush.bf16.msra.mxu2 %v5411_v27  ;;  %v7287_v60 = vld [vmem:[#allocation6 + $0x674] sm:$0xf0]  ;;  %3826 = vmatpush.bf16.msra.mxu0 %v4867_v45 }
 0x276   :  { %v4802_v62 = vld [vmem:[#allocation6 + $0x18] sm:$0xf]  ;;  %v5603_v9 = vor.u32 %v7287_v60, %v5602_v59 }
 0x277   :  { %3864 = vmatpush.bf16.msra.mxu3 %v5667_v39  ;;  %v7087_v63 = vld [vmem:[#allocation6 + $0x34] sm:$0xf0]  ;;  %3839 = vmatpush.bf16.msra.mxu1 %v5123_v49 }
 0x278   :  { %v5058_v2 = vld [vmem:[#allocation6 + $0x218] sm:$0xf]  ;;  %v4803_v17 = vor.u32 %v7087_v63, %v4802_v62 }
 0x279   :  { %3852 = vmatpush.bf16.msra.mxu2 %v5379_v50  ;;  %v7151_v3 = vld [vmem:[#allocation6 + $0x234] sm:$0xf0]  ;;  %3827 = vmatpush.bf16.msra.mxu0 %v4835_v61 }
 0x27a   :  { %v5314_v5 = vld [vmem:[#allocation6 + $0x418] sm:$0xf]  ;;  %v5059_v23 = vor.u32 %v7151_v3, %v5058_v2 }
 0x27b   :  { %3865 = vmatpush.bf16.msra.mxu3 %v5635_v55  ;;  %v7215_v10 = vld [vmem:[#allocation6 + $0x434] sm:$0xf0]  ;;  %3840 = vmatpush.bf16.msra.mxu1 %v5091_v0 }
 0x27c   :  { %v5570_v11 = vld [vmem:[#allocation6 + $0x618] sm:$0xf]  ;;  %v5315_v24 = vor.u32 %v7215_v10, %v5314_v5 }
 0x27d   :  { %v7279_v12 = vld [vmem:[#allocation6 + $0x634] sm:$0xf0]  ;;  %3853 = vmatpush.bf16.msra.mxu2 %v5347_v1  ;;  %3828 = vmatpush.bf16.msra.mxu0 %v4803_v17  ;;  %v3635_v17 = vpop.f32.mrf.mxu1 }
 0x27e   :  { %v6050_v14 = vld [vmem:[#allocation6 + $0x9d8] sm:$0xf]  ;;  %v5571_v27 = vor.u32 %v7279_v12, %v5570_v11  ;;  %v3622_v11 = vpop.f32.mrf.mxu0 }
 0x27f   :  { %v7399_v15 = vld [vmem:[#allocation6 + $0x9f4] sm:$0xf0]  ;;  %3866 = vmatpush.bf16.msra.mxu3 %v5603_v9  ;;  %3841 = vmatpush.bf16.msra.mxu1 %v5059_v23 }
 0x280   :  { %v6306_v16 = vld [vmem:[#allocation6 + $0xbd8] sm:$0xf]  ;;  %v6051_v28 = vor.u32 %v7399_v15, %v6050_v14  ;;  %3829 = vmatmul.bf16.vlgmr.msra.gmra.mxu0 %v7883_v20 }
 0x281   :  { %v7463_v18 = vld [vmem:[#allocation6 + $0xbf4] sm:$0xf0]  ;;  %3854 = vmatpush.bf16.msra.mxu2 %v5315_v24  ;;  %v3636_v24 = vadd.f32 %v3635_v17, %v3622_v11  ;;  %v7139_v17 = vld [vmem:[#allocation6 + $0x1dc] sm:$0xf] }
 0x282   :  { %v6562_v19 = vld [vmem:[#allocation6 + $0xdd8] sm:$0xf]  ;;  %v6307_v35 = vor.u32 %v7463_v18, %v6306_v16  ;;  %3873 = vmatpush.bf16.msrb.mxu0 %v6051_v28  ;;  %3842 = vmatmul.bf16.vlgmr.msra.gmra.mxu1 %v7886_v21 }
 0x283   :  { %v7527_v22 = vld [vmem:[#allocation6 + $0xdf4] sm:$0xf0]  ;;  %3867 = vmatpush.bf16.msra.mxu3 %v5571_v27 }
 0x284   :  { %v6818_v25 = vld [vmem:[#allocation6 + $0xfd8] sm:$0xf]  ;;  %v6563_v29 = vor.u32 %v7527_v22, %v6562_v19  ;;  %3886 = vmatpush.bf16.msrb.mxu1 %v6307_v35  ;;  %3855 = vmatmul.bf16.vlgmr.msra.gmra.mxu2 %v7878_v4 }
 0x285   :  { %v7591_v26 = vld [vmem:[#allocation6 + $0xff4] sm:$0xf0] }
 0x286   :  { %v6018_v40 = vld [vmem:[#allocation6 + $0x998] sm:$0xf]  ;;  %v6819_v31 = vor.u32 %v7591_v26, %v6818_v25  ;;  %3899 = vmatpush.bf16.msrb.mxu2 %v6563_v29  ;;  %3868 = vmatmul.bf16.vlgmr.msra.gmra.mxu3 %v7880_v6 }
 0x287   :  { %v7391_v39 = vld [vmem:[#allocation6 + $0x9b4] sm:$0xf0] }
 0x288   :  { %v6274_v30 = vld [vmem:[#allocation6 + $0xb98] sm:$0xf]  ;;  %v6019_v45 = vor.u32 %v7391_v39, %v6018_v40  ;;  %3912 = vmatpush.bf16.msrb.mxu3 %v6819_v31 }
 0x289   :  { %v7455_v32 = vld [vmem:[#allocation6 + $0xbb4] sm:$0xf0] }
 0x28a   :  { %v6530_v33 = vld [vmem:[#allocation6 + $0xd98] sm:$0xf]  ;;  %v6275_v48 = vor.u32 %v7455_v32, %v6274_v30  ;;  %3874 = vmatpush.bf16.msrb.mxu0 %v6019_v45  ;;  %v3648_v30 = vpop.f32.mrf.mxu2 }
 0x28b   :  { %v7519_v34 = vld [vmem:[#allocation6 + $0xdb4] sm:$0xf0] }
 0x28c   :  { %v6786_v8 = vld [vmem:[#allocation6 + $0xf98] sm:$0xf]  ;;  %v6531_v49 = vor.u32 %v7519_v34, %v6530_v33  ;;  %3887 = vmatpush.bf16.msrb.mxu1 %v6275_v48 }
 0x28d   :  { %v7583_v43 = vld [vmem:[#allocation6 + $0xfb4] sm:$0xf0] }
 0x28e   :  { %v5986_v50 = vld [vmem:[#allocation6 + $0x958] sm:$0xf]  ;;  %v6787_v53 = vor.u32 %v7583_v43, %v6786_v8  ;;  %3900 = vmatpush.bf16.msrb.mxu2 %v6531_v49  ;;  %v3649_v8 = vadd.f32 %v3648_v30, %v3636_v24  ;;  %v3661_v43 = vpop.f32.mrf.mxu3  ;;  %v7267_v24 = vld [vmem:[#allocation6 + $0x5dc] sm:$0xf] }
 0x28f   :  { %v7383_v51 = vld [vmem:[#allocation6 + $0x974] sm:$0xf0] }
 0x290   :  { %v6242_v52 = vld [vmem:[#allocation6 + $0xb58] sm:$0xf]  ;;  %v5987_v59 = vor.u32 %v7383_v51, %v5986_v50  ;;  %3913 = vmatpush.bf16.msrb.mxu3 %v6787_v53  ;;  %v7966_v50 = vadd.f32 %v3661_v43, %v3649_v8  ;;  %v3624_v51 = vpop.f32.mrf.mxu0  ;;  %v5252_v8 = vld [vmem:[#allocation6 + $0x3b8] sm:$0xf0] }
 0x291   :  { %v7447_v54 = vld [vmem:[#allocation6 + $0xb74] sm:$0xf0]  ;;  %v7259_v43 = vld [vmem:[#allocation6 + $0x59c] sm:$0xf] }
 0x292   :  { %v6498_v55 = vld [vmem:[#allocation6 + $0xd58] sm:$0xf]  ;;  %v6243_v60 = vor.u32 %v7447_v54, %v6242_v52  ;;  %3875 = vmatpush.bf16.msrb.mxu0 %v5987_v59  ;;  %v3650_v11 = vpop.f32.mrf.mxu2 }
 0x293   :  { %v7511_v56 = vld [vmem:[#allocation6 + $0xd74] sm:$0xf0]  ;;  %v5444_v11 = vld [vmem:[#allocation6 + $0x538] sm:$0xf0] }
 0x294   :  { %v6754_v57 = vld [vmem:[#allocation6 + $0xf58] sm:$0xf]  ;;  %v6499_v61 = vor.u32 %v7511_v56, %v6498_v55  ;;  %3888 = vmatpush.bf16.msrb.mxu1 %v6243_v60 }
 0x295   :  { %v7575_v58 = vld [vmem:[#allocation6 + $0xf74] sm:$0xf0] }
 0x296   :  { %v5954_v62 = vld [vmem:[#allocation6 + $0x918] sm:$0xf]  ;;  %v6755_v1 = vor.u32 %v7575_v58, %v6754_v57  ;;  %3901 = vmatpush.bf16.msrb.mxu2 %v6499_v61  ;;  %v3637_v57 = vpop.f32.mrf.mxu1 }
 0x297   :  { %v7375_v63 = vld [vmem:[#allocation6 + $0x934] sm:$0xf0] }
 0x298   :  { %v6210_v0 = vld [vmem:[#allocation6 + $0xb18] sm:$0xf]  ;;  %v5955_v10 = vor.u32 %v7375_v63, %v5954_v62  ;;  %3914 = vmatpush.bf16.msrb.mxu3 %v6755_v1 }
 0x299   :  { %v7439_v2 = vld [vmem:[#allocation6 + $0xb34] sm:$0xf0] }
 0x29a   :  { %v6466_v3 = vld [vmem:[#allocation6 + $0xd18] sm:$0xf]  ;;  %v6211_v12 = vor.u32 %v7439_v2, %v6210_v0  ;;  %3876 = vmatpush.bf16.msrb.mxu0 %v5955_v10 }
 0x29b   :  { %v7503_v5 = vld [vmem:[#allocation6 + $0xd34] sm:$0xf0] }
 0x29c   :  { %v6722_v7 = vld [vmem:[#allocation6 + $0xf18] sm:$0xf]  ;;  %v6467_v13 = vor.u32 %v7503_v5, %v6466_v3  ;;  %3889 = vmatpush.bf16.msrb.mxu1 %v6211_v12 }
 0x29d   :  { %v7567_v9 = vld [vmem:[#allocation6 + $0xf34] sm:$0xf0] }
 0x29e   :  { %v5922_v14 = vld [vmem:[#allocation6 + $0x8d8] sm:$0xf]  ;;  %v6723_v18 = vor.u32 %v7567_v9, %v6722_v7  ;;  %3902 = vmatpush.bf16.msrb.mxu2 %v6467_v13 }
 0x29f   :  { %v7367_v15 = vld [vmem:[#allocation6 + $0x8f4] sm:$0xf0] }
 0x2a0   :  { %v6178_v16 = vld [vmem:[#allocation6 + $0xad8] sm:$0xf]  ;;  %v5923_v27 = vor.u32 %v7367_v15, %v5922_v14  ;;  %3915 = vmatpush.bf16.msrb.mxu3 %v6723_v18  ;;  %v5028_v18 = vld [vmem:[#allocation6 + $0x1f8] sm:$0xf0] }
 0x2a1   :  { %v7431_v19 = vld [vmem:[#allocation6 + $0xaf4] sm:$0xf0] }
 0x2a2   :  { %v6434_v22 = vld [vmem:[#allocation6 + $0xcd8] sm:$0xf]  ;;  %v6179_v28 = vor.u32 %v7431_v19, %v6178_v16  ;;  %3877 = vmatpush.bf16.msrb.mxu0 %v5923_v27  ;;  %v3663_v16 = vpop.f32.mrf.mxu3  ;;  %v7203_v19 = vld [vmem:[#allocation6 + $0x3dc] sm:$0xf] }
 0x2a3   :  { %v7495_v23 = vld [vmem:[#allocation6 + $0xcf4] sm:$0xf0] }
 0x2a4   :  { %v6690_v25 = vld [vmem:[#allocation6 + $0xed8] sm:$0xf]  ;;  %v6435_v35 = vor.u32 %v7495_v23, %v6434_v22  ;;  %3890 = vmatpush.bf16.msrb.mxu1 %v6179_v28  ;;  %v5284_v23 = vld [vmem:[#allocation6 + $0x3f8] sm:$0xf0] }
 0x2a5   :  { %v7559_v26 = vld [vmem:[#allocation6 + $0xef4] sm:$0xf0]  ;;  %v7331_v28 = vld [vmem:[#allocation6 + $0x7dc] sm:$0xf] }
 0x2a6   :  { %v5890_v29 = vld [vmem:[#allocation6 + $0x898] sm:$0xf]  ;;  %v6691_v31 = vor.u32 %v7559_v26, %v6690_v25  ;;  %3903 = vmatpush.bf16.msrb.mxu2 %v6435_v35  ;;  %v5540_v25 = vld [vmem:[#allocation6 + $0x5f8] sm:$0xf0] }
 0x2a7   :  { %v7359_v40 = vld [vmem:[#allocation6 + $0x8b4] sm:$0xf0]  ;;  %v5796_v35 = vld [vmem:[#allocation6 + $0x7f8] sm:$0xf0]  ;;  %v5543_v30 = vor.u32 %v7267_v24, %v5540_v25  ;;  %v3687_v24 = vpop.f32.mrf.mxu1 }
 0x2a8   :  { %v6146_v39 = vld [vmem:[#allocation6 + $0xa98] sm:$0xf]  ;;  %v5891_v49 = vor.u32 %v7359_v40, %v5890_v29  ;;  %3916 = vmatpush.bf16.msrb.mxu3 %v6691_v31  ;;  %v5031_v40 = vor.u32 %v7139_v17, %v5028_v18  ;;  %v7131_v31 = vld [vmem:[#allocation6 + $0x19c] sm:$0xf] }
 0x2a9   :  { %v7423_v32 = vld [vmem:[#allocation6 + $0xab4] sm:$0xf0]  ;;  %v7107_v18 = vld [vmem:[#allocation6 + $0xdc] sm:$0xf] }
 0x2aa   :  { %v6402_v33 = vld [vmem:[#allocation6 + $0xc98] sm:$0xf]  ;;  %v6147_v52 = vor.u32 %v7423_v32, %v6146_v39  ;;  %3878 = vmatpush.bf16.msrb.mxu0 %v5891_v49  ;;  %v5287_v39 = vor.u32 %v7203_v19, %v5284_v23  ;;  %v4996_v32 = vld [vmem:[#allocation6 + $0x1b8] sm:$0xf0] }
 0x2ab   :  { %v7487_v34 = vld [vmem:[#allocation6 + $0xcb4] sm:$0xf0]  ;;  %v5764_v49 = vld [vmem:[#allocation6 + $0x7b8] sm:$0xf0]  ;;  %v4999_v51 = vor.u32 %v7131_v31, %v4996_v32 }
 0x2ac   :  { %v6658_v45 = vld [vmem:[#allocation6 + $0xe98] sm:$0xf]  ;;  %v6403_v53 = vor.u32 %v7487_v34, %v6402_v33  ;;  %3891 = vmatpush.bf16.msrb.mxu1 %v6147_v52  ;;  %v7195_v33 = vld [vmem:[#allocation6 + $0x39c] sm:$0xf]  ;;  %v5799_v34 = vor.u32 %v7331_v28, %v5796_v35 }
 0x2ad   :  { %v7551_v48 = vld [vmem:[#allocation6 + $0xeb4] sm:$0xf0]  ;;  %v5255_v52 = vor.u32 %v7195_v33, %v5252_v8  ;;  %v4900_v19 = vld [vmem:[#allocation6 + $0xf8] sm:$0xf0]  ;;  %v3700_v8 = vpop.f32.mrf.mxu2 }
 0x2ae   :  { %v5858_v54 = vld [vmem:[#allocation6 + $0x858] sm:$0xf]  ;;  %v6659_v58 = vor.u32 %v7551_v48, %v6658_v45  ;;  %3904 = vmatpush.bf16.msrb.mxu2 %v6403_v53  ;;  %v5508_v45 = vld [vmem:[#allocation6 + $0x5b8] sm:$0xf0] }
 0x2af   :  { %v7351_v55 = vld [vmem:[#allocation6 + $0x874] sm:$0xf0]  ;;  %v7323_v48 = vld [vmem:[#allocation6 + $0x79c] sm:$0xf]  ;;  %v5511_v53 = vor.u32 %v7259_v43, %v5508_v45 }
 0x2b0   :  { %v6114_v56 = vld [vmem:[#allocation6 + $0xa58] sm:$0xf]  ;;  %v5859_v0 = vor.u32 %v7351_v55, %v5858_v54  ;;  %3917 = vmatpush.bf16.msrb.mxu3 %v6659_v58  ;;  %v7123_v54 = vld [vmem:[#allocation6 + $0x15c] sm:$0xf]  ;;  %v5767_v57 = vor.u32 %v7323_v48, %v5764_v49 }
 0x2b1   :  { %v7415_v59 = vld [vmem:[#allocation6 + $0xa74] sm:$0xf0]  ;;  %v4964_v55 = vld [vmem:[#allocation6 + $0x178] sm:$0xf0] }
 0x2b2   :  { %v6370_v60 = vld [vmem:[#allocation6 + $0xc58] sm:$0xf]  ;;  %v6115_v3 = vor.u32 %v7415_v59, %v6114_v56  ;;  %3879 = vmatpush.bf16.msrb.mxu0 %v5859_v0  ;;  %v7187_v56 = vld [vmem:[#allocation6 + $0x35c] sm:$0xf] }
 0x2b3   :  { %v7479_v61 = vld [vmem:[#allocation6 + $0xc74] sm:$0xf0]  ;;  %v5220_v58 = vld [vmem:[#allocation6 + $0x378] sm:$0xf0] }
 0x2b4   :  { %v6626_v62 = vld [vmem:[#allocation6 + $0xe58] sm:$0xf]  ;;  %v6371_v5 = vor.u32 %v7479_v61, %v6370_v60  ;;  %3892 = vmatpush.bf16.msrb.mxu1 %v6115_v3  ;;  %v7251_v59 = vld [vmem:[#allocation6 + $0x55c] sm:$0xf]  ;;  %v5223_v0 = vor.u32 %v7187_v56, %v5220_v58 }
 0x2b5   :  { %v7543_v63 = vld [vmem:[#allocation6 + $0xe74] sm:$0xf0]  ;;  %v5476_v60 = vld [vmem:[#allocation6 + $0x578] sm:$0xf0] }
 0x2b6   :  { %v5826_v1 = vld [vmem:[#allocation6 + $0x818] sm:$0xf]  ;;  %v6627_v12 = vor.u32 %v7543_v63, %v6626_v62  ;;  %3905 = vmatpush.bf16.msrb.mxu2 %v6371_v5  ;;  %v7315_v61 = vld [vmem:[#allocation6 + $0x75c] sm:$0xf]  ;;  %v4967_v63 = vor.u32 %v7123_v54, %v4964_v55 }
 0x2b7   :  { %v7343_v2 = vld [vmem:[#allocation6 + $0x834] sm:$0xf0]  ;;  %v5732_v62 = vld [vmem:[#allocation6 + $0x778] sm:$0xf0] }
 0x2b8   :  { %v6082_v7 = vld [vmem:[#allocation6 + $0xa18] sm:$0xf]  ;;  %v5827_v22 = vor.u32 %v7343_v2, %v5826_v1  ;;  %3918 = vmatpush.bf16.msrb.mxu3 %v6627_v12  ;;  %v5479_v1 = vor.u32 %v7251_v59, %v5476_v60  ;;  %v7115_v2 = vld [vmem:[#allocation6 + $0x11c] sm:$0xf] }
 0x2b9   :  { %v7407_v9 = vld [vmem:[#allocation6 + $0xa34] sm:$0xf0]  ;;  %v4932_v3 = vld [vmem:[#allocation6 + $0x138] sm:$0xf0] }
 0x2ba   :  { %v6338_v10 = vld [vmem:[#allocation6 + $0xc18] sm:$0xf]  ;;  %v6083_v26 = vor.u32 %v7407_v9, %v6082_v7  ;;  %3880 = vmatpush.bf16.msrb.mxu0 %v5827_v22  ;;  %v7179_v5 = vld [vmem:[#allocation6 + $0x31c] sm:$0xf]  ;;  %v5735_v7 = vor.u32 %v7315_v61, %v5732_v62  ;;  %v3689_v62 = vpop.f32.mrf.mxu1 }
 0x2bb   :  { %v7471_v13 = vld [vmem:[#allocation6 + $0xc34] sm:$0xf0]  ;;  %v5188_v9 = vld [vmem:[#allocation6 + $0x338] sm:$0xf0] }
 0x2bc   :  { %v6594_v14 = vld [vmem:[#allocation6 + $0xe18] sm:$0xf]  ;;  %v6339_v27 = vor.u32 %v7471_v13, %v6338_v10  ;;  %3893 = vmatpush.bf16.msrb.mxu1 %v6083_v26  ;;  %v7243_v10 = vld [vmem:[#allocation6 + $0x51c] sm:$0xf]  ;;  %v5191_v16 = vor.u32 %v7179_v5, %v5188_v9 }
 0x2bd   :  { %v7535_v15 = vld [vmem:[#allocation6 + $0xe34] sm:$0xf0]  ;;  %3881 = vmatmul.bf16.vlgmr.msrb.gmra.mxu0 %v7892_v41  ;;  %v7307_v12 = vld [vmem:[#allocation6 + $0x71c] sm:$0xf]  ;;  %v5447_v17 = vor.u32 %v7243_v10, %v5444_v11 }
 0x2be   :  { %v6595_v29 = vor.u32 %v7535_v15, %v6594_v14  ;;  %3906 = vmatpush.bf16.msrb.mxu2 %v6339_v27  ;;  %3925 = vmatpush.bf16.msra.mxu0 %v5031_v40  ;;  %v5700_v13 = vld [vmem:[#allocation6 + $0x738] sm:$0xf0]  ;;  %v4935_v14 = vor.u32 %v7115_v2, %v4932_v3  ;;  %v3674_v15 = vpop.f32.mrf.mxu0 }
 0x2bf   :  { %3894 = vmatmul.bf16.vlgmr.msrb.gmra.mxu1 %v7896_v44  ;;  %v7171_v22 = vld [vmem:[#allocation6 + $0x2dc] sm:$0xf]  ;;  %v3675_v23 = vadd.f32 %v3674_v15, %v7966_v50  ;;  %v5703_v25 = vor.u32 %v7307_v12, %v5700_v13 }
 0x2c0   :  { %3919 = vmatpush.bf16.msrb.mxu3 %v6595_v29  ;;  %3938 = vmatpush.bf16.msra.mxu1 %v5287_v39  ;;  %v5156_v26 = vld [vmem:[#allocation6 + $0x2f8] sm:$0xf0]  ;;  %v4903_v39 = vor.u32 %v7107_v18, %v4900_v19 }
 0x2c1   :  { %3907 = vmatmul.bf16.vlgmr.msrb.gmra.mxu2 %v7890_v38  ;;  %v7235_v27 = vld [vmem:[#allocation6 + $0x4dc] sm:$0xf]  ;;  %v3688_v40 = vadd.f32 %v3687_v24, %v3675_v23 }
 0x2c2   :  { %3951 = vmatpush.bf16.msra.mxu2 %v5543_v30  ;;  %3926 = vmatpush.bf16.msra.mxu0 %v4999_v51  ;;  %v5412_v28 = vld [vmem:[#allocation6 + $0x4f8] sm:$0xf0]  ;;  %v5159_v30 = vor.u32 %v7171_v22, %v5156_v26  ;;  %v3713_v51 = vpop.f32.mrf.mxu3 }
 0x2c3   :  { %3920 = vmatmul.bf16.vlgmr.msrb.gmra.mxu3 %v7894_v42  ;;  %v7299_v35 = vld [vmem:[#allocation6 + $0x6dc] sm:$0xf]  ;;  %v5415_v31 = vor.u32 %v7235_v27, %v5412_v28  ;;  %v3701_v49 = vadd.f32 %v3700_v8, %v3688_v40 }
 0x2c4   :  { %3964 = vmatpush.bf16.msra.mxu3 %v5799_v34  ;;  %3939 = vmatpush.bf16.msra.mxu1 %v5255_v52  ;;  %v5668_v29 = vld [vmem:[#allocation6 + $0x6f8] sm:$0xf0] }
 0x2c5   :  { %v7099_v32 = vld [vmem:[#allocation6 + $0x9c] sm:$0xf]  ;;  %v5671_v50 = vor.u32 %v7299_v35, %v5668_v29  ;;  %v7973_v55 = vadd.f32 %v3713_v51, %v3701_v49 }
 0x2c6   :  { %3952 = vmatpush.bf16.msra.mxu2 %v5511_v53  ;;  %3927 = vmatpush.bf16.msra.mxu0 %v4967_v63  ;;  %v4868_v33 = vld [vmem:[#allocation6 + $0xb8] sm:$0xf0]  ;;  %v3676_v56 = vpop.f32.mrf.mxu0 }
 0x2c7   :  { %v7163_v34 = vld [vmem:[#allocation6 + $0x29c] sm:$0xf]  ;;  %v4871_v54 = vor.u32 %v7099_v32, %v4868_v33 }
 0x2c8   :  { %3965 = vmatpush.bf16.msra.mxu3 %v5767_v57  ;;  %3940 = vmatpush.bf16.msra.mxu1 %v5223_v0  ;;  %v5124_v43 = vld [vmem:[#allocation6 + $0x2b8] sm:$0xf0] }
 0x2c9   :  { %v7227_v45 = vld [vmem:[#allocation6 + $0x49c] sm:$0xf]  ;;  %v5127_v57 = vor.u32 %v7163_v34, %v5124_v43 }
 0x2ca   :  { %3953 = vmatpush.bf16.msra.mxu2 %v5479_v1  ;;  %3928 = vmatpush.bf16.msra.mxu0 %v4935_v14  ;;  %v5380_v48 = vld [vmem:[#allocation6 + $0x4b8] sm:$0xf0]  ;;  %v3715_v23 = vpop.f32.mrf.mxu3 }
 0x2cb   :  { %v7291_v52 = vld [vmem:[#allocation6 + $0x69c] sm:$0xf]  ;;  %v5383_v58 = vor.u32 %v7227_v45, %v5380_v48 }
 0x2cc   :  { %3966 = vmatpush.bf16.msra.mxu3 %v5735_v7  ;;  %3941 = vmatpush.bf16.msra.mxu1 %v5191_v16  ;;  %v5636_v53 = vld [vmem:[#allocation6 + $0x6b8] sm:$0xf0]  ;;  %v3702_v16 = vpop.f32.mrf.mxu2 }
 0x2cd   :  { %v7091_v59 = vld [vmem:[#allocation6 + $0x5c] sm:$0xf]  ;;  %v5639_v63 = vor.u32 %v7291_v52, %v5636_v53 }
 0x2ce   :  { %3954 = vmatpush.bf16.msra.mxu2 %v5447_v17  ;;  %3929 = vmatpush.bf16.msra.mxu0 %v4903_v39  ;;  %v4836_v60 = vld [vmem:[#allocation6 + $0x78] sm:$0xf0] }
 0x2cf   :  { %v7155_v61 = vld [vmem:[#allocation6 + $0x25c] sm:$0xf]  ;;  %v4839_v7 = vor.u32 %v7091_v59, %v4836_v60 }
 0x2d0   :  { %3967 = vmatpush.bf16.msra.mxu3 %v5703_v25  ;;  %3942 = vmatpush.bf16.msra.mxu1 %v5159_v30  ;;  %v5092_v0 = vld [vmem:[#allocation6 + $0x278] sm:$0xf0] }
 0x2d1   :  { %v7219_v1 = vld [vmem:[#allocation6 + $0x45c] sm:$0xf]  ;;  %v5095_v11 = vor.u32 %v7155_v61, %v5092_v0 }
 0x2d2   :  { %3955 = vmatpush.bf16.msra.mxu2 %v5415_v31  ;;  %v5348_v2 = vld [vmem:[#allocation6 + $0x478] sm:$0xf0]  ;;  %3930 = vmatpush.bf16.msra.mxu0 %v4871_v54 }
 0x2d3   :  { %v7283_v3 = vld [vmem:[#allocation6 + $0x65c] sm:$0xf]  ;;  %v5351_v12 = vor.u32 %v7219_v1, %v5348_v2 }
 0x2d4   :  { %3968 = vmatpush.bf16.msra.mxu3 %v5671_v50  ;;  %v5604_v5 = vld [vmem:[#allocation6 + $0x678] sm:$0xf0]  ;;  %3943 = vmatpush.bf16.msra.mxu1 %v5127_v57 }
 0x2d5   :  { %v7083_v9 = vld [vmem:[#allocation6 + $0x1c] sm:$0xf]  ;;  %v5607_v17 = vor.u32 %v7283_v3, %v5604_v5 }
 0x2d6   :  { %v4804_v10 = vld [vmem:[#allocation6 + $0x38] sm:$0xf0]  ;;  %3956 = vmatpush.bf16.msra.mxu2 %v5383_v58  ;;  %3931 = vmatpush.bf16.msra.mxu0 %v4839_v7 }
 0x2d7   :  { %v7147_v13 = vld [vmem:[#allocation6 + $0x21c] sm:$0xf]  ;;  %v4807_v27 = vor.u32 %v7083_v9, %v4804_v10 }
 0x2d8   :  { %v5060_v14 = vld [vmem:[#allocation6 + $0x238] sm:$0xf0]  ;;  %3969 = vmatpush.bf16.msra.mxu3 %v5639_v63  ;;  %3944 = vmatpush.bf16.msra.mxu1 %v5095_v11 }
 0x2d9   :  { %v7211_v15 = vld [vmem:[#allocation6 + $0x41c] sm:$0xf]  ;;  %v5063_v40 = vor.u32 %v7147_v13, %v5060_v14 }
 0x2da   :  { %v5316_v18 = vld [vmem:[#allocation6 + $0x438] sm:$0xf0]  ;;  %3957 = vmatpush.bf16.msra.mxu2 %v5351_v12  ;;  %3932 = vmatpush.bf16.msra.mxu0 %v4807_v27 }
 0x2db   :  { %v7275_v19 = vld [vmem:[#allocation6 + $0x61c] sm:$0xf]  ;;  %v5319_v39 = vor.u32 %v7211_v15, %v5316_v18 }
 0x2dc   :  { %v5572_v22 = vld [vmem:[#allocation6 + $0x638] sm:$0xf0]  ;;  %3970 = vmatpush.bf16.msra.mxu3 %v5607_v17  ;;  %3945 = vmatpush.bf16.msra.mxu1 %v5063_v40  ;;  %v7979_v17 = vpop.f32.mrf.mxu0 }
 0x2dd   :  { %v7395_v24 = vld [vmem:[#allocation6 + $0x9dc] sm:$0xf]  ;;  %v5575_v32 = vor.u32 %v7275_v19, %v5572_v22  ;;  %3933 = vmatmul.bf16.vlgmr.msra.gmra.mxu0 %v7883_v20 }
 0x2de   :  { %v6052_v25 = vld [vmem:[#allocation6 + $0x9f8] sm:$0xf0]  ;;  %3958 = vmatpush.bf16.msra.mxu2 %v5319_v39 }
 0x2df   :  { %v7459_v26 = vld [vmem:[#allocation6 + $0xbdc] sm:$0xf]  ;;  %v6055_v33 = vor.u32 %v7395_v24, %v6052_v25  ;;  %3946 = vmatmul.bf16.vlgmr.msra.gmra.mxu1 %v7886_v21  ;;  %v7981_v24 = vpop.f32.mrf.mxu1 }
 0x2e0   :  { %v6308_v28 = vld [vmem:[#allocation6 + $0xbf8] sm:$0xf0]  ;;  %3971 = vmatpush.bf16.msra.mxu3 %v5575_v32 }
 0x2e1   :  { %v7523_v35 = vld [vmem:[#allocation6 + $0xddc] sm:$0xf]  ;;  %v6311_v34 = vor.u32 %v7459_v26, %v6308_v28  ;;  %3977 = vmatpush.bf16.msrb.mxu0 %v6055_v33  ;;  %3959 = vmatmul.bf16.vlgmr.msra.gmra.mxu2 %v7878_v4 }
 0x2e2   :  { %v6564_v29 = vld [vmem:[#allocation6 + $0xdf8] sm:$0xf0] }
 0x2e3   :  { %v7587_v30 = vld [vmem:[#allocation6 + $0xfdc] sm:$0xf]  ;;  %v6567_v8 = vor.u32 %v7523_v35, %v6564_v29  ;;  %3990 = vmatpush.bf16.msrb.mxu1 %v6311_v34  ;;  %3972 = vmatmul.bf16.vlgmr.msra.gmra.mxu3 %v7880_v6  ;;  %v7983_v34 = vpop.f32.mrf.mxu2 }
 0x2e4   :  { %v6820_v31 = vld [vmem:[#allocation6 + $0xff8] sm:$0xf0] }
 0x2e5   :  { %v7387_v50 = vld [vmem:[#allocation6 + $0x99c] sm:$0xf]  ;;  %v6823_v48 = vor.u32 %v7587_v30, %v6820_v31  ;;  %4003 = vmatpush.bf16.msrb.mxu2 %v6567_v8 }
 0x2e6   :  { %v6020_v43 = vld [vmem:[#allocation6 + $0x9b8] sm:$0xf0] }
 0x2e7   :  { %v7451_v45 = vld [vmem:[#allocation6 + $0xb9c] sm:$0xf]  ;;  %v6023_v56 = vor.u32 %v7387_v50, %v6020_v43  ;;  %4016 = vmatpush.bf16.msrb.mxu3 %v6823_v48  ;;  %v7985_v48 = vpop.f32.mrf.mxu3 }
 0x2e8   :  { %v6276_v49 = vld [vmem:[#allocation6 + $0xbb8] sm:$0xf0] }
 0x2e9   :  { %v7515_v51 = vld [vmem:[#allocation6 + $0xd9c] sm:$0xf]  ;;  %v6279_v57 = vor.u32 %v7451_v45, %v6276_v49  ;;  %3978 = vmatpush.bf16.msrb.mxu0 %v6023_v56 }
 0x2ea   :  { %v6532_v52 = vld [vmem:[#allocation6 + $0xdb8] sm:$0xf0] }
 0x2eb   :  { %v7579_v53 = vld [vmem:[#allocation6 + $0xf9c] sm:$0xf]  ;;  %v6535_v58 = vor.u32 %v7515_v51, %v6532_v52  ;;  %3991 = vmatpush.bf16.msrb.mxu1 %v6279_v57 }
 0x2ec   :  { %v6788_v54 = vld [vmem:[#allocation6 + $0xfb8] sm:$0xf0] }
 0x2ed   :  { %v7379_v59 = vld [vmem:[#allocation6 + $0x95c] sm:$0xf]  ;;  %v6791_v62 = vor.u32 %v7579_v53, %v6788_v54  ;;  %4004 = vmatpush.bf16.msrb.mxu2 %v6535_v58  ;;  %v3728_v53 = vpop.f32.mrf.mxu0 }
 0x2ee   :  { %v5988_v60 = vld [vmem:[#allocation6 + $0x978] sm:$0xf0] }
 0x2ef   :  { %v7443_v61 = vld [vmem:[#allocation6 + $0xb5c] sm:$0xf]  ;;  %v5991_v5 = vor.u32 %v7379_v59, %v5988_v60  ;;  %4017 = vmatpush.bf16.msrb.mxu3 %v6791_v62  ;;  %v3741_v60 = vpop.f32.mrf.mxu1 }
 0x2f0   :  { %v6244_v63 = vld [vmem:[#allocation6 + $0xb78] sm:$0xf0] }
 0x2f1   :  { %v7507_v0 = vld [vmem:[#allocation6 + $0xd5c] sm:$0xf]  ;;  %v6247_v7 = vor.u32 %v7443_v61, %v6244_v63  ;;  %3979 = vmatpush.bf16.msrb.mxu0 %v5991_v5 }
 0x2f2   :  { %v6500_v1 = vld [vmem:[#allocation6 + $0xd78] sm:$0xf0] }
 0x2f3   :  { %v7571_v2 = vld [vmem:[#allocation6 + $0xf5c] sm:$0xf]  ;;  %v6503_v9 = vor.u32 %v7507_v0, %v6500_v1  ;;  %3992 = vmatpush.bf16.msrb.mxu1 %v6247_v7 }
 0x2f4   :  { %v6756_v3 = vld [vmem:[#allocation6 + $0xf78] sm:$0xf0] }
 0x2f5   :  { %v7371_v10 = vld [vmem:[#allocation6 + $0x91c] sm:$0xf]  ;;  %v6759_v12 = vor.u32 %v7571_v2, %v6756_v3  ;;  %4005 = vmatpush.bf16.msrb.mxu2 %v6503_v9 }
 0x2f6   :  { %v5956_v11 = vld [vmem:[#allocation6 + $0x938] sm:$0xf0] }
 0x2f7   :  { %v7435_v4 = vld [vmem:[#allocation6 + $0xb1c] sm:$0xf]  ;;  %v5959_v6 = vor.u32 %v7371_v10, %v5956_v11  ;;  %4018 = vmatpush.bf16.msrb.mxu3 %v6759_v12 }
 0x2f8   :  { %v6212_v13 = vld [vmem:[#allocation6 + $0xb38] sm:$0xf0] }
 0x2f9   :  { %v7499_v14 = vld [vmem:[#allocation6 + $0xd1c] sm:$0xf]  ;;  %v6215_v21 = vor.u32 %v7435_v4, %v6212_v13  ;;  %3980 = vmatpush.bf16.msrb.mxu0 %v5959_v6  ;;  %v3754_v4 = vpop.f32.mrf.mxu2 }
 0x2fa   :  { %v6468_v15 = vld [vmem:[#allocation6 + $0xd38] sm:$0xf0] }
 0x2fb   :  { %v7563_v16 = vld [vmem:[#allocation6 + $0xf1c] sm:$0xf]  ;;  %v6471_v18 = vor.u32 %v7499_v14, %v6468_v15  ;;  %3993 = vmatpush.bf16.msrb.mxu1 %v6215_v21 }
 0x2fc   :  { %v6724_v20 = vld [vmem:[#allocation6 + $0xf38] sm:$0xf0] }
 0x2fd   :  { %v7363_v19 = vld [vmem:[#allocation6 + $0x8dc] sm:$0xf]  ;;  %v6727_v25 = vor.u32 %v7563_v16, %v6724_v20  ;;  %4006 = vmatpush.bf16.msrb.mxu2 %v6471_v18  ;;  %v3767_v16 = vpop.f32.mrf.mxu3 }
 0x2fe   :  { %v5924_v22 = vld [vmem:[#allocation6 + $0x8f8] sm:$0xf0]  ;;  %v7608_v16 = vld [vmem:[#allocation9 + $0x80] sm:$0xff] }
 0x2ff   :  { %v7427_v23 = vld [vmem:[#allocation6 + $0xadc] sm:$0xf]  ;;  %v5927_v40 = vor.u32 %v7363_v19, %v5924_v22  ;;  %4019 = vmatpush.bf16.msrb.mxu3 %v6727_v25  ;;  %v7607_v25 = vld [vmem:[#allocation9 + $0x78] sm:$0xff] }
 0x300   :  { %v6180_v26 = vld [vmem:[#allocation6 + $0xaf8] sm:$0xf0] }
 0x301   :  { %v7491_v27 = vld [vmem:[#allocation6 + $0xcdc] sm:$0xf]  ;;  %v6183_v39 = vor.u32 %v7427_v23, %v6180_v26  ;;  %3981 = vmatpush.bf16.msrb.mxu0 %v5927_v40  ;;  %v7599_v23 = vld [vmem:[#allocation9 + $0x38] sm:$0xff] }
 0x302   :  { %v6436_v28 = vld [vmem:[#allocation6 + $0xcf8] sm:$0xf0]  ;;  %v7615_v26 = vld [vmem:[#allocation9 + $0xb8] sm:$0xff] }
 0x303   :  { %v7555_v35 = vld [vmem:[#allocation6 + $0xedc] sm:$0xf]  ;;  %v6439_v30 = vor.u32 %v7491_v27, %v6436_v28  ;;  %3994 = vmatpush.bf16.msrb.mxu1 %v6183_v39  ;;  %v7623_v27 = vld [vmem:[#allocation9 + $0xf8] sm:$0xff]  ;;  %v7597_v39 = vld [vmem:[#allocation9 + $0x28] sm:$0xff] }
 0x304   :  { %v6692_v29 = vld [vmem:[#allocation6 + $0xef8] sm:$0xf0] }
 0x305   :  { %v7355_v31 = vld [vmem:[#allocation6 + $0x89c] sm:$0xf]  ;;  %v6695_v8 = vor.u32 %v7555_v35, %v6692_v29  ;;  %4007 = vmatpush.bf16.msrb.mxu2 %v6439_v30  ;;  %v7605_v30 = vld [vmem:[#allocation9 + $0x68] sm:$0xff]  ;;  %v7999_v53 = vpop.f32.mrf.mxu3 }
 0x306   :  { %v5892_v32 = vld [vmem:[#allocation6 + $0x8b8] sm:$0xf0] }
 0x307   :  { %v7419_v33 = vld [vmem:[#allocation6 + $0xa9c] sm:$0xf]  ;;  %v5895_v52 = vor.u32 %v7355_v31, %v5892_v32  ;;  %4020 = vmatpush.bf16.msrb.mxu3 %v6695_v8  ;;  %v7613_v31 = vld [vmem:[#allocation9 + $0xa8] sm:$0xff]  ;;  %v7991_v8 = vpop.f32.mrf.mxu0 }
 0x308   :  { %v6148_v50 = vld [vmem:[#allocation6 + $0xab8] sm:$0xf0]  ;;  %v7621_v32 = vld [vmem:[#allocation9 + $0xe8] sm:$0xff] }
 0x309   :  { %v7483_v43 = vld [vmem:[#allocation6 + $0xc9c] sm:$0xf]  ;;  %v6151_v54 = vor.u32 %v7419_v33, %v6148_v50  ;;  %3982 = vmatpush.bf16.msrb.mxu0 %v5895_v52  ;;  %v7596_v33 = vld [vmem:[#allocation9 + $0x20] sm:$0xff]  ;;  %v7993_v50 = vpop.f32.mrf.mxu1  ;;  %v7619_v52 = vld [vmem:[#allocation9 + $0xd8] sm:$0xff] }
 0x30a   :  { %v6404_v45 = vld [vmem:[#allocation6 + $0xcb8] sm:$0xf0] }
 0x30b   :  { %v7547_v49 = vld [vmem:[#allocation6 + $0xe9c] sm:$0xf]  ;;  %v6407_v56 = vor.u32 %v7483_v43, %v6404_v45  ;;  %3995 = vmatpush.bf16.msrb.mxu1 %v6151_v54  ;;  %v7603_v43 = vld [vmem:[#allocation9 + $0x58] sm:$0xff] }
 0x30c   :  { %v6660_v51 = vld [vmem:[#allocation6 + $0xeb8] sm:$0xf0]  ;;  %v7611_v45 = vld [vmem:[#allocation9 + $0x98] sm:$0xff] }
 0x30d   :  { %v7347_v57 = vld [vmem:[#allocation6 + $0x85c] sm:$0xf]  ;;  %v6663_v61 = vor.u32 %v7547_v49, %v6660_v51  ;;  %4008 = vmatpush.bf16.msrb.mxu2 %v6407_v56  ;;  %v7995_v49 = vpop.f32.mrf.mxu2  ;;  %v7997_v51 = vld [vmem:[#allocation8] sm:$0xff]  ;;  %v3819_v4 = vpop.f32.mrf.mxu3 }
 0x30e   :  { %v5860_v58 = vld [vmem:[#allocation6 + $0x878] sm:$0xf0] }
 0x30f   :  { %v7411_v59 = vld [vmem:[#allocation6 + $0xa5c] sm:$0xf]  ;;  %v5863_v3 = vor.u32 %v7347_v57, %v5860_v58  ;;  %4021 = vmatpush.bf16.msrb.mxu3 %v6663_v61  ;;  %v3780_v56 = vpop.f32.mrf.mxu0  ;;  %v4035_v57 = vperm.slane %v7997_v51, 0  ;;  %v4036_v61 = vperm.slane %v7997_v51, 1 }
 0x310   :  { %v6116_v62 = vld [vmem:[#allocation6 + $0xa78] sm:$0xf0] }
 0x311   :  { %v7475_v63 = vld [vmem:[#allocation6 + $0xc5c] sm:$0xf]  ;;  %v6119_v5 = vor.u32 %v7411_v59, %v6116_v62  ;;  %3983 = vmatpush.bf16.msrb.mxu0 %v5863_v3  ;;  %v3793_v60 = vpop.f32.mrf.mxu1  ;;  %v4037_v62 = vperm.slane %v7997_v51, 2  ;;  %v7601_v3 = vld [vmem:[#allocation9 + $0x48] sm:$0xff] }
 0x312   :  { %v6372_v0 = vld [vmem:[#allocation6 + $0xc78] sm:$0xf0]  ;;  %v7625_v60 = vld [vmem:[#allocation9 + $0x108] sm:$0xff] }
 0x313   :  { %v7539_v1 = vld [vmem:[#allocation6 + $0xe5c] sm:$0xf]  ;;  %v6375_v7 = vor.u32 %v7475_v63, %v6372_v0  ;;  %3996 = vmatpush.bf16.msrb.mxu1 %v6119_v5  ;;  %v4038_v0 = vperm.slane %v7997_v51, 3  ;;  %v7609_v5 = vld [vmem:[#allocation9 + $0x88] sm:$0xff] }
 0x314   :  { %v6628_v2 = vld [vmem:[#allocation6 + $0xe78] sm:$0xf0] }
 0x315   :  { %v7339_v9 = vld [vmem:[#allocation6 + $0x81c] sm:$0xf]  ;;  %v6631_v12 = vor.u32 %v7539_v1, %v6628_v2  ;;  %4009 = vmatpush.bf16.msrb.mxu2 %v6375_v7  ;;  %v7593_v1 = vld [vmem:[#allocation9 + $0x8] sm:$0xff]  ;;  %v4051_v2 = vadd.f32 %v4035_v57, %v7921_v47  ;;  %v3806_v7 = vpop.f32.mrf.mxu2 }
 0x316   :  { %v5828_v10 = vld [vmem:[#allocation6 + $0x838] sm:$0xf0] }
 0x317   :  { %v7403_v11 = vld [vmem:[#allocation6 + $0xa1c] sm:$0xf]  ;;  %v5831_v21 = vor.u32 %v7339_v9, %v5828_v10  ;;  %4022 = vmatpush.bf16.msrb.mxu3 %v6631_v12  ;;  %v4052_v9 = vadd.f32 %v4036_v61, %v7934_v37  ;;  %v4053_v10 = vadd.f32 %v4037_v62, %v7947_v36  ;;  %v4054_v12 = vadd.f32 %v4038_v0, %v7960_v46  ;;  %v7616_v37 = vld [vmem:[#allocation9 + $0xc0] sm:$0xff]  ;;  %v7631_v36 = vld [vmem:[#allocation9 + $0x138] sm:$0xff] }
 0x318   :  { %v6084_v13 = vld [vmem:[#allocation6 + $0xa38] sm:$0xf0]  ;;  %v4106_v47 = vmax.f32 %v4051_v2, 0.0  ;;  %v7633_v61 = vld [vmem:[#allocation9 + $0x148] sm:$0xff]  ;;  %v7624_v2 = vld [vmem:[#allocation9 + $0x100] sm:$0xff] }
 0x319   :  { %v7467_v14 = vld [vmem:[#allocation6 + $0xc1c] sm:$0xf]  ;;  %v6087_v18 = vor.u32 %v7403_v11, %v6084_v13  ;;  %3984 = vmatpush.bf16.msrb.mxu0 %v5831_v21  ;;  %v7617_v11 = vld [vmem:[#allocation9 + $0xc8] sm:$0xff]  ;;  %v3740_v13 = vadd.f32 %v7981_v24, %v7979_v17  ;;  %v4109_v21 = vmax.f32 %v4054_v12, 0.0  ;;  %v7647_v17 = vld [vmem:[#allocation9 + $0x1b8] sm:$0xff] }
 0x31a   :  { %v6340_v15 = vld [vmem:[#allocation6 + $0xc38] sm:$0xf0]  ;;  %v4114_v46 = vpack.c.bf16 %v4106_v47, %v4106_v47 }
 0x31b   :  { %v7531_v20 = vld [vmem:[#allocation6 + $0xe1c] sm:$0xf]  ;;  %v6343_v19 = vor.u32 %v7467_v14, %v6340_v15  ;;  %3997 = vmatpush.bf16.msrb.mxu1 %v6087_v18  ;;  %v7592_v14 = vld [vmem:[#allocation9] sm:$0xff]  ;;  %v7639_v18 = vld [vmem:[#allocation9 + $0x178] sm:$0xff] }
 0x31c   :  { %v6596_v6 = vld [vmem:[#allocation6 + $0xe38] sm:$0xf0]  ;;  %3985 = vmatmul.bf16.vlgmr.msrb.gmra.mxu0 %v7892_v41  ;;  %v7604_v41 = vld [vmem:[#allocation9 + $0x60] sm:$0xff] }
 0x31d   :  { %v6599_v22 = vor.u32 %v7531_v20, %v6596_v6  ;;  %4010 = vmatpush.bf16.msrb.mxu2 %v6343_v19  ;;  %4638 = vmatpush.bf16.msra.mxu0 %v7599_v23  ;;  %v7598_v28 = vld [vmem:[#allocation9 + $0x30] sm:$0xff]  ;;  %v7600_v15 = vld [vmem:[#allocation9 + $0x40] sm:$0xff]  ;;  %v4107_v20 = vmax.f32 %v4052_v9, 0.0  ;;  %v4108_v6 = vmax.f32 %v4053_v10, 0.0  ;;  %v3753_v19 = vadd.f32 %v7983_v34, %v3740_v13 }
 0x31e   :  { %v7606_v35 = vld [vmem:[#allocation9 + $0x70] sm:$0xff]  ;;  %3998 = vmatmul.bf16.vlgmr.msrb.gmra.mxu1 %v7896_v44  ;;  %v7612_v44 = vld [vmem:[#allocation9 + $0xa0] sm:$0xff] }
 0x31f   :  { %4023 = vmatpush.bf16.msrb.mxu3 %v6599_v22  ;;  %4651 = vmatpush.bf16.msra.mxu1 %v7607_v25  ;;  %v7614_v29 = vld [vmem:[#allocation9 + $0xb0] sm:$0xff]  ;;  %v4115_v24 = vpack.c.bf16 %v4107_v20, %v4107_v20  ;;  %v4116_v22 = vpack.c.bf16 %v4108_v6, %v4108_v6  ;;  %v4117_v25 = vpack.c.bf16 %v4109_v21, %v4109_v21  ;;  %v7640_v9 = vld [vmem:[#allocation9 + $0x180] sm:$0xff]  ;;  %v4041_v6 = vperm.slane %v7997_v51, 6 }
 0x320   :  { %v7622_v40 = vld [vmem:[#allocation9 + $0xf0] sm:$0xff]  ;;  %4011 = vmatmul.bf16.vlgmr.msrb.gmra.mxu2 %v7890_v38  ;;  %v7620_v38 = vld [vmem:[#allocation9 + $0xe0] sm:$0xff] }
 0x321   :  { %4664 = vmatpush.bf16.msra.mxu2 %v7615_v26  ;;  %4639 = vmatpush.bf16.msra.mxu0 %v7598_v28  ;;  %v7594_v54 = vld [vmem:[#allocation9 + $0x10] sm:$0xff]  ;;  %v7629_v28 = vld [vmem:[#allocation9 + $0x128] sm:$0xff] }
 0x322   :  { %4024 = vmatmul.bf16.vlgmr.msrb.gmra.mxu3 %v7894_v42  ;;  %v7595_v42 = vld [vmem:[#allocation9 + $0x18] sm:$0xff]  ;;  %v7602_v58 = vld [vmem:[#allocation9 + $0x50] sm:$0xff] }
 0x323   :  { %4677 = vmatpush.bf16.msra.mxu3 %v7623_v27  ;;  %4652 = vmatpush.bf16.msra.mxu1 %v7606_v35  ;;  %v7610_v59 = vld [vmem:[#allocation9 + $0x90] sm:$0xff]  ;;  %v3766_v27 = vadd.f32 %v7985_v48, %v3753_v19  ;;  %v7637_v35 = vld [vmem:[#allocation9 + $0x168] sm:$0xff] }
 0x324   :  { %v7618_v63 = vld [vmem:[#allocation9 + $0xd0] sm:$0xff] }
 0x325   :  { %4665 = vmatpush.bf16.msra.mxu2 %v7614_v29  ;;  %4640 = vmatpush.bf16.msra.mxu0 %v7597_v39  ;;  %v7630_v23 = vld [vmem:[#allocation9 + $0x130] sm:$0xff]  ;;  %v3779_v29 = vadd.f32 %v7991_v8, %v3766_v27  ;;  %v7628_v39 = vld [vmem:[#allocation9 + $0x120] sm:$0xff]  ;;  %v3869_v8 = vpop.f32.mrf.mxu3  ;;  %v7651_v27 = vld [vmem:[#allocation9 + $0x1d8] sm:$0xff] }
 0x326   :  { %v7638_v26 = vld [vmem:[#allocation9 + $0x170] sm:$0xff] }
 0x327   :  { %4678 = vmatpush.bf16.msra.mxu3 %v7622_v40  ;;  %4653 = vmatpush.bf16.msra.mxu1 %v7605_v30  ;;  %v7646_v34 = vld [vmem:[#allocation9 + $0x1b0] sm:$0xff]  ;;  %v7645_v40 = vld [vmem:[#allocation9 + $0x1a8] sm:$0xff]  ;;  %v3830_v30 = vpop.f32.mrf.mxu0  ;;  %v3792_v48 = vadd.f32 %v7993_v50, %v3779_v29 }
 0x328   :  { %v7634_v56 = vld [vmem:[#allocation9 + $0x150] sm:$0xff] }
 0x329   :  { %4666 = vmatpush.bf16.msra.mxu2 %v7613_v31  ;;  %4641 = vmatpush.bf16.msra.mxu0 %v7596_v33  ;;  %v7636_v31 = vld [vmem:[#allocation9 + $0x160] sm:$0xff] }
 0x32a   :  { %v7644_v33 = vld [vmem:[#allocation9 + $0x1a0] sm:$0xff] }
 0x32b   :  { %4679 = vmatpush.bf16.msra.mxu3 %v7621_v32  ;;  %4654 = vmatpush.bf16.msra.mxu1 %v7604_v41  ;;  %v3843_v32 = vpop.f32.mrf.mxu1  ;;  %v7627_v41 = vld [vmem:[#allocation9 + $0x118] sm:$0xff] }
 0x32c   :  { %v3844_v7 = vadd.f32 %v3843_v32, %v3830_v30  ;;  %v7648_v32 = vld [vmem:[#allocation9 + $0x1c0] sm:$0xff] }
 0x32d   :  { %4667 = vmatpush.bf16.msra.mxu2 %v7612_v44  ;;  %4642 = vmatpush.bf16.msra.mxu0 %v7595_v42  ;;  %v7635_v44 = vld [vmem:[#allocation9 + $0x158] sm:$0xff]  ;;  %v3805_v42 = vadd.f32 %v7995_v49, %v3792_v48  ;;  %v3871_v0 = vpop.f32.mrf.mxu3 }
 0x32e   :  { %v7666_v0 = vld [vmem:[#allocation11] ss:$0 sm:$0xff] }
 0x32f   :  { %4680 = vmatpush.bf16.msra.mxu3 %v7620_v38  ;;  %4655 = vmatpush.bf16.msra.mxu1 %v7603_v43  ;;  %v3856_v38 = vpop.f32.mrf.mxu2  ;;  %v7643_v43 = vld [vmem:[#allocation9 + $0x198] sm:$0xff]  ;;  %v3818_v57 = vadd.f32 %v7999_v53, %v3805_v42  ;;  %v7632_v53 = vld [vmem:[#allocation9 + $0x140] sm:$0xff] }
 0x331   :  { %4668 = vmatpush.bf16.msra.mxu2 %v7611_v45  ;;  %4643 = vmatpush.bf16.msra.mxu0 %v7594_v54  ;;  %v7626_v45 = vld [vmem:[#allocation9 + $0x110] sm:$0xff]  ;;  %v4039_v54 = vperm.slane %v7997_v51, 4 }
 0x333   :  { %4681 = vmatpush.bf16.msra.mxu3 %v7619_v52  ;;  %4656 = vmatpush.bf16.msra.mxu1 %v7602_v58  ;;  %v3832_v52 = vpop.f32.mrf.mxu0  ;;  %v3845_v50 = vpop.f32.mrf.mxu1  ;;  %v4040_v58 = vperm.slane %v7997_v51, 5  ;;  %v4055_v49 = vadd.f32 %v4039_v54, %v7973_v55 }
 0x334   :  { %v4042_v50 = vperm.slane %v7997_v51, 7 }
 0x335   :  { %4669 = vmatpush.bf16.msra.mxu2 %v7610_v59  ;;  %4644 = vmatpush.bf16.msra.mxu0 %v7593_v1  ;;  %v7642_v59 = vld [vmem:[#allocation9 + $0x190] sm:$0xff]  ;;  %v7641_v1 = vld [vmem:[#allocation9 + $0x188] sm:$0xff] }
 0x337   :  { %4682 = vmatpush.bf16.msra.mxu3 %v7618_v63  ;;  %4657 = vmatpush.bf16.msra.mxu1 %v7601_v3  ;;  %v3858_v62 = vpop.f32.mrf.mxu2  ;;  %v4056_v63 = vadd.f32 %v4040_v58, %v3818_v57  ;;  %v4110_v3 = vmax.f32 %v4055_v49, 0.0 }
 0x339   :  { %4670 = vmatpush.bf16.msra.mxu2 %v7609_v5  ;;  %4645 = vmatpush.bf16.msra.mxu0 %v7592_v14  ;;  %v4111_v5 = vmax.f32 %v4056_v63, 0.0  ;;  %v4118_v10 = vpack.c.bf16 %v4110_v3, %v4110_v3 }
 0x33b   :  { %4683 = vmatpush.bf16.msra.mxu3 %v7617_v11  ;;  %4658 = vmatpush.bf16.msra.mxu1 %v7600_v15  ;;  %v4119_v55 = vpack.c.bf16 %v4111_v5, %v4111_v5  ;;  %v3857_v11 = vadd.f32 %v3856_v38, %v3844_v7  ;;  %v3882_v12 = vpop.f32.mrf.mxu0 }
 0x33c   :  { %4646 = vmatmul.bf16.vlgmr.msra.gmra.mxu0 %v4114_v46  ;;  %v3895_v14 = vpop.f32.mrf.mxu1  ;;  %v7654_v46 = vld [vmem:[#allocation9 + $0x1f0] sm:$0xff] }
 0x33d   :  { %4671 = vmatpush.bf16.msra.mxu2 %v7608_v16  ;;  %4690 = vmatpush.bf16.msrb.mxu0 %v7631_v36  ;;  %v3870_v4 = vadd.f32 %v3869_v8, %v3857_v11 }
 0x33e   :  { %4659 = vmatmul.bf16.vlgmr.msra.gmra.mxu1 %v4115_v24 }
 0x33f   :  { %4684 = vmatpush.bf16.msra.mxu3 %v7616_v37  ;;  %4703 = vmatpush.bf16.msrb.mxu1 %v7639_v18  ;;  %v3883_v13 = vadd.f32 %v3882_v12, %v3870_v4  ;;  %v7655_v37 = vld [vmem:[#allocation9 + $0x1f8] sm:$0xff] }
 0x340   :  { %4672 = vmatmul.bf16.vlgmr.msra.gmra.mxu2 %v4116_v22  ;;  %v7653_v22 = vld [vmem:[#allocation9 + $0x1e8] sm:$0xff] }
 0x341   :  { %4716 = vmatpush.bf16.msrb.mxu2 %v7647_v17  ;;  %4691 = vmatpush.bf16.msrb.mxu0 %v7630_v23  ;;  %v3896_v47 = vadd.f32 %v3895_v14, %v3883_v13 }
 0x342   :  { %4685 = vmatmul.bf16.vlgmr.msra.gmra.mxu3 %v4117_v25 }
 0x343   :  { %4704 = vmatpush.bf16.msrb.mxu1 %v7638_v26  ;;  %v3884_v21 = vpop.f32.mrf.mxu0  ;;  %4729 = vmatpush.bf16.msrb.mxu3 %v7655_v37  ;;  %v7652_v26 = vld [vmem:[#allocation9 + $0x1e0] sm:$0xff]  ;;  %v4742_v37 = vlaneseq }
 0x344   :  { %v3908_v15 = vpop.f32.mrf.mxu2  ;;  %v3897_v18 = vpop.f32.mrf.mxu1 }
 0x345   :  { %4717 = vmatpush.bf16.msrb.mxu2 %v7646_v34  ;;  %4692 = vmatpush.bf16.msrb.mxu0 %v7629_v28  ;;  %v3909_v16 = vadd.f32 %v3908_v15, %v3896_v47 }
 0x346   :  { %v3921_v20 = vpop.f32.mrf.mxu3 }
 0x347   :  { %4705 = vmatpush.bf16.msrb.mxu1 %v7637_v35  ;;  %v3922_v36 = vadd.f32 %v3921_v20, %v3909_v16  ;;  %4730 = vmatpush.bf16.msrb.mxu3 %v7654_v46  ;;  %v7650_v35 = vld [vmem:[#allocation9 + $0x1d0] sm:$0xff] }
 0x349   :  { %4718 = vmatpush.bf16.msrb.mxu2 %v7645_v40  ;;  %4693 = vmatpush.bf16.msrb.mxu0 %v7628_v39  ;;  %v4057_v19 = vadd.f32 %v4041_v6, %v3922_v36  ;;  %v7649_v39 = vld [vmem:[#allocation9 + $0x1c8] sm:$0xff]  ;;  %v4743_v36 = vand.u32 127, %v4742_v37 }
 0x34b   :  { %4706 = vmatpush.bf16.msrb.mxu1 %v7636_v31  ;;  %v4112_v17 = vmax.f32 %v4057_v19, 0.0  ;;  %4731 = vmatpush.bf16.msrb.mxu3 %v7653_v22  ;;  %vm4744_vm0 = vcmp.lt.s32.totalorder %v4743_v36, 100 }
 0x34c   :  { %v3910_v24 = vpop.f32.mrf.mxu2 }
 0x34d   :  { %4719 = vmatpush.bf16.msrb.mxu2 %v7644_v33  ;;  %4694 = vmatpush.bf16.msrb.mxu0 %v7627_v41  ;;  %v4120_v23 = vpack.c.bf16 %v4112_v17, %v4112_v17 }
 0x34e   :  { %v3923_v25 = vpop.f32.mrf.mxu3 }
 0x34f   :  { %4707 = vmatpush.bf16.msrb.mxu1 %v7635_v44  ;;  %4732 = vmatpush.bf16.msrb.mxu3 %v7652_v26 }
 0x351   :  { %4720 = vmatpush.bf16.msrb.mxu2 %v7643_v43  ;;  %4695 = vmatpush.bf16.msrb.mxu0 %v7626_v45 }
 0x353   :  { %4708 = vmatpush.bf16.msrb.mxu1 %v7634_v56  ;;  %4733 = vmatpush.bf16.msrb.mxu3 %v7651_v27 }
 0x355   :  { %4721 = vmatpush.bf16.msrb.mxu2 %v7642_v59  ;;  %4696 = vmatpush.bf16.msrb.mxu0 %v7625_v60 }
 0x357   :  { %4709 = vmatpush.bf16.msrb.mxu1 %v7633_v61  ;;  %4734 = vmatpush.bf16.msrb.mxu3 %v7650_v35 }
 0x359   :  { %4722 = vmatpush.bf16.msrb.mxu2 %v7641_v1  ;;  %4697 = vmatpush.bf16.msrb.mxu0 %v7624_v2 }
 0x35a   :  { %v3934_v34 = vpop.f32.mrf.mxu0 }
 0x35b   :  { %4710 = vmatpush.bf16.msrb.mxu1 %v7632_v53  ;;  %4735 = vmatpush.bf16.msrb.mxu3 %v7649_v39 }
 0x35c   :  { %4698 = vmatmul.bf16.vlgmr.msrb.gmra.mxu0 %v4118_v10  ;;  %v3947_v28 = vpop.f32.mrf.mxu1 }
 0x35d   :  { %4723 = vmatpush.bf16.msrb.mxu2 %v7640_v9  ;;  %v3948_v41 = vadd.f32 %v3947_v28, %v3934_v34 }
 0x35e   :  { %4711 = vmatmul.bf16.vlgmr.msrb.gmra.mxu1 %v4119_v55 }
 0x35f   :  { %4736 = vmatpush.bf16.msrb.mxu3 %v7648_v32 }
 0x360   :  { %4724 = vmatmul.bf16.vlgmr.msrb.gmra.mxu2 %v4120_v23 }
 0x362   :  { %v3936_v30 = vpop.f32.mrf.mxu0 }
 0x364   :  { %v3960_v29 = vpop.f32.mrf.mxu2  ;;  %v3949_v31 = vpop.f32.mrf.mxu1 }
 0x365   :  { %v3961_v44 = vadd.f32 %v3960_v29, %v3948_v41 }
 0x366   :  { %v3973_v40 = vpop.f32.mrf.mxu3 }
 0x367   :  { %v3974_v38 = vadd.f32 %v3973_v40, %v3961_v44 }
 0x36c   :  { %v3962_v48 = vpop.f32.mrf.mxu2 }
 0x36e   :  { %v3975_v33 = vpop.f32.mrf.mxu3 }
 0x399   :  { %v3986_v42 = vpop.f32.mrf.mxu0 }
 0x39a   :  { %v3987_v43 = vadd.f32 %v3986_v42, %v3974_v38 }
 0x39b   :  { %v3999_v8 = vpop.f32.mrf.mxu1 }
 0x39c   :  { %v4000_v45 = vadd.f32 %v3999_v8, %v3987_v43 }
 0x3a1   :  { %v3988_v57 = vpop.f32.mrf.mxu0 }
 0x3a3   :  { %v4012_v52 = vpop.f32.mrf.mxu2  ;;  %v4001_v58 = vpop.f32.mrf.mxu1 }
 0x3a4   :  { %v4013_v54 = vadd.f32 %v4012_v52, %v4000_v45 }
 0x3a5   :  { %v4025_v56 = vpop.f32.mrf.mxu3 }
 0x3a6   :  { %v4026_v59 = vadd.f32 %v4025_v56, %v4013_v54 }
 0x3a8   :  { %v4058_v60 = vadd.f32 %v4042_v50, %v4026_v59 }
 0x3aa   :  { %v4113_v49 = vmax.f32 %v4058_v60, 0.0 }
 0x3ab   :  { %v4014_v61 = vpop.f32.mrf.mxu2 }
 0x3ac   :  { %v4121_v62 = vpack.c.bf16 %v4113_v49, %v4113_v49 }
 0x3ad   :  { %v4027_v63 = vpop.f32.mrf.mxu3 }
 0x3ae   :  { %4737 = vmatmul.bf16.vlgmr.msrb.gmra.mxu3 %v4121_v62 }
 0x3b9   :  { %v4647_v1 = vpop.f32.mrf.mxu0 }
 0x3ba   :  { %v4648_v2 = vadd.f32 %v7666_v0, %v4647_v1 }
 0x3bb   :  { %v4660_v3 = vpop.f32.mrf.mxu1 }
 0x3bc   :  { %v4661_v53 = vadd.f32 %v4660_v3, %v4648_v2 }
 0x3c1   :  { %v4649_v10 = vpop.f32.mrf.mxu0 }
 0x3c3   :  { %v4673_v5 = vpop.f32.mrf.mxu2  ;;  %v4662_v55 = vpop.f32.mrf.mxu1 }
 0x3c4   :  { %v4674_v7 = vadd.f32 %v4673_v5, %v4661_v53 }
 0x3c5   :  { %v4686_v9 = vpop.f32.mrf.mxu3 }
 0x3c6   :  { %v4687_v51 = vadd.f32 %v4686_v9, %v4674_v7 }
 0x3cb   :  { %v4675_v11 = vpop.f32.mrf.mxu2 }
 0x3cd   :  { %v4688_v4 = vpop.f32.mrf.mxu3 }
 0x3d9   :  { %v4699_v12 = vpop.f32.mrf.mxu0 }
 0x3da   :  { %v4700_v13 = vadd.f32 %v4699_v12, %v4687_v51 }
 0x3db   :  { %v4712_v14 = vpop.f32.mrf.mxu1 }
 0x3dc   :  { %v4713_v47 = vadd.f32 %v4712_v14, %v4700_v13 }
 0x3e1   :  { %v4701_v15 = vpop.f32.mrf.mxu0 }
 0x3e3   :  { %v4714_v16 = vpop.f32.mrf.mxu1  ;;  %v4725_v20 = vpop.f32.mrf.mxu2 }
 0x3e4   :  { %v4726_v21 = vadd.f32 %v4725_v20, %v4713_v47 }
 0x3eb   :  { %v4727_v6 = vpop.f32.mrf.mxu2 }
 0x431   :  { %v4738_v18 = vpop.f32.mrf.mxu3 }
 0x432   :  { %v4739_v19 = vadd.f32 %v4738_v18, %v4726_v21 }
 0x434   :  { %v4745_v46 = vsel %vm4744_vm0, %v4739_v19, -inf }
 0x435   :  { %4746 = vmax.xlane.f32.xlu0 %v4745_v46 }
 0x439   :  { %v4740_v17 = vpop.f32.mrf.mxu3 }
 0x4a8   :  { %v4747_v24 = vpop.xlane.xlu0 %4746 }
 0x4a9   :  { %v4748_v22 = vsub.f32 %v4745_v46, %v4747_v24 }
 0x4ab   :  { %v4749_v23 = vmul.f32 1.442695, %v4748_v22 }
 0x4ad   :  { %7667 = vpow2.f32 %v4749_v23 }
 0x4b3   :  { %v7668_v25 = vpop.eup %7667 }
 0x4b4   :  { %4751 = vadd.xlane.f32.xlu0 %v7668_v25 }
 0x527   :  { %v4752_v26 = vpop.xlane.xlu0 %4751 }
 0x528   :  { %7669 = vlog2.f32 %v4752_v26 }
 0x52e   :  { %v7670_v27 = vpop.eup %7669 }
 0x52f   :  { %v4754_v34 = vmul.f32 0.6931472, %v7670_v27 }
 0x531   :  { %v4755_v28 = vsub.f32 %v4748_v22, %v4754_v34 }
 0x533   :  { %4756 = vst [vmem:[#allocation12] sm:$0xff] %v4755_v28 }
 0x534   :  { %4767 = dma.vmem_to_hbm [thread:$0]  %s4763_s4, 128, %s4765_s21, [#allocation5]  }
 0x535   :  { %7821 = dma.done.wait [#allocation5], 128  }
 0x536   :  { %7822 = vsyncadd [#allocation5], 4294967168 }
 0x537   :  { %4772 = vsyncpa [#allocation4], 1 }
 0x538   :  { %4773 = vsyncpa [#allocation7], 1 }
 0x539   :  { %4774 = vsyncpa [#allocation10], 1 }
 0x53a   :  { %4775 = vsyncpa [#allocation5], 1 }

</bundles_post_ra>
